<compile_context>
chip_gen: v7x
topology: tpu7x:2x2x1
jax: 0.10.0
libtpu: 0.0.40
codegen_flags: <defaults>
</compile_context>

<pallas_src>
import functools
import math

import jax
import jax.numpy as jnp
from jax.experimental import pallas as pl
from jax.experimental.pallas import tpu as pltpu

try:  # size tiles / pipelining to the actual generation (v5e/v6e: 128 MiB, v7x: 64 MiB/TC)
    _VMEM_LIMIT = int(min(pltpu.get_tpu_info().vmem_capacity_bytes * 3 // 4,
                          96 * 1024 * 1024))
except Exception:
    _VMEM_LIMIT = 48 * 1024 * 1024


# ----------------------------------------------------------------------------
# small helpers
# ----------------------------------------------------------------------------
def _round_up(x, m):
    return (x + m - 1) // m * m


def _pick_tile(total, cap):
    """Largest multiple of 128 that divides `total` (itself a multiple of 128) and <= cap."""
    best = 128
    for t in range(128, min(total, cap) + 1, 128):
        if total % t == 0:
            best = t
    return best


def _row_tile(M, cap):
    if M > cap:
        return cap
    if M >= 128 and M % 16 == 0:      # free 2nd grid step for the v7x megacore
        return M // 2
    return M


def _pad2(a, r, c):
    if a.shape == (r, c):
        return a
    return jnp.pad(a, ((0, r - a.shape[0]), (0, c - a.shape[1])))


def _flat(x):
    lead = x.shape[:-1]
    m = int(math.prod(lead)) if lead else 1
    return x.reshape(m, x.shape[-1]), lead, m


def _ln_f32(x, g, b, eps):
    mean = jnp.mean(x, axis=-1, keepdims=True)
    var = jnp.mean(jnp.square(x - mean), axis=-1, keepdims=True)
    return (x - mean) * jax.lax.rsqrt(var + eps) * g + b


# ----------------------------------------------------------------------------
# Pallas kernels
# ----------------------------------------------------------------------------
def _linear_kernel(x_ref, w_ref, b_ref, o_ref, acc_ref):
    @pl.when(pl.program_id(2) == 0)
    def _():
        acc_ref[...] = jnp.zeros_like(acc_ref)

    acc_ref[...] += jnp.dot(x_ref[...], w_ref[...],
                            preferred_element_type=jnp.float32)

    @pl.when(pl.program_id(2) == pl.num_programs(2) - 1)
    def _():
        o_ref[...] = (acc_ref[...] + b_ref[...].astype(jnp.float32)).astype(o_ref.dtype)


def _layernorm_kernel(x_ref, g_ref, b_ref, o_ref, *, eps):
    y = _ln_f32(x_ref[...].astype(jnp.float32),
                g_ref[...].astype(jnp.float32),
                b_ref[...].astype(jnp.float32), eps)
    o_ref[...] = y.astype(o_ref.dtype)


def _ln_linear_kernel(x_ref, g_ref, bln_ref, w_ref, b_ref, o_ref, *, eps):
    xn = _ln_f32(x_ref[...].astype(jnp.float32),
                 g_ref[...].astype(jnp.float32),
                 bln_ref[...].astype(jnp.float32), eps)
    y = jnp.dot(xn.astype(w_ref.dtype), w_ref[...],
                preferred_element_type=jnp.float32)
    o_ref[...] = (y + b_ref[...].astype(jnp.float32)).astype(o_ref.dtype)


def _ln_mlp_kernel(x_ref, g_ref, bln_ref, w1_ref, b1_ref, w2_ref, b2_ref, o_ref,
                   xn_ref, acc_ref, *, eps):
    # fused: x + proj(quick_gelu(fc(LN(x)))) with the hidden (4D) dim streamed over
    # grid axis 1 ("arbitrary"); the (tm, 4D) intermediate never exists at once.
    j = pl.program_id(1)

    @pl.when(j == 0)
    def _():
        x = x_ref[...].astype(jnp.float32)
        xn = _ln_f32(x, g_ref[...].astype(jnp.float32),
                     bln_ref[...].astype(jnp.float32), eps)
        xn_ref[...] = xn.astype(jnp.bfloat16)
        acc_ref[...] = x + b2_ref[...].astype(jnp.float32)   # residual + proj bias (once)

    h = jnp.dot(xn_ref[...], w1_ref[...],
                preferred_element_type=jnp.float32) + b1_ref[...].astype(jnp.float32)
    h = h * jax.nn.sigmoid(1.702 * h)                         # QuickGELU
    acc_ref[...] += jnp.dot(h.astype(w2_ref.dtype), w2_ref[...],
                            preferred_element_type=jnp.float32)

    @pl.when(j == pl.num_programs(1) - 1)
    def _():
        o_ref[...] = acc_ref[...].astype(o_ref.dtype)


def _attn_outproj_kernel(qkv_ref, res_ref, w_ref, b_ref, o_ref, ctx_ref,
                         *, num_heads, scale, causal):
    # One batch element per grid step.  Heads are read as 64-wide lane slices of the
    # (S, 3D) QKV block (no HBM transposes), the per-head context is written into a
    # lane-dense (S, D) VMEM scratch, and the out-projection + residual is fused here.
    S, D = ctx_ref.shape
    hd = D // num_heads
    if causal:
        row = jax.lax.broadcasted_iota(jnp.int32, (S, S), 0)
        col = jax.lax.broadcasted_iota(jnp.int32, (S, S), 1)
        causal_mask = row >= col
    for h in range(num_heads):
        q = qkv_ref[0, :, h * hd:(h + 1) * hd]                       # (S, hd) bf16
        k = qkv_ref[0, :, D + h * hd:D + (h + 1) * hd]
        v = qkv_ref[0, :, 2 * D + h * hd:2 * D + (h + 1) * hd]
        s = jnp.dot(q, k.T, preferred_element_type=jnp.float32) * scale
        if causal:
            s = jnp.where(causal_mask, s, jnp.float32(-1e30))
        s = s - jnp.max(s, axis=-1, keepdims=True)
        p = jnp.exp(s)
        p = p * pl.reciprocal(jnp.sum(p, axis=-1, keepdims=True), approx=True)
        o_h = jnp.dot(p.astype(v.dtype), v, preferred_element_type=jnp.float32)
        ctx_ref[:, h * hd:(h + 1) * hd] = o_h.astype(ctx_ref.dtype)
    y = jnp.dot(ctx_ref[...], w_ref[...], preferred_element_type=jnp.float32)
    y = y + b_ref[...].astype(jnp.float32) + res_ref[0].astype(jnp.float32)
    o_ref[0] = y.astype(o_ref.dtype)


# ----------------------------------------------------------------------------
# kernel wrappers
# ----------------------------------------------------------------------------
def linear(x, w, b=None, out_dtype=jnp.bfloat16):
    """y = x @ w + b; tiled bf16 MXU matmul with f32 accumulation (K never over-padded)."""
    x2, lead, M = _flat(x)
    K, N = w.shape
    Kp, Np = _round_up(K, 128), _round_up(N, 128)
    tk = _pick_tile(Kp, 768)
    tn = _pick_tile(Np, 512)
    tm = _row_tile(M, 256)
    Mp = _round_up(M, tm)
    bv = b if b is not None else jnp.zeros((N,), jnp.float32)

    out = pl.pallas_call(
        _linear_kernel,
        grid=(Mp // tm, Np // tn, Kp // tk),
        in_specs=[pl.BlockSpec((tm, tk), lambda i, j, k: (i, k)),
                  pl.BlockSpec((tk, tn), lambda i, j, k: (k, j)),
                  pl.BlockSpec((1, tn), lambda i, j, k: (0, j))],
        out_specs=pl.BlockSpec((tm, tn), lambda i, j, k: (i, j)),
        out_shape=jax.ShapeDtypeStruct((Mp, Np), out_dtype),
        scratch_shapes=[pltpu.VMEM((tm, tn), jnp.float32)],
        compiler_params=pltpu.CompilerParams(
            dimension_semantics=("parallel", "parallel", "arbitrary"),
            vmem_limit_bytes=_VMEM_LIMIT),
    )(_pad2(x2.astype(jnp.bfloat16), Mp, Kp),
      _pad2(w.astype(jnp.bfloat16), Kp, Np),              # no-op: weights pre-cast/padded
      _pad2(bv.astype(jnp.float32).reshape(1, N), 1, Np))
    return out[:M, :N].reshape(*lead, N)


def layernorm(x, g, b, eps=1e-5):
    x2, lead, M = _flat(x)
    D = x2.shape[-1]
    tm = _row_tile(M, 512)
    Mp = _round_up(M, tm)
    out = pl.pallas_call(
        functools.partial(_layernorm_kernel, eps=eps),
        grid=(Mp // tm,),
        in_specs=[pl.BlockSpec((tm, D), lambda i: (i, 0)),
                  pl.BlockSpec((1, D), lambda i: (0, 0)),
                  pl.BlockSpec((1, D), lambda i: (0, 0))],
        out_specs=pl.BlockSpec((tm, D), lambda i: (i, 0)),
        out_shape=jax.ShapeDtypeStruct((Mp, D), jnp.bfloat16),
        compiler_params=pltpu.CompilerParams(
            dimension_semantics=("parallel",), vmem_limit_bytes=_VMEM_LIMIT),
    )(_pad2(x2.astype(jnp.bfloat16), Mp, D),
      g.reshape(1, D).astype(jnp.float32),
      b.reshape(1, D).astype(jnp.float32))
    return out[:M].reshape(*lead, D)


def ln_linear(x, g, bln, w, b=None, eps=1e-5, out_dtype=jnp.bfloat16):
    """Fused LayerNorm + (x @ w + b); full-K block, weight resident (constant index map)."""
    x2, lead, M = _flat(x)
    K, N = w.shape
    Np = _round_up(N, 128)
    tm = _row_tile(M, 256)
    Mp = _round_up(M, tm)
    bv = b if b is not None else jnp.zeros((N,), jnp.float32)
    out = pl.pallas_call(
        functools.partial(_ln_linear_kernel, eps=eps),
        grid=(Mp // tm,),
        in_specs=[pl.BlockSpec((tm, K), lambda i: (i, 0)),
                  pl.BlockSpec((1, K), lambda i: (0, 0)),
                  pl.BlockSpec((1, K), lambda i: (0, 0)),
                  pl.BlockSpec((K, Np), lambda i: (0, 0)),
                  pl.BlockSpec((1, Np), lambda i: (0, 0))],
        out_specs=pl.BlockSpec((tm, Np), lambda i: (i, 0)),
        out_shape=jax.ShapeDtypeStruct((Mp, Np), out_dtype),
        compiler_params=pltpu.CompilerParams(
            dimension_semantics=("parallel",), vmem_limit_bytes=_VMEM_LIMIT),
    )(_pad2(x2.astype(jnp.bfloat16), Mp, K),
      g.reshape(1, K).astype(jnp.float32),
      bln.reshape(1, K).astype(jnp.float32),
      _pad2(w.astype(jnp.bfloat16), K, Np),
      _pad2(bv.astype(jnp.float32).reshape(1, N), 1, Np))
    return out[:M, :N].reshape(*lead, N)


def ln_mlp(x, g, bln, w1, b1, w2, b2, eps=1e-5):
    """Fused pre-LN transformer MLP block: x + proj(quick_gelu(fc(LN(x)))).
    The hidden (4D) dimension is streamed over grid axis 1 (bounded VMEM on v7x)."""
    x2, lead, M = _flat(x)
    K, H4 = w1.shape
    t4 = _pick_tile(H4, 1536)
    tm = _row_tile(M, 256)
    Mp = _round_up(M, tm)
    out = pl.pallas_call(
        functools.partial(_ln_mlp_kernel, eps=eps),
        grid=(Mp // tm, H4 // t4),
        in_specs=[pl.BlockSpec((tm, K), lambda i, j: (i, 0)),
                  pl.BlockSpec((1, K), lambda i, j: (0, 0)),
                  pl.BlockSpec((1, K), lambda i, j: (0, 0)),
                  pl.BlockSpec((K, t4), lambda i, j: (0, j)),
                  pl.BlockSpec((1, t4), lambda i, j: (0, j)),
                  pl.BlockSpec((t4, K), lambda i, j: (j, 0)),
                  pl.BlockSpec((1, K), lambda i, j: (0, 0))],
        out_specs=pl.BlockSpec((tm, K), lambda i, j: (i, 0)),
        out_shape=jax.ShapeDtypeStruct((Mp, K), jnp.bfloat16),
        scratch_shapes=[pltpu.VMEM((tm, K), jnp.bfloat16),
                        pltpu.VMEM((tm, K), jnp.float32)],
        compiler_params=pltpu.CompilerParams(
            dimension_semantics=("parallel", "arbitrary"),
            vmem_limit_bytes=_VMEM_LIMIT),
    )(_pad2(x2.astype(jnp.bfloat16), Mp, K),
      g.reshape(1, K).astype(jnp.float32),
      bln.reshape(1, K).astype(jnp.float32),
      w1.astype(jnp.bfloat16), b1.astype(jnp.float32).reshape(1, H4),
      w2.astype(jnp.bfloat16), b2.astype(jnp.float32).reshape(1, K))
    return out[:M].reshape(*lead, K)


def attention_outproj(qkv, x_res, out_w, out_b, num_heads, causal):
    """Multi-head self-attention + out-projection + residual, fused; one batch per step.
    Reads per-head slices directly from (B, S, 3D); writes output in (B, S, D) layout."""
    B, S, D3 = qkv.shape
    D = D3 // 3
    hd = D // num_heads
    return pl.pallas_call(
        functools.partial(_attn_outproj_kernel, num_heads=num_heads,
                          scale=1.0 / math.sqrt(hd), causal=causal),
        grid=(B,),
        in_specs=[pl.BlockSpec((1, S, D3), lambda b: (b, 0, 0)),
                  pl.BlockSpec((1, S, D), lambda b: (b, 0, 0)),
                  pl.BlockSpec((D, D), lambda b: (0, 0)),
                  pl.BlockSpec((1, D), lambda b: (0, 0))],
        out_specs=pl.BlockSpec((1, S, D), lambda b: (b, 0, 0)),
        out_shape=jax.ShapeDtypeStruct((B, S, D), jnp.bfloat16),
        scratch_shapes=[pltpu.VMEM((S, D), jnp.bfloat16)],
        compiler_params=pltpu.CompilerParams(
            dimension_semantics=("parallel",), vmem_limit_bytes=_VMEM_LIMIT),
    )(qkv, x_res, out_w.astype(jnp.bfloat16),
      out_b.astype(jnp.float32).reshape(1, D))


def resblock(x, p, num_heads, causal):
    # CLIP ResidualAttentionBlock (pre-LN, QuickGELU MLP): 3 fused pallas_calls
    qkv = ln_linear(x, p["ln1_g"], p["ln1_b"], p["in_w"], p["in_b"])   # LN1 + QKV proj
    x = attention_outproj(qkv, x, p["out_w"], p["out_b"], num_heads, causal)
    x = ln_mlp(x, p["ln2_g"], p["ln2_b"], p["fc_w"], p["fc_b"],
               p["proj_w"], p["proj_b"])                                # LN2 + MLP + residual
    return x


# ----------------------------------------------------------------------------
# Module forward passes (MultiModalPromptLearner / TextEncoder / visual / CustomCLIP)
# ----------------------------------------------------------------------------
def prompt_learner_forward(params, missing_type, prompt_depth):
    # M = B * (prompt_length//2) = 4 rows: per perf review these tiny MLPs are left to
    # XLA -- any Pallas launch here is ~100% fixed overhead.
    mt = jnp.asarray(missing_type).reshape(-1)
    # missing_type: 0 = complete, 1 = text missing, 2 = image missing
    img0 = jnp.where((mt == 2)[:, None, None],
                     params["visual_prompt_missing"][None],
                     params["visual_prompt_complete"][None])            # (B, Lh, 768)
    txt0 = jnp.where((mt == 1)[:, None, None],
                     params["text_prompt_missing"][None],
                     params["text_prompt_complete"][None])              # (B, Lh, 512)

    def mlp(c, ln_g, ln_b, w1, b1, w2, b2):
        cn = _ln_f32(c, ln_g, ln_b, 1e-5)
        h = jax.nn.gelu(cn @ w1.astype(jnp.float32) + b1, approximate=False)
        return h @ w2.astype(jnp.float32) + b2

    all_img, all_txt = [], []
    prev_img, prev_txt = img0, txt0
    for l in range(prompt_depth):
        cat = jnp.concatenate([prev_img.astype(jnp.float32),
                               prev_txt.astype(jnp.float32)], axis=-1)  # (B, Lh, 1280)
        lp = params["depth"][l]
        out_img = mlp(cat, lp["ln_img_g"], lp["ln_img_b"],
                      lp["img_w1"], lp["img_b1"], lp["img_w2"], lp["img_b2"])   # (B, Lh, 768)
        out_txt = mlp(cat, lp["ln_txt_g"], lp["ln_txt_b"],
                      lp["txt_w1"], lp["txt_b1"], lp["txt_w2"], lp["txt_b2"])   # (B, Lh, 512)
        all_img.append(out_img)
        all_txt.append(out_txt)
        prev_img, prev_txt = out_img, out_txt
    return all_img, all_txt


def text_encoder_forward(params, tokens, all_prompts_text, num_heads, prompt_depth):
    x = params["token_embedding"][tokens]                               # (B, 77, 512) gather glue
    x = (x + params["pos_embed"][None]).astype(jnp.bfloat16)
    Lh = all_prompts_text[0].shape[1]
    x = jnp.concatenate([all_prompts_text[0].astype(jnp.bfloat16), x], axis=1)   # prepend prompts
    for li, lp in enumerate(params["layers"]):
        if 0 < li < prompt_depth:
            x = jnp.concatenate([all_prompts_text[li].astype(jnp.bfloat16), x[:, Lh:]], axis=1)
        x = resblock(x, lp, num_heads, causal=True)
    x = x[:, Lh:]                                                       # outputs[0][prompt_length:]
    eot = jnp.argmax(tokens, axis=-1)                                   # tokenized_texts.argmax(-1)
    x_eot = x[jnp.arange(x.shape[0]), eot]                              # (B, 512)
    # ln_final + text_projection fused (LN is row-wise, so gather-then-LN == LN-then-gather)
    return ln_linear(x_eot, params["ln_final_g"], params["ln_final_b"],
                     params["text_projection"], None, out_dtype=jnp.float32)


def image_encoder_forward(params, image, all_prompts_image, num_heads, prompt_depth, patch):
    B, C, H, W = image.shape
    gh, gw = H // patch, W // patch
    # Conv2d(kernel=patch, stride=patch, bias=False) as patch-extract + Pallas matmul
    patches = image.reshape(B, C, gh, patch, gw, patch)
    patches = patches.transpose(0, 2, 4, 1, 3, 5).reshape(B, gh * gw, C * patch * patch)
    x = linear(patches, params["conv_w"])                               # (B, Np, width) bf16
    width = x.shape[-1]
    cls = jnp.broadcast_to(params["class_embedding"].astype(jnp.bfloat16)[None, None, :],
                           (B, 1, width))
    x = jnp.concatenate([cls, x], axis=1)
    x = x + params["pos_embed"][None].astype(jnp.bfloat16)
    x = layernorm(x, params["ln_pre_g"], params["ln_pre_b"])
    Lh = all_prompts_image[0].shape[1]
    x = jnp.concatenate([x, all_prompts_image[0].astype(jnp.bfloat16)], axis=1)  # append prompts
    for li, lp in enumerate(params["layers"]):
        if 0 < li < prompt_depth:
            x = jnp.concatenate([x[:, :-Lh], all_prompts_image[li].astype(jnp.bfloat16)], axis=1)
        x = resblock(x, lp, num_heads, causal=False)
    x_cls = x[:, 0]                                                     # CLS token
    # ln_post + proj fused
    return ln_linear(x_cls, params["ln_post_g"], params["ln_post_b"],
                     params["proj"], None, out_dtype=jnp.float32)


def custom_clip_forward(params, image, tokenized_texts, missing_type, cfg):
    all_img, all_txt = prompt_learner_forward(params["prompt_learner"], missing_type,
                                              cfg["prompt_depth"])
    text_features = text_encoder_forward(params["text"], tokenized_texts, all_txt,
                                         cfg["text_heads"], cfg["prompt_depth"])
    image_features = image_encoder_forward(params["visual"], image, all_img,
                                           cfg["vision_heads"], cfg["prompt_depth"],
                                           cfg["patch"])
    return jnp.concatenate([image_features, text_features], axis=-1)


# ----------------------------------------------------------------------------
# Deterministic parameter construction
# (matmul weights pre-cast bf16 / pre-transposed at init; LN / bias / embeds f32)
# ----------------------------------------------------------------------------
class KeyGen:
    def __init__(self, seed):
        self._key = jax.random.PRNGKey(seed)

    def __call__(self):
        self._key, sub = jax.random.split(self._key)
        return sub


def _n(kg, shape, std=0.02):
    return std * jax.random.normal(kg(), shape, dtype=jnp.float32)


def _nw(kg, shape, std=0.02):
    return _n(kg, shape, std).astype(jnp.bfloat16)


def init_prompt_learner(kg, prompt_length, prompt_depth):
    Lh = prompt_length // 2
    d_txt, d_img = 512, 768
    d = d_txt + d_img
    r = 16
    p = {
        "visual_prompt_complete": _n(kg, (Lh, d_img)),
        "visual_prompt_missing": _n(kg, (Lh, d_img)),
        "text_prompt_complete": _n(kg, (Lh, d_txt)),
        "text_prompt_missing": _n(kg, (Lh, d_txt)),
        # common_prompt_{complete,image,text} exist in __init__ but are unused in forward()
        "depth": [],
    }
    for _ in range(prompt_depth):
        p["depth"].append({
            "ln_img_g": jnp.ones((d,), jnp.float32), "ln_img_b": jnp.zeros((d,), jnp.float32),
            "ln_txt_g": jnp.ones((d,), jnp.float32), "ln_txt_b": jnp.zeros((d,), jnp.float32),
            "img_w1": _nw(kg, (d, d // r)), "img_b1": jnp.zeros((d // r,), jnp.float32),
            "img_w2": _nw(kg, (d // r, d_img)), "img_b2": jnp.zeros((d_img,), jnp.float32),
            "txt_w1": _nw(kg, (d, d // r)), "txt_b1": jnp.zeros((d // r,), jnp.float32),
            "txt_w2": _nw(kg, (d // r, d_txt)), "txt_b2": jnp.zeros((d_txt,), jnp.float32),
        })
    return p


def init_resblock(kg, d):
    return {
        "ln1_g": jnp.ones((d,), jnp.float32), "ln1_b": jnp.zeros((d,), jnp.float32),
        "in_w": _nw(kg, (d, 3 * d)), "in_b": jnp.zeros((3 * d,), jnp.float32),
        "out_w": _nw(kg, (d, d)), "out_b": jnp.zeros((d,), jnp.float32),
        "ln2_g": jnp.ones((d,), jnp.float32), "ln2_b": jnp.zeros((d,), jnp.float32),
        "fc_w": _nw(kg, (d, 4 * d)), "fc_b": jnp.zeros((4 * d,), jnp.float32),
        "proj_w": _nw(kg, (4 * d, d)), "proj_b": jnp.zeros((d,), jnp.float32),
    }


def init_text(kg, vocab, ctx, d, layers, out_dim):
    return {
        "token_embedding": _n(kg, (vocab, d)),
        "pos_embed": _n(kg, (ctx, d), std=0.01),
        "layers": [init_resblock(kg, d) for _ in range(layers)],
        "ln_final_g": jnp.ones((d,), jnp.float32), "ln_final_b": jnp.zeros((d,), jnp.float32),
        "text_projection": _nw(kg, (d, out_dim)),
    }


def init_visual(kg, in_ch, patch, grid, d, layers, out_dim):
    n_patches = grid * grid
    return {
        # patch-embed conv weight stored already reshaped/transposed: (C*P*P, width)
        "conv_w": _nw(kg, (in_ch * patch * patch, d)),
        "class_embedding": _n(kg, (d,)),
        "pos_embed": _n(kg, (n_patches + 1, d), std=0.01),
        "ln_pre_g": jnp.ones((d,), jnp.float32), "ln_pre_b": jnp.zeros((d,), jnp.float32),
        "layers": [init_resblock(kg, d) for _ in range(layers)],
        "ln_post_g": jnp.ones((d,), jnp.float32), "ln_post_b": jnp.zeros((d,), jnp.float32),
        "proj": _nw(kg, (d, out_dim)),
    }


# ----------------------------------------------------------------------------
# Demo
# ----------------------------------------------------------------------------
if __name__ == "__main__":
    cfg = dict(
        prompt_length=4,      # -> Lh = 2 trainable prompts per modality
        prompt_depth=2,
        patch=16,
        text_heads=8,         # text width 512 (hard-coded by the module's prompt dims)
        vision_heads=12,      # vision width 768
        text_layers=2,
        vision_layers=2,
        vocab=256,
        ctx=77,               # context_length=77 as in the torch forward
        out_dim=64,
    )
    B, C, H, W = 2, 3, 32, 32

    kg = KeyGen(0)
    params = {
        "prompt_learner": init_prompt_learner(kg, cfg["prompt_length"], cfg["prompt_depth"]),
        "text": init_text(kg, cfg["vocab"], cfg["ctx"], 512, cfg["text_layers"], cfg["out_dim"]),
        "visual": init_visual(kg, C, cfg["patch"], H // cfg["patch"], 768,
                              cfg["vision_layers"], cfg["out_dim"]),
    }

    # deterministic inputs (PRNGKey(0) stream)
    image = jax.random.normal(kg(), (B, C, H, W), dtype=jnp.float32)
    tokenized_texts = jax.random.randint(kg(), (B, cfg["ctx"]), 1, cfg["vocab"] - 1,
                                         dtype=jnp.int32)
    tokenized_texts = tokenized_texts.at[:, 10].set(cfg["vocab"] - 1)   # EOT = max id -> argmax
    missing_type = [1, 2]   # sample 0: text missing, sample 1: image missing

    out = custom_clip_forward(params, image, tokenized_texts, missing_type, cfg)
    out = jax.block_until_ready(out)
    assert out.shape == (B, 2 * cfg["out_dim"]), out.shape
    assert bool(jnp.all(jnp.isfinite(out)))
    print("KERNEL_OK")
</pallas_src>

<mosaic_0001>
module attributes {stable_mosaic.version = 11 : i64} {
  func.func @_ln_linear_kernel(%arg0: i32, %arg1: memref<158x512xbf16, #tpu.memory_space<vmem>>, %arg2: memref<1x512xf32, #tpu.memory_space<vmem>>, %arg3: memref<1x512xf32, #tpu.memory_space<vmem>>, %arg4: memref<512x1536xbf16, #tpu.memory_space<vmem>>, %arg5: memref<1x1536xf32, #tpu.memory_space<vmem>>, %arg6: memref<158x1536xbf16, #tpu.memory_space<vmem>>) attributes {dimension_semantics = [#tpu.dimension_semantics<parallel>], iteration_bounds = array<i64: 1>, scalar_prefetch = 0 : i64, scratch_operands = 0 : i64, tpu.core_type = #tpu.core_type<tc>, window_params = [{transform_indices = @transform_0, window_bounds = array<i64: 158, 512>}, {pipeline_mode = #tpu.pipeline_mode<synchronous>, transform_indices = @transform_1, window_bounds = array<i64: 1, 512>}, {pipeline_mode = #tpu.pipeline_mode<synchronous>, transform_indices = @transform_2, window_bounds = array<i64: 1, 512>}, {pipeline_mode = #tpu.pipeline_mode<synchronous>, transform_indices = @transform_3, window_bounds = array<i64: 512, 1536>}, {pipeline_mode = #tpu.pipeline_mode<synchronous>, transform_indices = @transform_4, window_bounds = array<i64: 1, 1536>}, {transform_indices = @transform_5, window_bounds = array<i64: 158, 1536>}]} {
    %c0 = arith.constant 0 : index
    %c0_0 = arith.constant 0 : index
    %0 = vector.load %arg1[%c0, %c0_0] : memref<158x512xbf16, #tpu.memory_space<vmem>>, vector<158x512xbf16>
    %1 = arith.extf %0 : vector<158x512xbf16> to vector<158x512xf32>
    %c0_1 = arith.constant 0 : index
    %c0_2 = arith.constant 0 : index
    %2 = vector.load %arg2[%c0_1, %c0_2] : memref<1x512xf32, #tpu.memory_space<vmem>>, vector<1x512xf32>
    %c0_3 = arith.constant 0 : index
    %c0_4 = arith.constant 0 : index
    %3 = vector.load %arg3[%c0_3, %c0_4] : memref<1x512xf32, #tpu.memory_space<vmem>>, vector<1x512xf32>
    %cst = arith.constant dense<0.000000e+00> : vector<158xf32>
    %4 = vector.multi_reduction <add>, %1, %cst [1] : vector<158x512xf32> to vector<158xf32>
    %5 = vector.shape_cast %4 : vector<158xf32> to vector<158x1xf32>
    %cst_5 = arith.constant 5.120000e+02 : f32
    %6 = vector.broadcast %cst_5 : f32 to vector<158x1xf32>
    %7 = arith.divf %5, %6 : vector<158x1xf32>
    %8 = vector.broadcast %7 : vector<158x1xf32> to vector<158x512xf32>
    %9 = arith.subf %1, %8 : vector<158x512xf32>
    %10 = arith.mulf %9, %9 : vector<158x512xf32>
    %cst_6 = arith.constant dense<0.000000e+00> : vector<158xf32>
    %11 = vector.multi_reduction <add>, %10, %cst_6 [1] : vector<158x512xf32> to vector<158xf32>
    %12 = vector.shape_cast %11 : vector<158xf32> to vector<158x1xf32>
    %cst_7 = arith.constant 5.120000e+02 : f32
    %13 = vector.broadcast %cst_7 : f32 to vector<158x1xf32>
    %14 = arith.divf %12, %13 : vector<158x1xf32>
    %15 = vector.broadcast %7 : vector<158x1xf32> to vector<158x512xf32>
    %16 = arith.subf %1, %15 : vector<158x512xf32>
    %cst_8 = arith.constant 9.99999974E-6 : f32
    %17 = vector.broadcast %cst_8 : f32 to vector<158x1xf32>
    %18 = arith.addf %14, %17 : vector<158x1xf32>
    %19 = math.rsqrt %18 : vector<158x1xf32>
    %20 = vector.broadcast %19 : vector<158x1xf32> to vector<158x512xf32>
    %21 = arith.mulf %16, %20 : vector<158x512xf32>
    %22 = vector.broadcast %2 : vector<1x512xf32> to vector<158x512xf32>
    %23 = arith.mulf %21, %22 : vector<158x512xf32>
    %24 = vector.broadcast %3 : vector<1x512xf32> to vector<158x512xf32>
    %25 = arith.addf %23, %24 : vector<158x512xf32>
    %26 = arith.truncf %25 : vector<158x512xf32> to vector<158x512xbf16>
    %c0_9 = arith.constant 0 : index
    %c0_10 = arith.constant 0 : index
    %27 = vector.load %arg4[%c0_9, %c0_10] : memref<512x1536xbf16, #tpu.memory_space<vmem>>, vector<512x1536xbf16>
    %cst_11 = arith.constant dense<0.000000e+00> : vector<158x1536xf32>
    %28 = tpu.matmul %26, %27, %cst_11 {dimension_numbers = #tpu.dot_dimension_numbers<[1], [0], [0], [1], [0, 0, 1, 1], [], []>} : vector<158x512xbf16>, vector<512x1536xbf16>, vector<158x1536xf32> -> vector<158x1536xf32>
    %c0_12 = arith.constant 0 : index
    %c0_13 = arith.constant 0 : index
    %29 = vector.load %arg5[%c0_12, %c0_13] : memref<1x1536xf32, #tpu.memory_space<vmem>>, vector<1x1536xf32>
    %30 = vector.broadcast %29 : vector<1x1536xf32> to vector<158x1536xf32>
    %31 = arith.addf %28, %30 : vector<158x1536xf32>
    %32 = arith.truncf %31 : vector<158x1536xf32> to vector<158x1536xbf16>
    %c0_14 = arith.constant 0 : index
    %c0_15 = arith.constant 0 : index
    %33 = vector.load %arg6[%c0_14, %c0_15] : memref<158x1536xbf16, #tpu.memory_space<vmem>>, vector<158x1536xbf16>
    tpu.vector_store %arg6[%c0_14, %c0_15], %32 {strides = array<i32>} : memref<158x1536xbf16, #tpu.memory_space<vmem>>, vector<158x1536xbf16>,
    return
  }
  func.func @transform_0(%arg0: i32) -> (i32, i32) {
    %c0_i32 = arith.constant 0 : i32
    %c0_i32_0 = arith.constant 0 : i32
    return %arg0, %c0_i32 : i32, i32
  }
  func.func @transform_1(%arg0: i32) -> (i32, i32) {
    %c0_i32 = arith.constant 0 : i32
    %c0_i32_0 = arith.constant 0 : i32
    %c0_i32_1 = arith.constant 0 : i32
    return %c0_i32, %c0_i32_0 : i32, i32
  }
  func.func @transform_2(%arg0: i32) -> (i32, i32) {
    %c0_i32 = arith.constant 0 : i32
    %c0_i32_0 = arith.constant 0 : i32
    %c0_i32_1 = arith.constant 0 : i32
    return %c0_i32, %c0_i32_0 : i32, i32
  }
  func.func @transform_3(%arg0: i32) -> (i32, i32) {
    %c0_i32 = arith.constant 0 : i32
    %c0_i32_0 = arith.constant 0 : i32
    %c0_i32_1 = arith.constant 0 : i32
    return %c0_i32, %c0_i32_0 : i32, i32
  }
  func.func @transform_4(%arg0: i32) -> (i32, i32) {
    %c0_i32 = arith.constant 0 : i32
    %c0_i32_0 = arith.constant 0 : i32
    %c0_i32_1 = arith.constant 0 : i32
    return %c0_i32, %c0_i32_0 : i32, i32
  }
  func.func @transform_5(%arg0: i32) -> (i32, i32) {
    %c0_i32 = arith.constant 0 : i32
    %c0_i32_0 = arith.constant 0 : i32
    return %arg0, %c0_i32 : i32, i32
  }
}

</mosaic_0001>

<bundles_post_ra>
// kernel: tpu_custom_call.1
= control target key start
LH: loop header
LB: loop body
LE: loop exit
PB: predicated region body
PF: predicated region fallthrough
CT: control target
= control target key end

     0   :  { %10 = vsyncpa [#allocation3], 0  ;;  %s9673_s0 = inlined_call_operand.hbm [shape: bf16[158,512], index: 0, kind: input, shape index: {}]   ;;  %s9674_s1 = inlined_call_operand.hbm [shape: f32[1,512], index: 1, kind: input, shape index: {}]   ;;  %s9675_s2 = inlined_call_operand.hbm [shape: f32[1,512], index: 2, kind: input, shape index: {}]   ;;  %s9676_s3 = inlined_call_operand.hbm [shape: bf16[512,1536], index: 3, kind: input, shape index: {}]   ;;  %s9677_s4 = inlined_call_operand.hbm [shape: f32[1,1536], index: 4, kind: input, shape index: {}]   ;;  %s9678_s5 = inlined_call_operand.hbm [shape: bf16[158,1536], index: 5, kind: output, shape index: {}]  }
   0x1   :  { %11 = vsyncpa [#allocation6], 0 }
   0x2   :  { %12 = vsyncpa [#allocation9], 0 }
   0x3   :  { %13 = vsyncpa [#allocation4], 0  ;;  %s7670_s18 = smov [#allocation5]   ;;  %s7671_s20 = smov [#allocation8]  }
   0x4   :  { %s32_s19 = sshll.u32 %s7670_s18, 4  ;;  %s51_s21 = sshll.u32 %s7671_s20, 4  ;;  %s33_s19 = int_to_ptr.vmem [resolvable:$true] %s32_s19  ;;  %s7710_s21 = int_to_ptr.vmem [resolvable:$true] %s51_s21 }
   0x5   :  { %s7530_s24 = scalar_lea.hbm %s9674_s1, 64 }
   0x6   :  { %p7531_p0 = scmp.ne.s32.totalorder %s9674_s1, %s7530_s24  ;;  %p7534_p1 = scmp.lt.u32.totalorder %s7530_s24, %s9674_s1 }
   0x8   :  { %p7536_p2 = pnand %p7534_p1, %p7531_p0 }
   0xa   :  { %7539 = shalt.err (!%p7536_p2)
}
   0xb   :  { %s7540_s29 = scalar_lea.vmem %s33_s19, 64  ;;  %p7545_p4 = scmp.lt.s32.totalorder %s33_s19, %s33_s19 }
   0xc   :  { %p7541_p3 = scmp.ne.s32.totalorder %s33_s19, %s7540_s29  ;;  %p7546_p5 = scmp.lt.s32.totalorder %s7540_s29, %s7540_s29 }
   0xe   :  { %p7547_p6 = por %p7546_p5, %p7545_p4 }
  0x10   :  { %p7548_p7 = pnand %p7547_p6, %p7541_p3 }
  0x12   :  { %7551 = shalt.err (!%p7548_p7)
}
  0x13   :  { %35 = dma.hbm_to_vmem [thread:$0]  %s9674_s1, 64, %s33_s19, [#allocation6]  }
  0x14   :  { %s7552_s9 = scalar_lea.hbm %s9676_s3, 49152 }
  0x15   :  { %p7553_p8 = scmp.ne.s32.totalorder %s9676_s3, %s7552_s9  ;;  %p7556_p9 = scmp.lt.u32.totalorder %s7552_s9, %s9676_s3 }
  0x17   :  { %p7558_p10 = pnand %p7556_p9, %p7553_p8 }
  0x19   :  { %7561 = shalt.err (!%p7558_p10)
}
  0x1a   :  { %s7562_s14 = scalar_lea.vmem %s7710_s21, 49152  ;;  %p7567_p12 = scmp.lt.s32.totalorder %s7710_s21, %s7710_s21 }
  0x1b   :  { %p7563_p11 = scmp.ne.s32.totalorder %s7710_s21, %s7562_s14  ;;  %p7568_p13 = scmp.lt.s32.totalorder %s7562_s14, %s7562_s14 }
  0x1d   :  { %p7569_p0 = por %p7568_p13, %p7567_p12 }
  0x1f   :  { %p7570_p1 = pnand %p7569_p0, %p7563_p11 }
  0x21   :  { %7573 = shalt.err (!%p7570_p1)
}
  0x22   :  { %s7672_s1 = smov 768   ;;  %s7673_s15 = smov 48  }
  0x23   :  { %57 = dma.hbm_to_vmem [thread:$0]  %s9676_s3, 49152, %s7710_s21, [#allocation9], %s7672_s1, %s7672_s1, %s7673_s15  }
  0x24   :  { %s7674_s18 = smov [#allocation2]   ;;  %s7574_s23 = scalar_lea.hbm %s9673_s0, 5120 }
  0x25   :  { %s19_s19 = sshll.u32 %s7674_s18, 4  ;;  %p7575_p2 = scmp.ne.s32.totalorder %s9673_s0, %s7574_s23  ;;  %s20_s19 = int_to_ptr.vmem [resolvable:$true] %s19_s19 }
  0x26   :  { %p7578_p3 = scmp.lt.u32.totalorder %s7574_s23, %s9673_s0 }
  0x28   :  { %p7580_p4 = pnand %p7578_p3, %p7575_p2 }
  0x2a   :  { %7583 = shalt.err (!%p7580_p4)
}
  0x2b   :  { %s7584_s28 = scalar_lea.vmem %s20_s19, 5120  ;;  %p7589_p6 = scmp.lt.s32.totalorder %s20_s19, %s20_s19 }
  0x2c   :  { %p7585_p5 = scmp.ne.s32.totalorder %s20_s19, %s7584_s28  ;;  %p7590_p7 = scmp.lt.s32.totalorder %s7584_s28, %s7584_s28 }
  0x2e   :  { %p7591_p8 = por %p7590_p7, %p7589_p6 }
  0x30   :  { %p7592_p9 = pnand %p7591_p8, %p7585_p5 }
  0x32   :  { %7595 = shalt.err (!%p7592_p9)
}
  0x33   :  { %s7675_s3 = smov 256   ;;  %s7676_s21 = smov 16  }
  0x34   :  { %25 = dma.hbm_to_vmem [thread:$0]  %s9673_s0, 5120, %s20_s19, [#allocation3], %s7675_s3, %s7675_s3, %s7676_s21  }
  0x35   :  { %s7677_s6 = smov [#allocation7]   ;;  %s7678_s8 = smov [#allocation10]  }
  0x36   :  { %s42_s7 = sshll.u32 %s7677_s6, 4  ;;  %s64_s9 = sshll.u32 %s7678_s8, 4  ;;  %s43_s7 = int_to_ptr.vmem [resolvable:$true] %s42_s7  ;;  %s65_s9 = int_to_ptr.vmem [resolvable:$true] %s64_s9 }
  0x37   :  { %s7596_s12 = scalar_lea.hbm %s9675_s2, 64 }
  0x38   :  { %p7597_p10 = scmp.ne.s32.totalorder %s9675_s2, %s7596_s12  ;;  %p7600_p11 = scmp.lt.u32.totalorder %s7596_s12, %s9675_s2 }
  0x3a   :  { %p7602_p12 = pnand %p7600_p11, %p7597_p10 }
  0x3c   :  { %7605 = shalt.err (!%p7602_p12)
}
  0x3d   :  { %s7606_s0 = scalar_lea.vmem %s43_s7, 64  ;;  %p7611_p0 = scmp.lt.s32.totalorder %s43_s7, %s43_s7 }
  0x3e   :  { %p7607_p13 = scmp.ne.s32.totalorder %s43_s7, %s7606_s0  ;;  %p7612_p1 = scmp.lt.s32.totalorder %s7606_s0, %s7606_s0 }
  0x40   :  { %p7613_p2 = por %p7612_p1, %p7611_p0 }
  0x42   :  { %p7614_p3 = pnand %p7613_p2, %p7607_p13 }
  0x44   :  { %7617 = shalt.err (!%p7614_p3)
}
  0x45   :  { %45 = dma.hbm_to_vmem [thread:$0]  %s9675_s2, 64, %s43_s7, [#allocation6]  }
  0x46   :  { %s7618_s23 = scalar_lea.hbm %s9677_s4, 192 }
  0x47   :  { %p7619_p4 = scmp.ne.s32.totalorder %s9677_s4, %s7618_s23  ;;  %p7622_p5 = scmp.lt.u32.totalorder %s7618_s23, %s9677_s4 }
  0x49   :  { %p7624_p6 = pnand %p7622_p5, %p7619_p4 }
  0x4b   :  { %7627 = shalt.err (!%p7624_p6)
}
  0x4c   :  { %s7628_s28 = scalar_lea.vmem %s65_s9, 192  ;;  %p7633_p8 = scmp.lt.s32.totalorder %s65_s9, %s65_s9 }
  0x4d   :  { %p7629_p7 = scmp.ne.s32.totalorder %s65_s9, %s7628_s28  ;;  %p7634_p9 = scmp.lt.s32.totalorder %s7628_s28, %s7628_s28 }
  0x4f   :  { %p7635_p10 = por %p7634_p9, %p7633_p8 }
  0x51   :  { %p7636_p11 = pnand %p7635_p10, %p7629_p7 }
  0x53   :  { %7639 = shalt.err (!%p7636_p11)
}
  0x54   :  { %67 = dma.hbm_to_vmem [thread:$0]  %s9677_s4, 192, %s65_s9, [#allocation9]  }
  0x55   :  { %7662 = dma.done.wait [#allocation3], 5120  }
  0x56   :  { %7663 = vsyncadd [#allocation3], 4294962176 }
  0x57   :  { %7664 = dma.done.wait [#allocation6], 128  }
  0x58   :  { %7665 = vsyncadd [#allocation6], 4294967168 }
  0x59   :  { %7666 = dma.done.wait [#allocation9], 49344  }
  0x5a   :  { %7667 = vsyncadd [#allocation9], 4294917952  ;;  %v7780_v0 = vld [vmem:[#allocation2 + $0x20] sm:$0xff]  ;;  %v7782_v1 = vld [vmem:[#allocation2 + $0x28] sm:$0xff]  ;;  %vm300_vm0 = vcmask 1045504   ;;  %s7679_s4 = smov [#allocation11]  }
  0x5b   :  { %v7784_v2 = vld [vmem:[#allocation2] sm:$0xff]  ;;  %v131_v3 = vunpack.c.l.bf16 %v7780_v0  ;;  %v132_v4 = vunpack.c.h.bf16 %v7780_v0  ;;  %v133_v5 = vunpack.c.l.bf16 %v7782_v1  ;;  %v134_v6 = vunpack.c.h.bf16 %v7782_v1  ;;  %v7790_v7 = vld [vmem:[#allocation2 + $0x8] sm:$0xff]  ;;  %v7792_v8 = vld [vmem:[#allocation2 + $0x30] sm:$0xff]  ;;  %s5786_s21 = sshll.u32 %s7679_s4, 4  ;;  %s5787_s21 = int_to_ptr.vmem [resolvable:$true] %s5786_s21 }
  0x5c   :  { %v7794_v9 = vld [vmem:[#allocation2 + $0x38] sm:$0xff]  ;;  %v9740_v10 = vunpack.c.l.bf16 %v7784_v2  ;;  %v9735_v11 = vunpack.c.h.bf16 %v7784_v2  ;;  %v9729_v12 = vunpack.c.l.bf16 %v7790_v7  ;;  %v9723_v13 = vunpack.c.h.bf16 %v7790_v7  ;;  %v7800_v14 = vld [vmem:[#allocation2 + $0x10] sm:$0xff]  ;;  %v7830_v30 = vld [vmem:[#allocation2 + $0x40] sm:$0xff]  ;;  %s7640_s29 = scalar_lea.vmem %s5787_s21, 15360  ;;  %p7645_p13 = scmp.lt.s32.totalorder %s5787_s21, %s5787_s21 }
  0x5d   :  { %v7802_v15 = vld [vmem:[#allocation2 + $0x18] sm:$0xff]  ;;  %v215_v16 = vadd.f32 %v132_v4, %v131_v3  ;;  %v9722_v17 = vunpack.c.l.bf16 %v7792_v8  ;;  %v9721_v18 = vunpack.c.h.bf16 %v7792_v8  ;;  %v9706_v19 = vunpack.c.l.bf16 %v7794_v9  ;;  %v7811_v20 = vld [vmem:[#allocation2 + $0x50] sm:$0xff]  ;;  %v7840_v35 = vld [vmem:[#allocation2 + $0x48] sm:$0xff]  ;;  %p7641_p12 = scmp.ne.s32.totalorder %s5787_s21, %s7640_s29  ;;  %p7646_p0 = scmp.lt.s32.totalorder %s7640_s29, %s7640_s29 }
  0x5e   :  { %v205_v21 = vadd.f32 %v9735_v11, %v9740_v10  ;;  %v9696_v22 = vunpack.c.h.bf16 %v7794_v9  ;;  %v9717_v23 = vunpack.c.l.bf16 %v7800_v14  ;;  %v9714_v24 = vunpack.c.h.bf16 %v7800_v14  ;;  %v7820_v25 = vld [vmem:[#allocation2 + $0x58] sm:$0xff]  ;;  %v7847_v39 = vld [vmem:[#allocation2 + $0x70] sm:$0xff]  ;;  %v7860_v45 = vld [vmem:[#allocation2 + $0x60] sm:$0xff] }
  0x5f   :  { %v216_v26 = vadd.f32 %v215_v16, %v133_v5  ;;  %v220_v27 = vadd.f32 %v9721_v18, %v9722_v17  ;;  %v9713_v28 = vunpack.c.l.bf16 %v7802_v15  ;;  %v9707_v29 = vunpack.c.h.bf16 %v7802_v15  ;;  %v7858_v44 = vld [vmem:[#allocation2 + $0x78] sm:$0xff]  ;;  %v7867_v50 = vld [vmem:[#allocation2 + $0x68] sm:$0xff]  ;;  %v7875_v55 = vld [vmem:[#allocation2 + $0x90] sm:$0xff]  ;;  %p7647_p1 = por %p7646_p0, %p7645_p13 }
  0x60   :  { %v206_v31 = vadd.f32 %v205_v21, %v9729_v12  ;;  %v210_v32 = vadd.f32 %v9714_v24, %v9717_v23  ;;  %v9704_v33 = vunpack.c.l.bf16 %v7811_v20  ;;  %v9700_v34 = vunpack.c.h.bf16 %v7811_v20  ;;  %v7884_v60 = vld [vmem:[#allocation2 + $0x98] sm:$0xff]  ;;  %v7893_v21 = vld [vmem:[#allocation2 + $0x80] sm:$0xff]  ;;  %v8014_v23 = vld [vmem:[#allocation2 + $0x108] sm:$0xff] }
  0x61   :  { %v217_v36 = vadd.f32 %v216_v26, %v134_v6  ;;  %v221_v37 = vadd.f32 %v220_v27, %v9706_v19  ;;  %v9680_v38 = vunpack.c.l.bf16 %v7820_v25  ;;  %v9698_v43 = vunpack.c.l.bf16 %v7830_v30  ;;  %v7895_v26 = vld [vmem:[#allocation2 + $0x88] sm:$0xff]  ;;  %v7897_v27 = vld [vmem:[#allocation2 + $0xb0] sm:$0xff]  ;;  %v8007_v24 = vld [vmem:[#allocation2 + $0x100] sm:$0xff]  ;;  %p7648_p2 = pnand %p7647_p1, %p7641_p12 }
  0x62   :  { %v207_v40 = vadd.f32 %v206_v31, %v9723_v13  ;;  %v211_v41 = vadd.f32 %v210_v32, %v9713_v28  ;;  %v230_v42 = vadd.f32 %v9700_v34, %v9704_v33  ;;  %v9679_v47 = vunpack.c.h.bf16 %v7820_v25  ;;  %v7971_v34 = vld [vmem:[#allocation2 + $0xe0] sm:$0xff]  ;;  %v7989_v19 = vld [vmem:[#allocation2 + $0xe8] sm:$0xff]  ;;  %v8005_v28 = vld [vmem:[#allocation2 + $0x118] sm:$0xff] }
  0x63   :  { %218 = vadd.xlane.f32.xlu1 %v217_v36  ;;  %v222_v46 = vadd.f32 %v221_v37, %v9696_v22  ;;  %v9697_v48 = vunpack.c.h.bf16 %v7830_v30  ;;  %v9682_v49 = vunpack.c.l.bf16 %v7840_v35  ;;  %v9691_v53 = vunpack.c.l.bf16 %v7847_v39  ;;  %v8030_v13 = vld [vmem:[#allocation2 + $0x130] sm:$0x77] }
  0x64   :  { %208 = vadd.xlane.f32.xlu0 %v207_v40  ;;  %v212_v51 = vadd.f32 %v211_v41, %v9707_v29  ;;  %v231_v52 = vadd.f32 %v230_v42, %v9680_v38  ;;  %v9686_v54 = vunpack.c.h.bf16 %v7847_v39  ;;  %v9685_v56 = vunpack.c.h.bf16 %v7840_v35  ;;  %v7905_v40 = vld [vmem:[#allocation2 + $0xb8] sm:$0xff]  ;;  %v7907_v41 = vld [vmem:[#allocation2 + $0xa0] sm:$0xff]  ;;  %v7991_v29 = vld [vmem:[#allocation2 + $0x110] sm:$0xff] }
  0x65   :  { %v225_v57 = vadd.f32 %v9697_v48, %v9698_v43  ;;  %v9681_v58 = vunpack.c.l.bf16 %v7858_v44  ;;  %v9684_v59 = vunpack.c.l.bf16 %v7860_v45  ;;  %v9689_v61 = vunpack.c.h.bf16 %v7858_v44 }
  0x66   :  { %v240_v62 = vadd.f32 %v9686_v54, %v9691_v53  ;;  %v9683_v63 = vunpack.c.h.bf16 %v7860_v45  ;;  %v9690_v16 = vunpack.c.l.bf16 %v7867_v50  ;;  %v232_v31 = vadd.f32 %v231_v52, %v9679_v47  ;;  %v7935_v54 = vld [vmem:[#allocation2 + $0xd8] sm:$0xff] }
  0x67   :  { %223 = vadd.xlane.f32.xlu1 %v222_v46  ;;  %v226_v32 = vadd.f32 %v225_v57, %v9682_v49  ;;  %v9688_v36 = vunpack.c.l.bf16 %v7875_v55  ;;  %v9687_v37 = vunpack.c.h.bf16 %v7875_v55  ;;  %v9695_v46 = vunpack.c.h.bf16 %v7867_v50  ;;  %v7927_v49 = vld [vmem:[#allocation2 + $0xd0] sm:$0xff] }
  0x68   :  { %213 = vadd.xlane.f32.xlu0 %v212_v51  ;;  %v241_v42 = vadd.f32 %v240_v62, %v9681_v58  ;;  %v235_v52 = vadd.f32 %v9683_v63, %v9684_v59  ;;  %v9692_v57 = vunpack.c.l.bf16 %v7884_v60  ;;  %v9694_v38 = vunpack.c.l.bf16 %v7893_v21  ;;  %v7925_v58 = vld [vmem:[#allocation2 + $0xa8] sm:$0xff] }
  0x69   :  { %v227_v47 = vadd.f32 %v226_v32, %v9685_v56  ;;  %v250_v51 = vadd.f32 %v9687_v37, %v9688_v36  ;;  %v9693_v62 = vunpack.c.h.bf16 %v7893_v21  ;;  %v9703_v32 = vunpack.c.h.bf16 %v7884_v60 }
  0x6a   :  { %v242_v63 = vadd.f32 %v241_v42, %v9689_v61  ;;  %v236_v59 = vadd.f32 %v235_v52, %v9690_v16  ;;  %v9699_v56 = vunpack.c.l.bf16 %v7895_v26  ;;  %v9702_v42 = vunpack.c.l.bf16 %v7897_v27  ;;  %v7945_v52 = vld [vmem:[#allocation2 + $0xc0] sm:$0xff] }
  0x6b   :  { %233 = vadd.xlane.f32.xlu1 %v232_v31  ;;  %v251_v37 = vadd.f32 %v250_v51, %v9692_v57  ;;  %v245_v36 = vadd.f32 %v9693_v62, %v9694_v38  ;;  %v9701_v61 = vunpack.c.h.bf16 %v7897_v27  ;;  %v9709_v31 = vunpack.c.h.bf16 %v7895_v26  ;;  %v7952_v57 = vld [vmem:[#allocation2 + $0xc8] sm:$0xff] }
  0x6c   :  { %228 = vadd.xlane.f32.xlu0 %v227_v47  ;;  %v237_v16 = vadd.f32 %v236_v59, %v9695_v46  ;;  %v9705_v53 = vunpack.c.l.bf16 %v7905_v40  ;;  %v9712_v51 = vunpack.c.l.bf16 %v7907_v41  ;;  %v9720_v38 = vunpack.c.h.bf16 %v7905_v40  ;;  %v7962_v46 = vld [vmem:[#allocation2 + $0xf0] sm:$0xff] }
  0x6d   :  { %v246_v62 = vadd.f32 %v245_v36, %v9699_v56  ;;  %v260_v47 = vadd.f32 %v9701_v61, %v9702_v42  ;;  %v9708_v59 = vunpack.c.h.bf16 %v7907_v41  ;;  %v252_v22 = vadd.f32 %v251_v37, %v9703_v32  ;;  %v7969_v56 = vld [vmem:[#allocation2 + $0xf8] sm:$0xff] }
  0x6e   :  { %v9715_v48 = vunpack.c.l.bf16 %v7925_v58  ;;  %v9711_v43 = vunpack.c.l.bf16 %v7927_v49  ;;  %v9710_v36 = vunpack.c.h.bf16 %v7927_v49  ;;  %v9725_v42 = vunpack.c.h.bf16 %v7925_v58 }
  0x6f   :  { %243 = vadd.xlane.f32.xlu1 %v242_v63  ;;  %v261_v61 = vadd.f32 %v260_v47, %v9705_v53  ;;  %v255_v37 = vadd.f32 %v9708_v59, %v9712_v51  ;;  %v9716_v32 = vunpack.c.l.bf16 %v7935_v54  ;;  %v247_v33 = vadd.f32 %v246_v62, %v9709_v31 }
  0x70   :  { %238 = vadd.xlane.f32.xlu0 %v237_v16  ;;  %v270_v63 = vadd.f32 %v9710_v36, %v9711_v43  ;;  %v9719_v47 = vunpack.c.l.bf16 %v7945_v52  ;;  %v9718_v53 = vunpack.c.h.bf16 %v7945_v52  ;;  %v9728_v16 = vunpack.c.h.bf16 %v7935_v54 }
  0x71   :  { %v256_v59 = vadd.f32 %v255_v37, %v9715_v48  ;;  %v9724_v62 = vunpack.c.l.bf16 %v7952_v57  ;;  %v9727_v43 = vunpack.c.l.bf16 %v7962_v46  ;;  %v9726_v51 = vunpack.c.h.bf16 %v7962_v46 }
  0x72   :  { %v271_v31 = vadd.f32 %v270_v63, %v9716_v32  ;;  %v265_v36 = vadd.f32 %v9718_v53, %v9719_v47  ;;  %v262_v37 = vadd.f32 %v261_v61, %v9720_v38  ;;  %v9736_v48 = vunpack.c.h.bf16 %v7952_v57  ;;  %v8025_v38 = vld [vmem:[#allocation2 + $0x120] sm:$0xff] }
  0x73   :  { %253 = vadd.xlane.f32.xlu1 %v252_v22  ;;  %v9730_v63 = vunpack.c.l.bf16 %v7969_v56  ;;  %v9732_v32 = vunpack.c.l.bf16 %v7971_v34  ;;  %v257_v53 = vadd.f32 %v256_v59, %v9725_v42  ;;  %v280_v22 = vadd.f32 %v9726_v51, %v9727_v43  ;;  %v8041_v51 = vld [vmem:[#allocation2 + $0x128] sm:$0xff] }
  0x74   :  { %248 = vadd.xlane.f32.xlu0 %v247_v33  ;;  %v266_v47 = vadd.f32 %v265_v36, %v9724_v62  ;;  %v9731_v61 = vunpack.c.h.bf16 %v7971_v34  ;;  %v9737_v18 = vunpack.c.l.bf16 %v7989_v19  ;;  %v9734_v17 = vunpack.c.l.bf16 %v7991_v29 }
  0x75   :  { %v9733_v33 = vunpack.c.h.bf16 %v7991_v29  ;;  %v272_v59 = vadd.f32 %v271_v31, %v9728_v16  ;;  %v9741_v36 = vunpack.c.h.bf16 %v7969_v56  ;;  %v281_v62 = vadd.f32 %v280_v22, %v9730_v63  ;;  %v8050_v22 = vld [vmem:[#allocation2 + $0x138] sm:$0x77] }
  0x76   :  { %v275_v42 = vadd.f32 %v9731_v61, %v9732_v32  ;;  %v9742_v43 = vunpack.c.l.bf16 %v8005_v28  ;;  %v9739_v16 = vunpack.c.l.bf16 %v8007_v24  ;;  %v9738_v12 = vunpack.c.h.bf16 %v8007_v24 }
  0x77   :  { %263 = vadd.xlane.f32.xlu1 %v262_v37  ;;  %v290_v31 = vadd.f32 %v9733_v33, %v9734_v17  ;;  %v267_v63 = vadd.f32 %v266_v47, %v9736_v48  ;;  %v9746_v61 = vunpack.c.h.bf16 %v7989_v19  ;;  %v9745_v32 = vunpack.c.l.bf16 %v8014_v23 }
  0x78   :  { %258 = vadd.xlane.f32.xlu0 %v257_v53  ;;  %v276_v37 = vadd.f32 %v275_v42, %v9737_v18  ;;  %v285_v33 = vadd.f32 %v9738_v12, %v9739_v16  ;;  %v9744_v17 = vunpack.c.l.bf16 %v8025_v38  ;;  %v9743_v11 = vunpack.c.h.bf16 %v8025_v38 }
  0x79   :  { %v282_v53 = vadd.f32 %v281_v62, %v9741_v36  ;;  %v9750_v47 = vunpack.c.h.bf16 %v8005_v28  ;;  %v9753_v48 = vunpack.c.h.bf16 %v8014_v23  ;;  %v9747_v42 = vunpack.c.l.bf16 %v8030_v13 }
  0x7a   :  { %v291_v18 = vadd.f32 %v290_v31, %v9742_v43  ;;  %v9749_v12 = vunpack.c.l.bf16 %v8041_v51  ;;  %v295_v16 = vadd.f32 %v9743_v11, %v9744_v17  ;;  %v9754_v10 = vunpack.c.h.bf16 %v8030_v13 }
  0x7b   :  { %273 = vadd.xlane.f32.xlu1 %v272_v59  ;;  %v277_v62 = vadd.f32 %v276_v37, %v9746_v61  ;;  %v286_v36 = vadd.f32 %v285_v33, %v9745_v32  ;;  %v9748_v59 = vunpack.c.l.bf16 %v8050_v22  ;;  %v301_v31 = vsel %vm300_vm0, %v9747_v42, 0.0 }
  0x7c   :  { %268 = vadd.xlane.f32.xlu0 %v267_v63  ;;  %v9751_v43 = vunpack.c.h.bf16 %v8050_v22  ;;  %v302_v11 = vsel %vm300_vm0, %v9754_v10, 0.0  ;;  %v292_v33 = vadd.f32 %v291_v18, %v9750_v47  ;;  %v9752_v37 = vunpack.c.h.bf16 %v8041_v51  ;;  %v6922_v47 = vld [vmem:[#allocation8 + $0x6c] ss:$48 sps:$4 sm:$0xff]  }
  0x7d   :  { %v303_v17 = vadd.f32 %v302_v11, %v301_v31  ;;  %v304_v63 = vsel %vm300_vm0, %v9748_v59, 0.0  ;;  %v296_v32 = vadd.f32 %v295_v16, %v9749_v12  ;;  %v287_v61 = vadd.f32 %v286_v36, %v9753_v48  ;;  %v6914_v31 = vld [vmem:[#allocation8 + $0x4] ss:$48 sps:$4 sm:$0xff]   ;;  %v6916_v59 = vld [vmem:[#allocation8 + $0xc] ss:$48 sps:$4 sm:$0xff]  }
  0x7e   :  { %v306_v11 = vsel %vm300_vm0, %v9751_v43, 0.0  ;;  %v6918_v16 = vld [vmem:[#allocation8] ss:$48 sps:$4 sm:$0xff]   ;;  %v6920_v12 = vld [vmem:[#allocation8 + $0x64] ss:$48 sps:$4 sm:$0xff]   ;;  %3345 = vmatprep.subr.bf16.mxu0 %v6914_v31  ;;  %3611 = vmatprep.subr.bf16.mxu1 %v6916_v59  ;;  %v9839_v0 = vunpack.c.l.bf16 %v7790_v7  ;;  %v9848_v43 = vunpack.c.h.bf16 %v7800_v14 }
  0x7f   :  { %283 = vadd.xlane.f32.xlu1 %v282_v53  ;;  %v305_v42 = vadd.f32 %v304_v63, %v303_v17  ;;  %v297_v53 = vadd.f32 %v296_v32, %v9752_v37  ;;  %3346 = vmatpush1.bf16.msra.mxu0 %v6918_v16  ;;  %v6924_v17 = vld [vmem:[#allocation8 + $0x60] ss:$48 sps:$4 sm:$0xff]   ;;  %v6925_v36 = vld [vmem:[#allocation8 + $0x68] ss:$48 sps:$4 sm:$0xff]   ;;  %v6926_v63 = vld [vmem:[#allocation8 + $0xc4] ss:$48 sps:$4 sm:$0xff]  }
  0x80   :  { %278 = vadd.xlane.f32.xlu0 %v277_v62  ;;  %v6919_v62 = vld [vmem:[#allocation8 + $0x8] ss:$48 sps:$4 sm:$0xff]   ;;  %3347 = vmatprep.subr.bf16.mxu0 %v6920_v12  ;;  %v6928_v32 = vld [vmem:[#allocation8 + $0xcc] ss:$48 sps:$4 sm:$0xff]   ;;  %v6942_v12 = vld [vmem:[#allocation8 + $0x180] ss:$48 sps:$4 sm:$0xff]  }
  0x81   :  { %v307_v18 = vadd.f32 %v306_v11, %v305_v42  ;;  %3612 = vmatpush1.bf16.msra.mxu1 %v6919_v62  ;;  %v6931_v42 = vld [vmem:[#allocation8 + $0xc8] ss:$48 sps:$4 sm:$0xff]   ;;  %v6934_v11 = vld [vmem:[#allocation8 + $0x12c] ss:$48 sps:$4 sm:$0xff]   ;;  %v6944_v16 = vld [vmem:[#allocation8 + $0x1e4] ss:$48 sps:$4 sm:$0xff]  }
  0x82   :  { %3613 = vmatprep.subr.bf16.mxu1 %v6922_v47  ;;  %v6937_v59 = vld [vmem:[#allocation8 + $0x128] ss:$48 sps:$4 sm:$0xff]   ;;  %v6940_v31 = vld [vmem:[#allocation8 + $0x18c] ss:$48 sps:$4 sm:$0xff]  }
  0x83   :  { %293 = vadd.xlane.f32.xlu1 %v292_v33  ;;  %3348 = vmatpush1.bf16.msra.mxu0 %v6924_v17  ;;  %v6932_v33 = vld [vmem:[#allocation8 + $0x124] ss:$48 sps:$4 sm:$0xff]   ;;  %v6943_v47 = vld [vmem:[#allocation8 + $0x188] ss:$48 sps:$4 sm:$0xff]   ;;  %v6946_v62 = vld [vmem:[#allocation8 + $0x1ec] ss:$48 sps:$4 sm:$0xff]  }
  0x84   :  { %288 = vadd.xlane.f32.xlu0 %v287_v61  ;;  %v6930_v61 = vld [vmem:[#allocation8 + $0xc0] ss:$48 sps:$4 sm:$0xff]   ;;  %3349 = vmatprep.subr.bf16.mxu0 %v6926_v63  ;;  %v6950_v63 = vld [vmem:[#allocation8 + $0x244] ss:$48 sps:$4 sm:$0xff]  }
  0x85   :  { %3614 = vmatpush1.bf16.msra.mxu1 %v6925_v36  ;;  %v6948_v17 = vld [vmem:[#allocation8 + $0x1e0] ss:$48 sps:$4 sm:$0xff]   ;;  %v6949_v36 = vld [vmem:[#allocation8 + $0x1e8] ss:$48 sps:$4 sm:$0xff]  }
  0x86   :  { %3615 = vmatprep.subr.bf16.mxu1 %v6928_v32  ;;  %v6952_v32 = vld [vmem:[#allocation8 + $0x24c] ss:$48 sps:$4 sm:$0xff]  }
  0x87   :  { %298 = vadd.xlane.f32.xlu1 %v297_v53  ;;  %3350 = vmatpush1.bf16.msra.mxu0 %v6930_v61  ;;  %v6936_v53 = vld [vmem:[#allocation8 + $0x120] ss:$48 sps:$4 sm:$0xff]  }
  0x88   :  { %308 = vadd.xlane.f32.xlu0 %v307_v18  ;;  %3351 = vmatprep.subr.bf16.mxu0 %v6932_v33  ;;  %v6938_v18 = vld [vmem:[#allocation8 + $0x184] ss:$48 sps:$4 sm:$0xff]   ;;  %v6954_v61 = vld [vmem:[#allocation8 + $0x240] ss:$48 sps:$4 sm:$0xff]  }
  0x89   :  { %3616 = vmatpush1.bf16.msra.mxu1 %v6931_v42  ;;  %v6955_v42 = vld [vmem:[#allocation8 + $0x248] ss:$48 sps:$4 sm:$0xff]   ;;  %v6956_v33 = vld [vmem:[#allocation8 + $0x2a4] ss:$48 sps:$4 sm:$0xff]  }
  0x8a   :  { %3617 = vmatprep.subr.bf16.mxu1 %v6934_v11  ;;  %v6958_v11 = vld [vmem:[#allocation8 + $0x2ac] ss:$48 sps:$4 sm:$0xff]  }
  0x8b   :  { %3352 = vmatpush1.bf16.msra.mxu0 %v6936_v53  ;;  %v6960_v53 = vld [vmem:[#allocation8 + $0x2a0] ss:$48 sps:$4 sm:$0xff]  }
  0x8c   :  { %3353 = vmatprep.subr.bf16.mxu0 %v6938_v18  ;;  %v6962_v18 = vld [vmem:[#allocation8 + $0x304] ss:$48 sps:$4 sm:$0xff]  }
  0x8d   :  { %3618 = vmatpush1.bf16.msra.mxu1 %v6937_v59  ;;  %v6961_v59 = vld [vmem:[#allocation8 + $0x2a8] ss:$48 sps:$4 sm:$0xff]  }
  0x8e   :  { %3619 = vmatprep.subr.bf16.mxu1 %v6940_v31  ;;  %v6964_v31 = vld [vmem:[#allocation8 + $0x30c] ss:$48 sps:$4 sm:$0xff]  }
  0x8f   :  { %3354 = vmatpush1.bf16.msra.mxu0 %v6942_v12  ;;  %v6966_v12 = vld [vmem:[#allocation8 + $0x300] ss:$48 sps:$4 sm:$0xff]  }
  0x90   :  { %3355 = vmatprep.subr.bf16.mxu0 %v6944_v16  ;;  %v6968_v16 = vld [vmem:[#allocation8 + $0x364] ss:$48 sps:$4 sm:$0xff]  }
  0x91   :  { %3620 = vmatpush1.bf16.msra.mxu1 %v6943_v47  ;;  %v6967_v47 = vld [vmem:[#allocation8 + $0x308] ss:$48 sps:$4 sm:$0xff]  }
  0x92   :  { %3621 = vmatprep.subr.bf16.mxu1 %v6946_v62  ;;  %v6970_v62 = vld [vmem:[#allocation8 + $0x36c] ss:$48 sps:$4 sm:$0xff]  }
  0x93   :  { %3356 = vmatpush1.bf16.msra.mxu0 %v6948_v17 }
  0x94   :  { %3357 = vmatprep.subr.bf16.mxu0 %v6950_v63 }
  0x95   :  { %3622 = vmatpush1.bf16.msra.mxu1 %v6949_v36 }
  0x96   :  { %3623 = vmatprep.subr.bf16.mxu1 %v6952_v32 }
  0x97   :  { %3358 = vmatpush1.bf16.msra.mxu0 %v6954_v61 }
  0x98   :  { %3359 = vmatprep.subr.bf16.mxu0 %v6956_v33 }
  0x99   :  { %3624 = vmatpush1.bf16.msra.mxu1 %v6955_v42 }
  0x9a   :  { %3625 = vmatprep.subr.bf16.mxu1 %v6958_v11 }
  0x9b   :  { %3360 = vmatpush1.bf16.msra.mxu0 %v6960_v53  ;;  %v9837_v53 = vunpack.c.l.bf16 %v7784_v2 }
  0x9c   :  { %3361 = vmatprep.subr.bf16.mxu0 %v6962_v18  ;;  %v9838_v18 = vunpack.c.h.bf16 %v7784_v2 }
  0x9d   :  { %3626 = vmatpush1.bf16.msra.mxu1 %v6961_v59 }
  0x9e   :  { %3627 = vmatprep.subr.bf16.mxu1 %v6964_v31 }
  0x9f   :  { %3362 = vmatpush1.bf16.msra.mxu0 %v6966_v12 }
  0xa0   :  { %3363 = vmatprep.subr.bf16.mxu0 %v6968_v16 }
  0xa1   :  { %3628 = vmatpush1.bf16.msra.mxu1 %v6967_v47 }
  0xa2   :  { %3629 = vmatprep.subr.bf16.mxu1 %v6970_v62 }
  0xf0   :  { %v219_v17 = vpop.xlane.xlu1 %218 }
  0xf1   :  { %v313_v36 = vmul.f32 0.001953125, %v219_v17  ;;  %v209_v63 = vpop.xlane.xlu0 %208 }
  0xf2   :  { %v311_v32 = vmul.f32 0.001953125, %v209_v63  ;;  %v9843_v63 = vunpack.c.l.bf16 %v7792_v8 }
  0xf3   :  { %v8106_v61 = vsub.f32 %v131_v3, %v313_v36  ;;  %v8110_v42 = vsub.f32 %v132_v4, %v313_v36  ;;  %v8114_v33 = vsub.f32 %v133_v5, %v313_v36  ;;  %v8118_v11 = vsub.f32 %v134_v6, %v313_v36 }
  0xf4   :  { %v8122_v59 = vsub.f32 %v9837_v53, %v311_v32  ;;  %v8126_v3 = vsub.f32 %v9838_v18, %v311_v32  ;;  %v224_v31 = vpop.xlane.xlu1 %223  ;;  %v8130_v4 = vsub.f32 %v9839_v0, %v311_v32  ;;  %v9841_v5 = vunpack.c.h.bf16 %v7790_v7 }
  0xf5   :  { %9833 = vst [vmem:[#allocation16_spill] sm:$0xff] %v8106_v61  ;;  %9834 = vst [vmem:[#allocation17_spill] sm:$0xff] %v8110_v42  ;;  %v314_v1 = vmul.f32 0.001953125, %v224_v31  ;;  %v214_v6 = vpop.xlane.xlu0 %213  ;;  %v419_v47 = vmul.f32 %v8106_v61, %v8106_v61  ;;  %v420_v16 = vmul.f32 %v8110_v42, %v8110_v42  ;;  %v421_v2 = vmul.f32 %v8114_v33, %v8114_v33 }
  0xf6   :  { %9835 = vst [vmem:[#allocation18_spill] sm:$0xff] %v8114_v33  ;;  %9836 = vst [vmem:[#allocation19_spill] sm:$0xff] %v8118_v11  ;;  %v8134_v12 = vsub.f32 %v9841_v5, %v311_v32  ;;  %v312_v62 = vmul.f32 0.001953125, %v214_v6  ;;  %v411_v17 = vmul.f32 %v8122_v59, %v8122_v59  ;;  %v412_v7 = vmul.f32 %v8126_v3, %v8126_v3 }
  0xf7   :  { %9840 = vst [vmem:[#allocation20_spill] sm:$0xff] %v8130_v4  ;;  %v413_v36 = vmul.f32 %v8130_v4, %v8130_v4  ;;  %v8150_v32 = vsub.f32 %v9843_v63, %v314_v1  ;;  %v9845_v53 = vunpack.c.h.bf16 %v7792_v8  ;;  %v422_v0 = vmul.f32 %v8118_v11, %v8118_v11 }
  0xf8   :  { %9842 = vst [vmem:[#allocation21_spill] sm:$0xff] %v8134_v12  ;;  %v414_v31 = vmul.f32 %v8134_v12, %v8134_v12  ;;  %v9846_v5 = vunpack.c.l.bf16 %v7800_v14  ;;  %v8166_v37 = vsub.f32 %v9848_v43, %v312_v62  ;;  %v234_v63 = vpop.xlane.xlu1 %233  ;;  %v491_v48 = vadd.f32 %v412_v7, %v411_v17 }
  0xf9   :  { %9844 = vst [vmem:[#allocation22_spill] sm:$0xff] %v8150_v32  ;;  %v8154_v18 = vsub.f32 %v9845_v53, %v314_v1  ;;  %v501_v10 = vadd.f32 %v420_v16, %v419_v47  ;;  %v316_v8 = vmul.f32 0.001953125, %v234_v63  ;;  %v229_v53 = vpop.xlane.xlu0 %228  ;;  %v9849_v33 = vunpack.c.l.bf16 %v7802_v15 }
  0xfa   :  { %v8162_v6 = vsub.f32 %v9846_v5, %v312_v62  ;;  %v9851_v42 = vunpack.c.h.bf16 %v7802_v15  ;;  %v9852_v5 = vunpack.c.l.bf16 %v7794_v9  ;;  %v315_v14 = vmul.f32 0.001953125, %v229_v53 }
  0xfb   :  { %v8170_v61 = vsub.f32 %v9849_v33, %v312_v62  ;;  %v492_v43 = vadd.f32 %v491_v48, %v413_v36  ;;  %v502_v12 = vadd.f32 %v501_v10, %v421_v2  ;;  %v9854_v16 = vunpack.c.l.bf16 %v7811_v20 }
  0xfc   :  { %9847 = vst [vmem:[#allocation23_spill] sm:$0xff] %v8162_v6  ;;  %v8174_v11 = vsub.f32 %v9851_v42, %v312_v62  ;;  %v8178_v4 = vsub.f32 %v9852_v5, %v314_v1  ;;  %v415_v47 = vmul.f32 %v8162_v6, %v8162_v6  ;;  %v9856_v33 = vunpack.c.h.bf16 %v7811_v20  ;;  %v244_v36 = vpop.xlane.xlu1 %243 }
  0xfd   :  { %9850 = vst [vmem:[#allocation24_spill] sm:$0xff] %v8170_v61  ;;  %v8184_v17 = vsub.f32 %v9854_v16, %v316_v8  ;;  %v416_v15 = vmul.f32 %v8166_v37, %v8166_v37  ;;  %v417_v42 = vmul.f32 %v8170_v61, %v8170_v61  ;;  %v9857_v48 = vunpack.c.l.bf16 %v7830_v30  ;;  %v239_v5 = vpop.xlane.xlu0 %238 }
  0xfe   :  { %9853 = vst [vmem:[#allocation25_spill] sm:$0xff] %v8178_v4  ;;  %v8188_v7 = vsub.f32 %v9856_v33, %v316_v8  ;;  %v9859_v2 = vunpack.c.h.bf16 %v7830_v30  ;;  %v493_v63 = vadd.f32 %v492_v43, %v414_v31  ;;  %v503_v53 = vadd.f32 %v502_v12, %v422_v0 }
  0xff   :  { %9855 = vst [vmem:[#allocation26_spill] sm:$0xff] %v8184_v17  ;;  %v8196_v10 = vsub.f32 %v9857_v48, %v315_v14  ;;  %v8202_v20 = vmul.f32 0.001953125, %v244_v36  ;;  %v418_v16 = vmul.f32 %v8174_v11, %v8174_v11  ;;  %v496_v33 = vadd.f32 %v416_v15, %v415_v47 }
 0x100   :  { %v8200_v62 = vsub.f32 %v9859_v2, %v315_v14  ;;  %v9861_v61 = vunpack.c.h.bf16 %v7794_v9  ;;  %v317_v48 = vmul.f32 0.001953125, %v239_v5  ;;  %494 = vadd.xlane.f32.xlu0 %v493_v63  ;;  %v423_v30 = vmul.f32 %v8150_v32, %v8150_v32  ;;  %v254_v5 = vpop.xlane.xlu1 %253 }
 0x101   :  { %9858 = vst [vmem:[#allocation27_spill] sm:$0xff] %v8196_v10  ;;  %v424_v31 = vmul.f32 %v8154_v18, %v8154_v18  ;;  %v425_v12 = vmul.f32 %v8178_v4, %v8178_v4  ;;  %v9863_v0 = vunpack.c.l.bf16 %v7847_v39  ;;  %v9865_v9 = vunpack.c.h.bf16 %v7847_v39 }
 0x102   :  { %9860 = vst [vmem:[#allocation28_spill] sm:$0xff] %v8200_v62  ;;  %v8208_v6 = vsub.f32 %v9861_v61, %v314_v1  ;;  %v497_v1 = vadd.f32 %v496_v33, %v417_v42  ;;  %v9867_v15 = vunpack.c.l.bf16 %v7860_v45  ;;  %v9869_v36 = vunpack.c.h.bf16 %v7860_v45  ;;  %v249_v42 = vpop.xlane.xlu0 %248 }
 0x103   :  { %v8219_v43 = vsub.f32 %v9863_v0, %v8202_v20  ;;  %v8224_v61 = vsub.f32 %v9865_v9, %v8202_v20  ;;  %v506_v0 = vadd.f32 %v424_v31, %v423_v30  ;;  %v9871_v4 = vunpack.c.l.bf16 %v7840_v35 }
 0x104   :  { %9862 = vst [vmem:[#allocation29_spill] sm:$0xff] %v8208_v6  ;;  %v426_v47 = vmul.f32 %v8208_v6, %v8208_v6  ;;  %v8230_v2 = vsub.f32 %v9867_v15, %v317_v48  ;;  %v8234_v63 = vsub.f32 %v9869_v36, %v317_v48  ;;  %v8240_v39 = vmul.f32 0.001953125, %v254_v5  ;;  %504 = vadd.xlane.f32.xlu0 %v503_v53 }
 0x105   :  { %9864 = vst [vmem:[#allocation30_spill] sm:$0xff] %v8219_v43  ;;  %9866 = vst [vmem:[#allocation31_spill] sm:$0xff] %v8224_v61  ;;  %v8238_v32 = vsub.f32 %v9871_v4, %v315_v14  ;;  %v498_v33 = vadd.f32 %v497_v1, %v418_v16  ;;  %v9873_v9 = vunpack.c.h.bf16 %v7840_v35  ;;  %v427_v15 = vmul.f32 %v8196_v10, %v8196_v10 }
 0x106   :  { %9868 = vst [vmem:[#allocation32_spill] sm:$0xff] %v8230_v2  ;;  %9870 = vst [vmem:[#allocation33_spill] sm:$0xff] %v8234_v63  ;;  %v319_v45 = vmul.f32 0.001953125, %v249_v42  ;;  %v507_v36 = vadd.f32 %v506_v0, %v425_v12  ;;  %v428_v30 = vmul.f32 %v8200_v62, %v8200_v62  ;;  %v9875_v31 = vunpack.c.l.bf16 %v7875_v55 }
 0x107   :  { %9872 = vst [vmem:[#allocation34_spill] sm:$0xff] %v8238_v32  ;;  %v8244_v6 = vsub.f32 %v9873_v9, %v315_v14  ;;  %v429_v4 = vmul.f32 %v8238_v32, %v8238_v32  ;;  %v9876_v35 = vunpack.c.h.bf16 %v7875_v55  ;;  %499 = vadd.xlane.f32.xlu1 %v498_v33  ;;  %v9877_v12 = vunpack.c.l.bf16 %v7820_v25  ;;  %v259_v33 = vpop.xlane.xlu0 %258 }
 0x108   :  { %v8255_v16 = vsub.f32 %v9875_v31, %v8240_v39  ;;  %v9879_v5 = vunpack.c.l.bf16 %v7893_v21  ;;  %v9881_v42 = vunpack.c.h.bf16 %v7893_v21  ;;  %v264_v31 = vpop.xlane.xlu1 %263  ;;  %v508_v55 = vadd.f32 %v507_v36, %v426_v47 }
 0x109   :  { %9874 = vst [vmem:[#allocation35_spill] sm:$0xff] %v8244_v6  ;;  %v8260_v14 = vsub.f32 %v9876_v35, %v8240_v39  ;;  %v430_v53 = vmul.f32 %v8244_v6, %v8244_v6  ;;  %v8266_v1 = vsub.f32 %v9877_v12, %v316_v8  ;;  %v511_v35 = vadd.f32 %v428_v30, %v427_v15 }
 0x10a   :  { %v8270_v0 = vsub.f32 %v9879_v5, %v319_v45  ;;  %v8274_v9 = vsub.f32 %v9881_v42, %v319_v45  ;;  %v8276_v32 = vmul.f32 0.001953125, %v264_v31  ;;  %v9883_v6 = vunpack.c.h.bf16 %v7820_v25 }
 0x10b   :  { %9878 = vst [vmem:[#allocation36_spill] sm:$0xff] %v8266_v1  ;;  %v431_v12 = vmul.f32 %v8184_v17, %v8184_v17  ;;  %v432_v5 = vmul.f32 %v8188_v7, %v8188_v7  ;;  %v8286_v62 = vmul.f32 0.001953125, %v259_v33  ;;  %v512_v21 = vadd.f32 %v511_v35, %v429_v4  ;;  %509 = vadd.xlane.f32.xlu1 %v508_v55 }
 0x10c   :  { %9880 = vst [vmem:[#allocation37_spill] sm:$0xff] %v8270_v0  ;;  %9882 = vst [vmem:[#allocation38_spill] sm:$0xff] %v8274_v9  ;;  %v8280_v10 = vsub.f32 %v9883_v6, %v316_v8  ;;  %v433_v47 = vmul.f32 %v8266_v1, %v8266_v1  ;;  %v9885_v15 = vunpack.c.l.bf16 %v7867_v50  ;;  %v9887_v25 = vunpack.c.l.bf16 %v7897_v27  ;;  %v274_v1 = vpop.xlane.xlu1 %273 }
 0x10d   :  { %v9888_v8 = vunpack.c.h.bf16 %v7897_v27  ;;  %v516_v42 = vadd.f32 %v432_v5, %v431_v12  ;;  %v9889_v31 = vunpack.c.l.bf16 %v7907_v41  ;;  %v9890_v33 = vunpack.c.h.bf16 %v7907_v41 }
 0x10e   :  { %9884 = vst [vmem:[#allocation39_spill] sm:$0xff] %v8280_v10  ;;  %v8292_v36 = vsub.f32 %v9885_v15, %v317_v48  ;;  %v8297_v6 = vsub.f32 %v9887_v25, %v8276_v32  ;;  %v434_v4 = vmul.f32 %v8280_v10, %v8280_v10  ;;  %v513_v25 = vadd.f32 %v512_v21, %v430_v53  ;;  %v269_v10 = vpop.xlane.xlu0 %268 }
 0x10f   :  { %v8302_v30 = vsub.f32 %v9888_v8, %v8276_v32  ;;  %v8309_v35 = vsub.f32 %v9889_v31, %v8286_v62  ;;  %v8314_v15 = vsub.f32 %v9890_v33, %v8286_v62  ;;  %v9891_v27 = vunpack.c.h.bf16 %v7867_v50 }
 0x110   :  { %9886 = vst [vmem:[#allocation40_spill] sm:$0xff] %v8292_v36  ;;  %v8320_v55 = vmul.f32 0.001953125, %v274_v1  ;;  %v517_v12 = vadd.f32 %v516_v42, %v433_v47  ;;  %v435_v5 = vmul.f32 %v8230_v2, %v8230_v2  ;;  %v436_v31 = vmul.f32 %v8234_v63, %v8234_v63  ;;  %514 = vadd.xlane.f32.xlu0 %v513_v25  ;;  %v284_v2 = vpop.xlane.xlu1 %283 }
 0x111   :  { %v8318_v8 = vsub.f32 %v9891_v27, %v317_v48  ;;  %v8326_v41 = vmul.f32 0.001953125, %v269_v10  ;;  %v437_v53 = vmul.f32 %v8292_v36, %v8292_v36  ;;  %v9893_v48 = vunpack.c.l.bf16 %v7858_v44 }
 0x112   :  { %v9895_v21 = vunpack.c.l.bf16 %v7927_v49  ;;  %v9896_v10 = vunpack.c.h.bf16 %v7927_v49  ;;  %v518_v33 = vadd.f32 %v517_v12, %v434_v4  ;;  %v521_v25 = vadd.f32 %v436_v31, %v435_v5  ;;  %v279_v5 = vpop.xlane.xlu0 %278 }
 0x113   :  { %9892 = vst [vmem:[#allocation41_spill] sm:$0xff] %v8318_v8  ;;  %v438_v50 = vmul.f32 %v8318_v8, %v8318_v8  ;;  %v8335_v1 = vsub.f32 %v9893_v48, %v8202_v20  ;;  %v9897_v27 = vunpack.c.l.bf16 %v7945_v52  ;;  %v9898_v48 = vunpack.c.h.bf16 %v7945_v52 }
 0x114   :  { %v8340_v47 = vsub.f32 %v9895_v21, %v8320_v55  ;;  %v8345_v42 = vsub.f32 %v9896_v10, %v8320_v55  ;;  %v9899_v21 = vunpack.c.h.bf16 %v7858_v44  ;;  %v439_v49 = vmul.f32 %v8219_v43, %v8219_v43  ;;  %519 = vadd.xlane.f32.xlu1 %v518_v33  ;;  %v6976_v43 = vld [vmem:[#allocation8 + $0x3cc] ss:$48 sps:$4 sm:$0xff]  }
 0x115   :  { %9894 = vst [vmem:[#allocation42_spill] sm:$0xff] %v8335_v1  ;;  %v8350_v36 = vsub.f32 %v9897_v27, %v8326_v41  ;;  %v8355_v8 = vsub.f32 %v9898_v48, %v8326_v41  ;;  %v522_v4 = vadd.f32 %v521_v25, %v437_v53  ;;  %v8364_v12 = vmul.f32 0.001953125, %v284_v2 }
 0x116   :  { %v8360_v63 = vsub.f32 %v9899_v21, %v8202_v20  ;;  %v440_v31 = vmul.f32 %v8224_v61, %v8224_v61  ;;  %v441_v52 = vmul.f32 %v8335_v1, %v8335_v1  ;;  %v8370_v10 = vmul.f32 0.001953125, %v279_v5 }
 0x117   :  { %v9901_v20 = vunpack.c.l.bf16 %v7895_v26  ;;  %v9903_v53 = vunpack.c.h.bf16 %v7895_v26  ;;  %v523_v33 = vadd.f32 %v522_v4, %v438_v50  ;;  %v9905_v25 = vunpack.c.l.bf16 %v7962_v46 }
 0x118   :  { %9900 = vst [vmem:[#allocation43_spill] sm:$0xff] %v8360_v63  ;;  %v442_v44 = vmul.f32 %v8360_v63, %v8360_v63  ;;  %v9906_v21 = vunpack.c.h.bf16 %v7962_v46  ;;  %v526_v1 = vadd.f32 %v440_v31, %v439_v49  ;;  %v9908_v26 = vunpack.c.h.bf16 %v7971_v34  ;;  %v294_v46 = vpop.xlane.xlu1 %293  ;;  %v6974_v49 = vld [vmem:[#allocation8 + $0x3c4] ss:$48 sps:$4 sm:$0xff]  }
 0x119   :  { %v8376_v27 = vsub.f32 %v9901_v20, %v319_v45  ;;  %v8380_v2 = vsub.f32 %v9903_v53, %v319_v45  ;;  %v8385_v48 = vsub.f32 %v9905_v25, %v8364_v12  ;;  %v9907_v20 = vunpack.c.l.bf16 %v7971_v34  ;;  %v6972_v53 = vld [vmem:[#allocation8 + $0x360] ss:$48 sps:$4 sm:$0xff]   ;;  %v6973_v25 = vld [vmem:[#allocation8 + $0x368] ss:$48 sps:$4 sm:$0xff]   ;;  %524 = vadd.xlane.f32.xlu0 %v523_v33 }
 0x11a   :  { %v8390_v5 = vsub.f32 %v9906_v21, %v8364_v12  ;;  %v8400_v45 = vsub.f32 %v9908_v26, %v8370_v10  ;;  %v443_v50 = vmul.f32 %v8270_v0, %v8270_v0  ;;  %v444_v4 = vmul.f32 %v8274_v9, %v8274_v9  ;;  %v289_v26 = vpop.xlane.xlu0 %288  ;;  %3364 = vmatpush1.bf16.msra.mxu0 %v6972_v53 }
 0x11b   :  { %9902 = vst [vmem:[#allocation44_spill] sm:$0xff] %v8376_v27  ;;  %9904 = vst [vmem:[#allocation45_spill] sm:$0xff] %v8380_v2  ;;  %v8395_v63 = vsub.f32 %v9907_v20, %v8370_v10  ;;  %v527_v31 = vadd.f32 %v526_v1, %v441_v52  ;;  %v445_v21 = vmul.f32 %v8376_v27, %v8376_v27  ;;  %v8410_v20 = vmul.f32 0.001953125, %v294_v46 }
 0x11c   :  { %v446_v34 = vmul.f32 %v8380_v2, %v8380_v2  ;;  %v531_v0 = vadd.f32 %v444_v4, %v443_v50  ;;  %v8412_v61 = vmul.f32 0.001953125, %v289_v26  ;;  %v9909_v9 = vunpack.c.l.bf16 %v7884_v60  ;;  %3630 = vmatpush1.bf16.msra.mxu1 %v6973_v25  ;;  %3365 = vmatprep.subr.bf16.mxu0 %v6974_v49 }
 0x11d   :  { %v9911_v1 = vunpack.c.h.bf16 %v7884_v60  ;;  %v528_v33 = vadd.f32 %v527_v31, %v442_v44  ;;  %v9913_v46 = vunpack.c.l.bf16 %v7991_v29  ;;  %v9914_v50 = vunpack.c.h.bf16 %v7991_v29  ;;  %v299_v31 = vpop.xlane.xlu1 %298  ;;  %3631 = vmatprep.subr.bf16.mxu1 %v6976_v43  ;;  %v6980_v43 = vld [vmem:[#allocation8 + $0x424] ss:$48 sps:$4 sm:$0xff]  }
 0x11e   :  { %v8417_v17 = vsub.f32 %v9909_v9, %v8240_v39  ;;  %v447_v9 = vmul.f32 %v8255_v16, %v8255_v16  ;;  %v532_v60 = vadd.f32 %v531_v0, %v445_v21  ;;  %v9916_v44 = vunpack.c.h.bf16 %v8007_v24 }
 0x11f   :  { %v8422_v52 = vsub.f32 %v9911_v1, %v8240_v39  ;;  %v8427_v27 = vsub.f32 %v9913_v46, %v8410_v20  ;;  %v8432_v4 = vsub.f32 %v9914_v50, %v8410_v20  ;;  %v9915_v39 = vunpack.c.l.bf16 %v8007_v24  ;;  %529 = vadd.xlane.f32.xlu1 %v528_v33  ;;  %v6978_v46 = vld [vmem:[#allocation8 + $0x3c0] ss:$48 sps:$4 sm:$0xff]   ;;  %v6979_v50 = vld [vmem:[#allocation8 + $0x3c8] ss:$48 sps:$4 sm:$0xff]  }
 0x120   :  { %9910 = vst [vmem:[#allocation46_spill] sm:$0xff] %v8417_v17  ;;  %v8444_v25 = vsub.f32 %v9916_v44, %v8412_v61  ;;  %v448_v29 = vmul.f32 %v8260_v14, %v8260_v14  ;;  %v449_v49 = vmul.f32 %v8417_v17, %v8417_v17  ;;  %v9917_v21 = vunpack.c.l.bf16 %v7925_v58  ;;  %3366 = vmatpush1.bf16.msra.mxu0 %v6978_v46 }
 0x121   :  { %9912 = vst [vmem:[#allocation47_spill] sm:$0xff] %v8422_v52  ;;  %v8439_v53 = vsub.f32 %v9915_v39, %v8412_v61  ;;  %v450_v0 = vmul.f32 %v8422_v52, %v8422_v52  ;;  %v9919_v24 = vunpack.c.h.bf16 %v7925_v58  ;;  %v533_v33 = vadd.f32 %v532_v60, %v446_v34  ;;  %v6982_v52 = vld [vmem:[#allocation8 + $0x42c] ss:$48 sps:$4 sm:$0xff]   ;;  %3632 = vmatpush1.bf16.msra.mxu1 %v6979_v50 }
 0x122   :  { %v8455_v26 = vsub.f32 %v9917_v21, %v8286_v62  ;;  %v536_v39 = vadd.f32 %v448_v29, %v447_v9  ;;  %v451_v44 = vmul.f32 %v8309_v35, %v8309_v35  ;;  %v452_v17 = vmul.f32 %v8314_v15, %v8314_v15  ;;  %3367 = vmatprep.subr.bf16.mxu0 %v6980_v43 }
 0x123   :  { %v8460_v1 = vsub.f32 %v9919_v24, %v8286_v62  ;;  %v8470_v62 = vmul.f32 0.001953125, %v299_v31  ;;  %v9921_v24 = vunpack.c.l.bf16 %v7905_v40  ;;  %534 = vadd.xlane.f32.xlu0 %v533_v33  ;;  %v9923_v29 = vunpack.c.h.bf16 %v7905_v40  ;;  %3633 = vmatprep.subr.bf16.mxu1 %v6982_v52 }
 0x124   :  { %9918 = vst [vmem:[#allocation48_spill] sm:$0xff] %v8455_v26  ;;  %v453_v21 = vmul.f32 %v8455_v26, %v8455_v26  ;;  %v537_v9 = vadd.f32 %v536_v39, %v449_v49  ;;  %v541_v60 = vadd.f32 %v452_v17, %v451_v44  ;;  %v455_v26 = vmul.f32 %v8297_v6, %v8297_v6 }
 0x125   :  { %9920 = vst [vmem:[#allocation49_spill] sm:$0xff] %v8460_v1  ;;  %v454_v58 = vmul.f32 %v8460_v1, %v8460_v1  ;;  %v8475_v34 = vsub.f32 %v9921_v24, %v8276_v32  ;;  %v8480_v2 = vsub.f32 %v9923_v29, %v8276_v32  ;;  %v9925_v31 = vunpack.c.l.bf16 %v8025_v38  ;;  %v309_v32 = vpop.xlane.xlu0 %308 }
 0x126   :  { %v9926_v46 = vunpack.c.h.bf16 %v8025_v38  ;;  %v456_v17 = vmul.f32 %v8302_v30, %v8302_v30  ;;  %v538_v49 = vadd.f32 %v537_v9, %v450_v0  ;;  %v542_v33 = vadd.f32 %v541_v60, %v453_v21 }
 0x127   :  { %9922 = vst [vmem:[#allocation50_spill] sm:$0xff] %v8475_v34  ;;  %9924 = vst [vmem:[#allocation51_spill] sm:$0xff] %v8480_v2  ;;  %v8487_v1 = vsub.f32 %v9925_v31, %v8470_v62  ;;  %v457_v40 = vmul.f32 %v8475_v34, %v8475_v34  ;;  %v458_v39 = vmul.f32 %v8480_v2, %v8480_v2  ;;  %v9927_v44 = vunpack.c.l.bf16 %v7952_v57 }
 0x128   :  { %v8492_v50 = vsub.f32 %v9926_v46, %v8470_v62  ;;  %v546_v38 = vadd.f32 %v456_v17, %v455_v26  ;;  %v9929_v29 = vunpack.c.h.bf16 %v7952_v57  ;;  %v459_v43 = vmul.f32 %v8350_v36, %v8350_v36  ;;  %539 = vadd.xlane.f32.xlu1 %v538_v49  ;;  %v6984_v57 = vld [vmem:[#allocation8 + $0x420] ss:$48 sps:$4 sm:$0xff]  }
 0x129   :  { %v8503_v24 = vsub.f32 %v9927_v44, %v8326_v41  ;;  %v460_v0 = vmul.f32 %v8355_v8, %v8355_v8  ;;  %v543_v21 = vadd.f32 %v542_v33, %v454_v58  ;;  %v8516_v60 = vmul.f32 0.001953125, %v309_v32  ;;  %3368 = vmatpush1.bf16.msra.mxu0 %v6984_v57 }
 0x12a   :  { %v8508_v31 = vsub.f32 %v9929_v29, %v8326_v41  ;;  %v9931_v52 = vunpack.c.l.bf16 %v7935_v54  ;;  %v6985_v41 = vld [vmem:[#allocation8 + $0x428] ss:$48 sps:$4 sm:$0xff]   ;;  %v547_v46 = vadd.f32 %v546_v38, %v457_v40  ;;  %v9933_v58 = vunpack.c.h.bf16 %v7935_v54  ;;  %v6986_v54 = vld [vmem:[#allocation8 + $0x484] ss:$48 sps:$4 sm:$0xff]  }
 0x12b   :  { %9928 = vst [vmem:[#allocation52_spill] sm:$0xff] %v8503_v24  ;;  %v461_v9 = vmul.f32 %v8503_v24, %v8503_v24  ;;  %v551_v44 = vadd.f32 %v460_v0, %v459_v43  ;;  %544 = vadd.xlane.f32.xlu0 %v543_v21  ;;  %v9935_v32 = vunpack.c.l.bf16 %v8030_v13  ;;  %v9936_v29 = vunpack.c.h.bf16 %v8030_v13  ;;  %3634 = vmatpush1.bf16.msra.mxu1 %v6985_v41 }
 0x12c   :  { %9930 = vst [vmem:[#allocation53_spill] sm:$0xff] %v8508_v31  ;;  %v8521_v26 = vsub.f32 %v9931_v52, %v8320_v55  ;;  %v462_v17 = vmul.f32 %v8508_v31, %v8508_v31  ;;  %v8528_v49 = vsub.f32 %v9933_v58, %v8320_v55  ;;  %v463_v40 = vmul.f32 %v8340_v47, %v8340_v47 }
 0x12d   :  { %v8533_v33 = vsub.f32 %v9935_v32, %v8516_v60  ;;  %v8538_v52 = vsub.f32 %v9936_v29, %v8516_v60  ;;  %v464_v38 = vmul.f32 %v8345_v42, %v8345_v42  ;;  %v548_v55 = vadd.f32 %v547_v46, %v458_v39  ;;  %3369 = vmatprep.subr.bf16.mxu0 %v6986_v54 }
 0x12e   :  { %9932 = vst [vmem:[#allocation54_spill] sm:$0xff] %v8521_v26  ;;  %9934 = vst [vmem:[#allocation55_spill] sm:$0xff] %v8528_v49  ;;  %v552_v43 = vadd.f32 %v551_v44, %v461_v9  ;;  %v465_v0 = vmul.f32 %v8521_v26, %v8521_v26  ;;  %v466_v21 = vmul.f32 %v8528_v49, %v8528_v49  ;;  %v9937_v13 = vunpack.c.l.bf16 %v7989_v19  ;;  %v6988_v9 = vld [vmem:[#allocation8 + $0x48c] ss:$48 sps:$4 sm:$0xff]  }
 0x12f   :  { %v556_v58 = vadd.f32 %v464_v38, %v463_v40  ;;  %v9939_v29 = vunpack.c.h.bf16 %v7989_v19  ;;  %v467_v39 = vmul.f32 %v8395_v63, %v8395_v63  ;;  %549 = vadd.xlane.f32.xlu1 %v548_v55  ;;  %v468_v57 = vmul.f32 %v8400_v45, %v8400_v45  ;;  %3635 = vmatprep.subr.bf16.mxu1 %v6988_v9  ;;  %v9975_v26 = vld [vmem:[#allocation28_spill] sm:$0xff] }
 0x130   :  { %v8551_v32 = vsub.f32 %v9937_v13, %v8370_v10  ;;  %v553_v46 = vadd.f32 %v552_v43, %v462_v17  ;;  %v9941_v44 = vunpack.c.l.bf16 %v7969_v56  ;;  %v9943_v19 = vunpack.c.h.bf16 %v7969_v56 }
 0x131   :  { %v8556_v24 = vsub.f32 %v9939_v29, %v8370_v10  ;;  %v557_v38 = vadd.f32 %v556_v58, %v465_v0  ;;  %v471_v55 = vmul.f32 %v8385_v48, %v8385_v48  ;;  %v561_v43 = vadd.f32 %v468_v57, %v467_v39  ;;  %v6990_v0 = vld [vmem:[#allocation8 + $0x480] ss:$48 sps:$4 sm:$0xff]   ;;  %v6991_v58 = vld [vmem:[#allocation8 + $0x488] ss:$48 sps:$4 sm:$0xff]   ;;  %v6992_v57 = vld [vmem:[#allocation8 + $0x4e4] ss:$48 sps:$4 sm:$0xff]  }
 0x132   :  { %9938 = vst [vmem:[#allocation56_spill] sm:$0xff] %v8551_v32  ;;  %v8565_v40 = vsub.f32 %v9941_v44, %v8364_v12  ;;  %v8570_v10 = vsub.f32 %v9943_v19, %v8364_v12  ;;  %v469_v41 = vmul.f32 %v8551_v32, %v8551_v32  ;;  %554 = vadd.xlane.f32.xlu0 %v553_v46  ;;  %v9945_v44 = vunpack.c.l.bf16 %v8014_v23 }
 0x133   :  { %9940 = vst [vmem:[#allocation57_spill] sm:$0xff] %v8556_v24  ;;  %v470_v17 = vmul.f32 %v8556_v24, %v8556_v24  ;;  %v472_v13 = vmul.f32 %v8390_v5, %v8390_v5  ;;  %v558_v29 = vadd.f32 %v557_v38, %v466_v21  ;;  %v9947_v54 = vunpack.c.h.bf16 %v8014_v23  ;;  %3370 = vmatpush1.bf16.msra.mxu0 %v6990_v0 }
 0x134   :  { %9942 = vst [vmem:[#allocation58_spill] sm:$0xff] %v8565_v40  ;;  %9944 = vst [vmem:[#allocation59_spill] sm:$0xff] %v8570_v10  ;;  %v473_v56 = vmul.f32 %v8565_v40, %v8565_v40  ;;  %v474_v12 = vmul.f32 %v8570_v10, %v8570_v10  ;;  %v8587_v19 = vsub.f32 %v9945_v44, %v8412_v61  ;;  %v9949_v38 = vunpack.c.l.bf16 %v8005_v28  ;;  %v7013_v10 = vld [vmem:[#allocation8 + $0x608] ss:$48 sps:$4 sm:$0xff]  }
 0x135   :  { %v8592_v39 = vsub.f32 %v9947_v54, %v8412_v61  ;;  %v475_v46 = vmul.f32 %v8439_v53, %v8439_v53  ;;  %v562_v40 = vadd.f32 %v561_v43, %v469_v41  ;;  %v566_v32 = vadd.f32 %v472_v13, %v471_v55  ;;  %559 = vadd.xlane.f32.xlu1 %v558_v29  ;;  %v6994_v43 = vld [vmem:[#allocation8 + $0x4ec] ss:$48 sps:$4 sm:$0xff]  }
 0x136   :  { %9946 = vst [vmem:[#allocation60_spill] sm:$0xff] %v8587_v19  ;;  %v476_v21 = vmul.f32 %v8444_v25, %v8444_v25  ;;  %v8601_v44 = vsub.f32 %v9949_v38, %v8410_v20  ;;  %v477_v23 = vmul.f32 %v8587_v19, %v8587_v19  ;;  %v9951_v9 = vunpack.c.h.bf16 %v8005_v28  ;;  %3636 = vmatpush1.bf16.msra.mxu1 %v6991_v58 }
 0x137   :  { %9948 = vst [vmem:[#allocation61_spill] sm:$0xff] %v8592_v39  ;;  %v478_v61 = vmul.f32 %v8592_v39, %v8592_v39  ;;  %v479_v55 = vmul.f32 %v8427_v27, %v8427_v27  ;;  %v563_v13 = vadd.f32 %v562_v40, %v470_v17  ;;  %v567_v54 = vadd.f32 %v566_v32, %v473_v56 }
 0x138   :  { %9950 = vst [vmem:[#allocation62_spill] sm:$0xff] %v8601_v44  ;;  %v8610_v41 = vsub.f32 %v9951_v9, %v8410_v20  ;;  %v571_v38 = vadd.f32 %v476_v21, %v475_v46  ;;  %v480_v0 = vmul.f32 %v8432_v4, %v8432_v4  ;;  %v481_v29 = vmul.f32 %v8601_v44, %v8601_v44 }
 0x139   :  { %v9953_v28 = vunpack.c.l.bf16 %v8041_v51  ;;  %v9955_v40 = vunpack.c.h.bf16 %v8041_v51  ;;  %3371 = vmatprep.subr.bf16.mxu0 %v6992_v57  ;;  %564 = vadd.xlane.f32.xlu0 %v563_v13  ;;  %v568_v17 = vadd.f32 %v567_v54, %v474_v12  ;;  %v483_v46 = vmul.f32 %v8487_v1, %v8487_v1  ;;  %v6996_v12 = vld [vmem:[#allocation8 + $0x4e0] ss:$48 sps:$4 sm:$0xff]   ;;  %v6997_v57 = vld [vmem:[#allocation8 + $0x4e8] ss:$48 sps:$4 sm:$0xff]  }
 0x13a   :  { %9952 = vst [vmem:[#allocation63_spill] sm:$0xff] %v8610_v41  ;;  %v482_v19 = vmul.f32 %v8610_v41, %v8610_v41  ;;  %v572_v56 = vadd.f32 %v571_v38, %v477_v23  ;;  %v576_v58 = vadd.f32 %v480_v0, %v479_v55  ;;  %v484_v21 = vmul.f32 %v8492_v50, %v8492_v50  ;;  %v6998_v23 = vld [vmem:[#allocation8 + $0x544] ss:$48 sps:$4 sm:$0xff]  }
 0x13b   :  { %v8623_v20 = vsub.f32 %v9953_v28, %v8470_v62  ;;  %v8628_v32 = vsub.f32 %v9955_v40, %v8470_v62  ;;  %v9957_v51 = vunpack.c.l.bf16 %v8050_v22  ;;  %3637 = vmatprep.subr.bf16.mxu1 %v6994_v43  ;;  %569 = vadd.xlane.f32.xlu1 %v568_v17  ;;  %v9959_v54 = vunpack.c.h.bf16 %v8050_v22  ;;  %v7000_v40 = vld [vmem:[#allocation8 + $0x54c] ss:$48 sps:$4 sm:$0xff]  }
 0x13c   :  { %v573_v55 = vadd.f32 %v572_v56, %v478_v61  ;;  %v577_v13 = vadd.f32 %v576_v58, %v481_v29  ;;  %v487_v0 = vmul.f32 %v8533_v33, %v8533_v33  ;;  %3372 = vmatpush1.bf16.msra.mxu0 %v6996_v12  ;;  %3638 = vmatpush1.bf16.msra.mxu1 %v6997_v57 }
 0x13d   :  { %9954 = vst [vmem:[#allocation64_spill] sm:$0xff] %v8623_v20  ;;  %9956 = vst [vmem:[#allocation65_spill] sm:$0xff] %v8628_v32  ;;  %v485_v9 = vmul.f32 %v8623_v20, %v8623_v20  ;;  %v486_v28 = vmul.f32 %v8628_v32, %v8628_v32  ;;  %v8641_v62 = vsub.f32 %v9957_v51, %v8516_v60  ;;  %3373 = vmatprep.subr.bf16.mxu0 %v6998_v23  ;;  %v7009_v23 = vld [vmem:[#allocation8 + $0x5a8] ss:$48 sps:$4 sm:$0xff]   ;;  %v9970_v32 = vld [vmem:[#allocation16_spill] sm:$0xff] }
 0x13e   :  { %v8646_v38 = vsub.f32 %v9959_v54, %v8516_v60  ;;  %v581_v20 = vadd.f32 %v484_v21, %v483_v46  ;;  %v488_v51 = vmul.f32 %v8538_v52, %v8538_v52  ;;  %574 = vadd.xlane.f32.xlu0 %v573_v55  ;;  %v578_v61 = vadd.f32 %v577_v13, %v482_v19  ;;  %v7002_v46 = vld [vmem:[#allocation8 + $0x540] ss:$48 sps:$4 sm:$0xff]   ;;  %v7003_v21 = vld [vmem:[#allocation8 + $0x548] ss:$48 sps:$4 sm:$0xff]   ;;  %v7004_v19 = vld [vmem:[#allocation8 + $0x5a4] ss:$48 sps:$4 sm:$0xff]  }
 0x13f   :  { %9958 = vst [vmem:[#allocation66_spill] sm:$0xff] %v8641_v62  ;;  %v489_v43 = vmul.f32 %v8641_v62, %v8641_v62  ;;  %v586_v60 = vsel %vm300_vm0, %v487_v0, 0.0  ;;  %3639 = vmatprep.subr.bf16.mxu1 %v7000_v40  ;;  %v7006_v55 = vld [vmem:[#allocation8 + $0x5ac] ss:$48 sps:$4 sm:$0xff]   ;;  %v7012_v54 = vld [vmem:[#allocation8 + $0x604] ss:$48 sps:$4 sm:$0xff]  }
 0x140   :  { %9960 = vst [vmem:[#allocation67_spill] sm:$0xff] %v8646_v38  ;;  %v490_v22 = vmul.f32 %v8646_v38, %v8646_v38  ;;  %v582_v29 = vadd.f32 %v581_v20, %v485_v9  ;;  %v587_v17 = vsel %vm300_vm0, %v488_v51, 0.0  ;;  %579 = vadd.xlane.f32.xlu1 %v578_v61  ;;  %3374 = vmatpush1.bf16.msra.mxu0 %v7002_v46  ;;  %v7008_v9 = vld [vmem:[#allocation8 + $0x5a0] ss:$48 sps:$4 sm:$0xff]   ;;  %v7015_v0 = vld [vmem:[#allocation8 + $0x60c] ss:$48 sps:$4 sm:$0xff]   ;;  %v736_v51 = vlaneseq }
 0x141   :  { %v589_v56 = vsel %vm300_vm0, %v489_v43, 0.0  ;;  %v588_v58 = vadd.f32 %v587_v17, %v586_v60  ;;  %3640 = vmatpush1.bf16.msra.mxu1 %v7003_v21  ;;  %3375 = vmatprep.subr.bf16.mxu0 %v7004_v19 }
 0x142   :  { %v583_v12 = vadd.f32 %v582_v29, %v486_v28  ;;  %v591_v57 = vsel %vm300_vm0, %v490_v22, 0.0  ;;  %3641 = vmatprep.subr.bf16.mxu1 %v7006_v55  ;;  %v8660_v29 = vshrl.u32 %v736_v51, 7  ;;  %v203_v55 = vld [vmem:[#allocation5] sm:$0xf] }
 0x143   :  { %v590_v13 = vadd.f32 %v589_v56, %v588_v58 }
 0x144   :  { %584 = vadd.xlane.f32.xlu0 %v583_v12  ;;  %3376 = vmatpush1.bf16.msra.mxu0 %v7008_v9  ;;  %9961 = vst [vmem:[#allocation68_spill] sm:$0xff] %v8660_v29  ;;  %v8663_v21 = vsub.s32 1, %v8660_v29  ;;  %v8669_v19 = vsub.s32 3, %v8660_v29 }
 0x145   :  { %v592_v20 = vadd.f32 %v591_v57, %v590_v13  ;;  %3642 = vmatpush1.bf16.msra.mxu1 %v7009_v23  ;;  %3478 = vmatprep.subr.bf16.mxu0 %v7012_v54  ;;  %v8666_v57 = vsub.s32 0, %v8660_v29  ;;  %v8672_v13 = vsub.s32 2, %v8660_v29  ;;  %v204_v23 = vld [vmem:[#allocation7] sm:$0xf] }
 0x146   :  { %3744 = vmatprep.subr.bf16.mxu1 %v7015_v0  ;;  %9962 = vst [vmem:[#allocation69_spill] sm:$0xff] %v8663_v21  ;;  %9964 = vst [vmem:[#allocation71_spill] sm:$0xff] %v8669_v19  ;;  %v8675_v0 = vrot.slane %v203_v55, %v8663_v21 }
 0x147   :  { %593 = vadd.xlane.f32.xlu1 %v592_v20  ;;  %9963 = vst [vmem:[#allocation70_spill] sm:$0xff] %v8666_v57  ;;  %9965 = vst [vmem:[#allocation72_spill] sm:$0xff] %v8672_v13 }
 0x18d   :  { %v495_v28 = vpop.xlane.xlu0 %494 }
 0x18e   :  { %v595_v40 = vmul.f32 0.001953125, %v495_v28  ;;  %v8678_v28 = vrot.slane %v203_v55, %v8666_v57 }
 0x190   :  { %v615_v43 = vadd.f32 1e-05, %v595_v40  ;;  %v8681_v40 = vrot.slane %v203_v55, %v8669_v19 }
 0x191   :  { %v505_v61 = vpop.xlane.xlu0 %504 }
 0x192   :  { %7490 = vrsqrt.f32 %v615_v43  ;;  %v597_v60 = vmul.f32 0.001953125, %v505_v61 }
 0x194   :  { %v500_v22 = vpop.xlane.xlu1 %499  ;;  %v617_v56 = vadd.f32 1e-05, %v597_v60  ;;  %v8687_v60 = vrot.slane %v204_v23, %v8666_v57 }
 0x195   :  { %v596_v17 = vmul.f32 0.001953125, %v500_v22  ;;  %v8684_v22 = vrot.slane %v204_v23, %v8663_v21 }
 0x196   :  { %7492 = vrsqrt.f32 %v617_v56 }
 0x197   :  { %v616_v58 = vadd.f32 1e-05, %v596_v17  ;;  %v8690_v17 = vrot.slane %v203_v55, %v8672_v13 }
 0x198   :  { %v510_v46 = vpop.xlane.xlu1 %509 }
 0x199   :  { %7494 = vrsqrt.f32 %v616_v58  ;;  %v598_v12 = vmul.f32 0.001953125, %v510_v46 }
 0x19b   :  { %v618_v20 = vadd.f32 1e-05, %v598_v12  ;;  %v9966_v12 = vld [vmem:[#allocation21_spill] sm:$0xff] }
 0x19c   :  { %v7491_v51 = vpop.eup %7490 }
 0x19d   :  { %v515_v9 = vpop.xlane.xlu0 %514  ;;  %7496 = vrsqrt.f32 %v618_v20  ;;  %v656_v58 = vmul.f32 %v7491_v51, %v8126_v3  ;;  %v655_v46 = vmul.f32 %v7491_v51, %v8122_v59  ;;  %v658_v20 = vmul.f32 %v7491_v51, %v9966_v12 }
 0x19e   :  { %v599_v54 = vmul.f32 0.001953125, %v515_v9  ;;  %v8696_v9 = vrot.slane %v204_v23, %v8669_v19  ;;  %v8706_v12 = vrot.slane %v204_v23, %v8672_v13 }
 0x19f   :  { %v757_v57 = vmul.f32 %v8675_v0, %v656_v58  ;;  %v756_v62 = vmul.f32 %v8678_v28, %v655_v46  ;;  %v759_v55 = vmul.f32 %v8681_v40, %v658_v20  ;;  %v9968_v46 = vld [vmem:[#allocation23_spill] sm:$0xff]  ;;  %v9969_v20 = vld [vmem:[#allocation17_spill] sm:$0xff] }
 0x1a0   :  { %v619_v43 = vadd.f32 1e-05, %v599_v54  ;;  %v9967_v54 = vld [vmem:[#allocation20_spill] sm:$0xff] }
 0x1a1   :  { %v520_v61 = vpop.xlane.xlu1 %519  ;;  %v657_v29 = vmul.f32 %v7491_v51, %v9967_v54  ;;  %v858_v51 = vadd.f32 %v8684_v22, %v757_v57 }
 0x1a2   :  { %v600_v56 = vmul.f32 0.001953125, %v520_v61  ;;  %7498 = vrsqrt.f32 %v619_v43  ;;  %v8702_v61 = vpop.eup %7492 }
 0x1a3   :  { %v758_v59 = vmul.f32 %v8690_v17, %v657_v29  ;;  %v7495_v43 = vpop.eup %7494  ;;  %v664_v38 = vmul.f32 %v8702_v61, %v9969_v20  ;;  %v663_v29 = vmul.f32 %v8702_v61, %v9970_v32 }
 0x1a4   :  { %v620_v21 = vadd.f32 1e-05, %v600_v56  ;;  %v857_v56 = vadd.f32 %v8687_v60, %v756_v62  ;;  %v660_v58 = vmul.f32 %v7495_v43, %v8166_v37  ;;  %v659_v54 = vmul.f32 %v7495_v43, %v9968_v46 }
 0x1a5   :  { %v662_v23 = vmul.f32 %v7495_v43, %v8174_v11  ;;  %v765_v46 = vmul.f32 %v8675_v0, %v664_v38  ;;  %v764_v41 = vmul.f32 %v8678_v28, %v663_v29  ;;  %v9972_v29 = vld [vmem:[#allocation22_spill] sm:$0xff] }
 0x1a6   :  { %v525_v3 = vpop.xlane.xlu0 %524  ;;  %7500 = vrsqrt.f32 %v620_v21  ;;  %v860_v21 = vadd.f32 %v8696_v9, %v759_v55  ;;  %v761_v62 = vmul.f32 %v8675_v0, %v660_v58  ;;  %v760_v37 = vmul.f32 %v8678_v28, %v659_v54 }
 0x1a7   :  { %v601_v19 = vmul.f32 0.001953125, %v525_v3  ;;  %v9971_v3 = vld [vmem:[#allocation24_spill] sm:$0xff]  ;;  %v8723_v20 = vpop.eup %7496  ;;  %v866_v54 = vadd.f32 %v8684_v22, %v765_v46  ;;  %v7018_v46 = vld [vmem:[#allocation8 + $0x664] ss:$48 sps:$4 sm:$0xff]  }
 0x1a8   :  { %v661_v13 = vmul.f32 %v7495_v43, %v9971_v3  ;;  %v862_v55 = vadd.f32 %v8684_v22, %v761_v62  ;;  %v861_v43 = vadd.f32 %v8687_v60, %v760_v37  ;;  %v668_v58 = vmul.f32 %v8723_v20, %v8154_v18  ;;  %v7010_v62 = vld [vmem:[#allocation8 + $0x600] ss:$48 sps:$4 sm:$0xff]  }
 0x1a9   :  { %v621_v44 = vadd.f32 1e-05, %v601_v19  ;;  %v763_v19 = vmul.f32 %v8681_v40, %v662_v23  ;;  %v667_v39 = vmul.f32 %v8723_v20, %v9972_v29 }
 0x1aa   :  { %v762_v11 = vmul.f32 %v8690_v17, %v661_v13  ;;  %v8738_v37 = vpack.c.bf16 %v862_v55, %v858_v51  ;;  %v8740_v24 = vpack.c.bf16 %v861_v43, %v857_v56  ;;  %v769_v18 = vmul.f32 %v8675_v0, %v668_v58 }
 0x1ab   :  { %7502 = vrsqrt.f32 %v621_v44  ;;  %v865_v44 = vadd.f32 %v8687_v60, %v764_v41  ;;  %v864_v23 = vadd.f32 %v8696_v9, %v763_v19  ;;  %v768_v29 = vmul.f32 %v8678_v28, %v667_v39  ;;  %v9976_v19 = vld [vmem:[#allocation27_spill] sm:$0xff] }
 0x1ac   :  { %v530_v57 = vpop.xlane.xlu1 %529  ;;  %9973 = vst [vmem:[#allocation21_spill] sm:$0xff] %v8738_v37  ;;  %9974 = vst [vmem:[#allocation20_spill] sm:$0xff] %v8740_v24  ;;  %3377 = vmatprep.mubr.bf16.mxu0 %v8738_v37  ;;  %3643 = vmatprep.mubr.bf16.mxu1 %v8738_v37  ;;  %v870_v51 = vadd.f32 %v8684_v22, %v769_v18  ;;  %v859_v55 = vadd.f32 %v8706_v12, %v758_v59  ;;  %v7016_v59 = vld [vmem:[#allocation8 + $0x660] ss:$48 sps:$4 sm:$0xff]  }
 0x1ad   :  { %v602_v32 = vmul.f32 0.001953125, %v530_v57  ;;  %v8736_v57 = vpop.eup %7498  ;;  %v8751_v56 = vpack.c.bf16 %v864_v23, %v860_v21  ;;  %3378 = vmatmul.mubr.bf16.vlgmr.msra.gmra.mrb[0].mxu0 %v8740_v24  ;;  %3644 = vmatmul.mubr.bf16.vlgmr.msra.gmra.mrb[0].mxu1 %v8740_v24  ;;  %v7019_v23 = vld [vmem:[#allocation8 + $0x668] ss:$48 sps:$4 sm:$0xff]  }
 0x1ae   :  { %v672_v41 = vmul.f32 %v8736_v57, %v9975_v26  ;;  %v671_v49 = vmul.f32 %v8736_v57, %v9976_v19  ;;  %v869_v26 = vadd.f32 %v8687_v60, %v768_v29  ;;  %3479 = vmatpush1.bf16.msra.mxu0 %v7010_v62  ;;  %3745 = vmatpush1.bf16.msra.mxu1 %v7013_v10 }
 0x1af   :  { %v622_v38 = vadd.f32 1e-05, %v602_v32  ;;  %v7021_v32 = vld [vmem:[#allocation8 + $0x66c] ss:$48 sps:$4 sm:$0xff]   ;;  %9977 = vst [vmem:[#allocation23_spill] sm:$0xff] %v8751_v56  ;;  %v8761_v21 = vpack.c.bf16 %v870_v51, %v866_v54  ;;  %3480 = vmatprep.subr.bf16.mxu0 %v7018_v46  ;;  %v863_v51 = vadd.f32 %v8706_v12, %v762_v11 }
 0x1b0   :  { %v535_v3 = vpop.xlane.xlu0 %534  ;;  %v8754_v43 = vpop.eup %7500  ;;  %v773_v58 = vmul.f32 %v8675_v0, %v672_v41  ;;  %3746 = vmatprep.subr.bf16.mxu1 %v7021_v32  ;;  %v8765_v24 = vpack.c.bf16 %v869_v26, %v865_v44  ;;  %v7024_v41 = vld [vmem:[#allocation8 + $0x6c4] ss:$48 sps:$4 sm:$0xff]   ;;  %v7025_v11 = vld [vmem:[#allocation8 + $0x6c8] ss:$48 sps:$4 sm:$0xff]   ;;  %v9984_v56 = vld [vmem:[#allocation32_spill] sm:$0xff] }
 0x1b1   :  { %v603_v13 = vmul.f32 0.001953125, %v535_v3  ;;  %7504 = vrsqrt.f32 %v622_v38  ;;  %v772_v38 = vmul.f32 %v8678_v28, %v671_v49  ;;  %9978 = vst [vmem:[#allocation17_spill] sm:$0xff] %v8761_v21  ;;  %v676_v18 = vmul.f32 %v8754_v43, %v8188_v7  ;;  %v7027_v49 = vld [vmem:[#allocation8 + $0x6cc] ss:$48 sps:$4 sm:$0xff]   ;;  %3387 = vmatprep.mubr.bf16.mxu0 %v8761_v21  ;;  %3653 = vmatprep.mubr.bf16.mxu1 %v8761_v21 }
 0x1b2   :  { %9979 = vst [vmem:[#allocation16_spill] sm:$0xff] %v8765_v24  ;;  %v874_v29 = vadd.f32 %v8684_v22, %v773_v58  ;;  %v9982_v58 = vld [vmem:[#allocation29_spill] sm:$0xff]  ;;  %3481 = vmatpush1.bf16.msra.mxu0 %v7016_v59  ;;  %3747 = vmatpush1.bf16.msra.mxu1 %v7019_v23 }
 0x1b3   :  { %v623_v3 = vadd.f32 1e-05, %v603_v13  ;;  %v777_v7 = vmul.f32 %v8675_v0, %v676_v18  ;;  %v873_v46 = vadd.f32 %v8687_v60, %v772_v38  ;;  %v9983_v38 = vld [vmem:[#allocation33_spill] sm:$0xff]  ;;  %3482 = vmatprep.subr.bf16.mxu0 %v7024_v41  ;;  %3748 = vmatprep.subr.bf16.mxu1 %v7027_v49 }
 0x1b5   :  { %v540_v39 = vpop.xlane.xlu1 %539  ;;  %7506 = vrsqrt.f32 %v623_v3  ;;  %v9980_v3 = vld [vmem:[#allocation26_spill] sm:$0xff]  ;;  %v8774_v32 = vpop.eup %7502  ;;  %v878_v18 = vadd.f32 %v8684_v22, %v777_v7  ;;  %3388 = vmatmul.mubr.bf16.gmra.mrb[4].mxu0 %v8765_v24  ;;  %3654 = vmatmul.mubr.bf16.gmra.mrb[4].mxu1 %v8765_v24 }
 0x1b6   :  { %v604_v13 = vmul.f32 0.001953125, %v540_v39  ;;  %v675_v62 = vmul.f32 %v8754_v43, %v9980_v3  ;;  %v9981_v39 = vld [vmem:[#allocation19_spill] sm:$0xff]  ;;  %v680_v21 = vmul.f32 %v8774_v32, %v9983_v38  ;;  %v7033_v7 = vld [vmem:[#allocation8 + $0x72c] ss:$48 sps:$4 sm:$0xff]   ;;  %3749 = vmatpush1.bf16.msra.mxu1 %v7025_v11 }
 0x1b7   :  { %v666_v26 = vmul.f32 %v8702_v61, %v9981_v39  ;;  %v8790_v23 = vpack.c.bf16 %v878_v18, %v874_v29  ;;  %v9987_v29 = vld [vmem:[#allocation31_spill] sm:$0xff]  ;;  %3750 = vmatprep.subr.bf16.mxu1 %v7033_v7  ;;  %v9989_v11 = vld [vmem:[#allocation38_spill] sm:$0xff] }
 0x1b8   :  { %v545_v19 = vpop.xlane.xlu0 %544  ;;  %v624_v10 = vadd.f32 1e-05, %v604_v13  ;;  %v776_v44 = vmul.f32 %v8678_v28, %v675_v62  ;;  %v670_v13 = vmul.f32 %v8723_v20, %v9982_v58  ;;  %v7022_v62 = vld [vmem:[#allocation8 + $0x6c0] ss:$48 sps:$4 sm:$0xff]   ;;  %v679_v58 = vmul.f32 %v8774_v32, %v9984_v56  ;;  %v7031_v18 = vld [vmem:[#allocation8 + $0x728] ss:$48 sps:$4 sm:$0xff]  }
 0x1b9   :  { %v605_v54 = vmul.f32 0.001953125, %v545_v19  ;;  %9986 = vst [vmem:[#allocation22_spill] sm:$0xff] %v8790_v23  ;;  %v781_v38 = vmul.f32 %v8675_v0, %v680_v21  ;;  %3397 = vmatprep.mubr.bf16.mxu0 %v8790_v23  ;;  %3663 = vmatprep.mubr.bf16.mxu1 %v8790_v23 }
 0x1ba   :  { %7508 = vrsqrt.f32 %v624_v10  ;;  %v877_v39 = vadd.f32 %v8687_v60, %v776_v44  ;;  %v8788_v10 = vpack.c.bf16 %v863_v51, %v859_v55  ;;  %v780_v55 = vmul.f32 %v8678_v28, %v679_v58  ;;  %v9988_v51 = vld [vmem:[#allocation30_spill] sm:$0xff]  ;;  %3483 = vmatpush1.bf16.msra.mxu0 %v7022_v62  ;;  %3751 = vmatpush1.bf16.msra.mxu1 %v7031_v18  ;;  %v9992_v18 = vld [vmem:[#allocation25_spill] sm:$0xff] }
 0x1bb   :  { %v625_v19 = vadd.f32 1e-05, %v605_v54  ;;  %v7030_v54 = vld [vmem:[#allocation8 + $0x724] ss:$48 sps:$4 sm:$0xff]   ;;  %v8794_v41 = vpop.eup %7504  ;;  %v882_v44 = vadd.f32 %v8684_v22, %v781_v38  ;;  %v771_v58 = vmul.f32 %v8681_v40, %v670_v13 }
 0x1bc   :  { %v550_v3 = vpop.xlane.xlu1 %549  ;;  %9985 = vst [vmem:[#allocation24_spill] sm:$0xff] %v8788_v10  ;;  %v8798_v56 = vpack.c.bf16 %v877_v39, %v873_v46  ;;  %v684_v21 = vmul.f32 %v8794_v41, %v9987_v29  ;;  %v7028_v46 = vld [vmem:[#allocation8 + $0x720] ss:$48 sps:$4 sm:$0xff]   ;;  %v881_v39 = vadd.f32 %v8687_v60, %v780_v55  ;;  %3484 = vmatprep.subr.bf16.mxu0 %v7030_v54  ;;  %v7036_v29 = vld [vmem:[#allocation8 + $0x784] ss:$48 sps:$4 sm:$0xff]  }
 0x1bd   :  { %v606_v37 = vmul.f32 0.001953125, %v550_v3  ;;  %7510 = vrsqrt.f32 %v625_v19  ;;  %v767_v3 = vmul.f32 %v8681_v40, %v666_v26  ;;  %v9990_v55 = vld [vmem:[#allocation37_spill] sm:$0xff]  ;;  %v872_v24 = vadd.f32 %v8696_v9, %v771_v58  ;;  %v9991_v10 = vld [vmem:[#allocation18_spill] sm:$0xff] }
 0x1be   :  { %v785_v38 = vmul.f32 %v8675_v0, %v684_v21  ;;  %3485 = vmatpush1.bf16.msra.mxu0 %v7028_v46  ;;  %v7045_v46 = vld [vmem:[#allocation8 + $0x7ec] ss:$48 sps:$4 sm:$0xff]   ;;  %3664 = vmatmul.mubr.bf16.gmra.mrb[8].mxu1 %v8798_v56 }
 0x1bf   :  { %v555_v59 = vpop.xlane.xlu0 %554  ;;  %v626_v49 = vadd.f32 1e-05, %v606_v37  ;;  %v683_v37 = vmul.f32 %v8794_v41, %v9988_v51  ;;  %v7039_v51 = vld [vmem:[#allocation8 + $0x78c] ss:$48 sps:$4 sm:$0xff]   ;;  %v868_v62 = vadd.f32 %v8696_v9, %v767_v3  ;;  %v7034_v3 = vld [vmem:[#allocation8 + $0x780] ss:$48 sps:$4 sm:$0xff]   ;;  %3486 = vmatprep.subr.bf16.mxu0 %v7036_v29  ;;  %3398 = vmatmul.mubr.bf16.gmra.mrb[8].mxu0 %v8798_v56 }
 0x1c0   :  { %v607_v31 = vmul.f32 0.001953125, %v555_v59  ;;  %v8810_v59 = vpop.eup %7506  ;;  %v886_v7 = vadd.f32 %v8684_v22, %v785_v38  ;;  %3752 = vmatprep.subr.bf16.mxu1 %v7039_v51 }
 0x1c1   :  { %7512 = vrsqrt.f32 %v626_v49  ;;  %v688_v49 = vmul.f32 %v8810_v59, %v9989_v11  ;;  %v687_v13 = vmul.f32 %v8810_v59, %v9990_v55  ;;  %v8826_v2 = vpack.c.bf16 %v872_v24, %v868_v62 }
 0x1c2   :  { %v627_v26 = vadd.f32 1e-05, %v607_v31  ;;  %v560_v19 = vpop.xlane.xlu1 %559  ;;  %v784_v31 = vmul.f32 %v8678_v28, %v683_v37  ;;  %v665_v37 = vmul.f32 %v8702_v61, %v9991_v10  ;;  %v8830_v38 = vpack.c.bf16 %v886_v7, %v882_v44  ;;  %v7042_v10 = vld [vmem:[#allocation8 + $0x7e4] ss:$48 sps:$4 sm:$0xff]   ;;  %3487 = vmatpush1.bf16.msra.mxu0 %v7034_v3 }
 0x1c3   :  { %v608_v23 = vmul.f32 0.001953125, %v560_v19  ;;  %v789_v11 = vmul.f32 %v8675_v0, %v688_v49  ;;  %v788_v55 = vmul.f32 %v8678_v28, %v687_v13  ;;  %3488 = vmatprep.subr.bf16.mxu0 %v7042_v10 }
 0x1c4   :  { %7514 = vrsqrt.f32 %v627_v26  ;;  %v885_v21 = vadd.f32 %v8687_v60, %v784_v31  ;;  %v7037_v26 = vld [vmem:[#allocation8 + $0x788] ss:$48 sps:$4 sm:$0xff]   ;;  %v8836_v31 = vmul.f32 %v8723_v20, %v9992_v18  ;;  %3407 = vmatprep.mubr.bf16.mxu0 %v8830_v38  ;;  %3673 = vmatprep.mubr.bf16.mxu1 %v8830_v38  ;;  %v7040_v20 = vld [vmem:[#allocation8 + $0x7e0] ss:$48 sps:$4 sm:$0xff]   ;;  %v8851_v62 = vmul.f32 %v8690_v17, %v665_v37 }
 0x1c5   :  { %v628_v19 = vadd.f32 1e-05, %v608_v23  ;;  %v8828_v23 = vpop.eup %7508  ;;  %v890_v44 = vadd.f32 %v8684_v22, %v789_v11  ;;  %v889_v51 = vadd.f32 %v8687_v60, %v788_v55  ;;  %3753 = vmatpush1.bf16.msra.mxu1 %v7037_v26  ;;  %v7048_v11 = vld [vmem:[#allocation8 + $0x844] ss:$48 sps:$4 sm:$0xff]  }
 0x1c6   :  { %v565_v54 = vpop.xlane.xlu0 %564  ;;  %v8832_v61 = vpack.c.bf16 %v885_v21, %v881_v39  ;;  %v692_v24 = vmul.f32 %v8828_v23, %v8260_v14  ;;  %3754 = vmatprep.subr.bf16.mxu1 %v7045_v46  ;;  %3489 = vmatpush1.bf16.msra.mxu0 %v7040_v20 }
 0x1c7   :  { %v609_v34 = vmul.f32 0.001953125, %v565_v54  ;;  %7516 = vrsqrt.f32 %v628_v19  ;;  %v8843_v29 = vpop.eup %7510  ;;  %v7043_v54 = vld [vmem:[#allocation8 + $0x7e8] ss:$48 sps:$4 sm:$0xff]   ;;  %3490 = vmatprep.subr.bf16.mxu0 %v7048_v11 }
 0x1c8   :  { %v570_v58 = vpop.xlane.xlu1 %569  ;;  %v793_v7 = vmul.f32 %v8675_v0, %v692_v24  ;;  %v696_v55 = vmul.f32 %v8843_v29, %v8314_v15  ;;  %v695_v37 = vmul.f32 %v8843_v29, %v8309_v35  ;;  %3408 = vmatmul.mubr.bf16.gmra.mrb[12].mxu0 %v8832_v61  ;;  %3674 = vmatmul.mubr.bf16.gmra.mrb[12].mxu1 %v8832_v61 }
 0x1c9   :  { %v629_v49 = vadd.f32 1e-05, %v609_v34  ;;  %v610_v13 = vmul.f32 0.001953125, %v570_v58  ;;  %v691_v34 = vmul.f32 %v8828_v23, %v8255_v16  ;;  %v7051_v58 = vld [vmem:[#allocation8 + $0x84c] ss:$48 sps:$4 sm:$0xff]   ;;  %3755 = vmatpush1.bf16.msra.mxu1 %v7043_v54 }
 0x1ca   :  { %3756 = vmatprep.subr.bf16.mxu1 %v7051_v58 }
 0x1cb   :  { %v575_v39 = vpop.xlane.xlu0 %574  ;;  %7518 = vrsqrt.f32 %v629_v49  ;;  %v630_v14 = vadd.f32 1e-05, %v610_v13  ;;  %v792_v16 = vmul.f32 %v8678_v28, %v691_v34  ;;  %v8859_v18 = vpop.eup %7512  ;;  %v894_v49 = vadd.f32 %v8684_v22, %v793_v7 }
 0x1cc   :  { %v611_v19 = vmul.f32 0.001953125, %v575_v39  ;;  %v700_v46 = vmul.f32 %v8859_v18, %v8302_v30  ;;  %v797_v13 = vmul.f32 %v8675_v0, %v696_v55  ;;  %v699_v15 = vmul.f32 %v8859_v18, %v8297_v6  ;;  %v7054_v55 = vld [vmem:[#allocation8 + $0x8a4] ss:$48 sps:$4 sm:$0xff]  }
 0x1cd   :  { %v580_v21 = vpop.xlane.xlu1 %579  ;;  %7520 = vrsqrt.f32 %v630_v14  ;;  %v893_v10 = vadd.f32 %v8687_v60, %v792_v16  ;;  %v8870_v34 = vpack.c.bf16 %v894_v49, %v890_v44  ;;  %v7046_v14 = vld [vmem:[#allocation8 + $0x840] ss:$48 sps:$4 sm:$0xff]   ;;  %v796_v7 = vmul.f32 %v8678_v28, %v695_v37 }
 0x1ce   :  { %v631_v3 = vadd.f32 1e-05, %v611_v19  ;;  %v612_v26 = vmul.f32 0.001953125, %v580_v21  ;;  %v8868_v24 = vpop.eup %7514  ;;  %v7049_v19 = vld [vmem:[#allocation8 + $0x848] ss:$48 sps:$4 sm:$0xff]   ;;  %v801_v6 = vmul.f32 %v8675_v0, %v700_v46  ;;  %v898_v16 = vadd.f32 %v8684_v22, %v797_v13  ;;  %3491 = vmatpush1.bf16.msra.mxu0 %v7046_v14 }
 0x1cf   :  { %v8873_v30 = vpack.c.bf16 %v893_v10, %v889_v51  ;;  %v800_v44 = vmul.f32 %v8678_v28, %v699_v15  ;;  %v897_v20 = vadd.f32 %v8687_v60, %v796_v7  ;;  %v704_v54 = vmul.f32 %v8868_v24, %v8355_v8  ;;  %3417 = vmatprep.mubr.bf16.mxu0 %v8870_v34  ;;  %v7052_v8 = vld [vmem:[#allocation8 + $0x8a0] ss:$48 sps:$4 sm:$0xff]   ;;  %v7055_v46 = vld [vmem:[#allocation8 + $0x8a8] ss:$48 sps:$4 sm:$0xff]   ;;  %v7063_v7 = vld [vmem:[#allocation8 + $0x90c] ss:$48 sps:$4 sm:$0xff]  }
 0x1d0   :  { %7522 = vrsqrt.f32 %v631_v3  ;;  %v632_v35 = vadd.f32 1e-05, %v612_v26  ;;  %v7057_v3 = vld [vmem:[#allocation8 + $0x8ac] ss:$48 sps:$4 sm:$0xff]   ;;  %3683 = vmatprep.mubr.bf16.mxu1 %v8870_v34  ;;  %v902_v37 = vadd.f32 %v8684_v22, %v801_v6  ;;  %v703_v26 = vmul.f32 %v8868_v24, %v8350_v36  ;;  %3757 = vmatpush1.bf16.msra.mxu1 %v7049_v19  ;;  %v7060_v36 = vld [vmem:[#allocation8 + $0x904] ss:$48 sps:$4 sm:$0xff]  }
 0x1d1   :  { %v585_v39 = vpop.xlane.xlu0 %584  ;;  %v8883_v51 = vpop.eup %7516  ;;  %v770_v49 = vmul.f32 %v8690_v17, %v8836_v31  ;;  %v901_v13 = vadd.f32 %v8687_v60, %v800_v44  ;;  %3492 = vmatprep.subr.bf16.mxu0 %v7054_v55  ;;  %3758 = vmatprep.subr.bf16.mxu1 %v7057_v3 }
 0x1d2   :  { %v613_v21 = vmul.f32 0.001953125, %v585_v39  ;;  %7524 = vrsqrt.f32 %v632_v35  ;;  %v708_v15 = vmul.f32 %v8883_v51, %v8345_v42  ;;  %v805_v35 = vmul.f32 %v8675_v0, %v704_v54  ;;  %3493 = vmatpush1.bf16.msra.mxu0 %v7052_v8  ;;  %3684 = vmatmul.mubr.bf16.gmra.mrb[16].mxu1 %v8873_v30 }
 0x1d3   :  { %v8896_v39 = vpack.c.bf16 %v902_v37, %v898_v16  ;;  %v707_v31 = vmul.f32 %v8883_v51, %v8340_v47  ;;  %v804_v14 = vmul.f32 %v8678_v28, %v703_v26  ;;  %v8903_v6 = vpack.c.bf16 %v901_v13, %v897_v20  ;;  %v7058_v20 = vld [vmem:[#allocation8 + $0x900] ss:$48 sps:$4 sm:$0xff]   ;;  %3494 = vmatprep.subr.bf16.mxu0 %v7060_v36 }
 0x1d4   :  { %v633_v11 = vadd.f32 1e-05, %v613_v21  ;;  %v594_v58 = vpop.xlane.xlu1 %593  ;;  %v809_v42 = vmul.f32 %v8675_v0, %v708_v15  ;;  %v906_v44 = vadd.f32 %v8684_v22, %v805_v35  ;;  %3759 = vmatpush1.bf16.msra.mxu1 %v7055_v46  ;;  %v867_v37 = vadd.f32 %v8706_v12, %v8851_v62  ;;  %3418 = vmatmul.mubr.bf16.gmra.mrb[16].mxu0 %v8873_v30 }
 0x1d5   :  { %v614_v10 = vmul.f32 0.001953125, %v594_v58  ;;  %v8901_v19 = vpop.eup %7518  ;;  %v808_v16 = vmul.f32 %v8678_v28, %v707_v31  ;;  %v905_v55 = vadd.f32 %v8687_v60, %v804_v14  ;;  %v871_v26 = vadd.f32 %v8706_v12, %v770_v49  ;;  %3760 = vmatprep.subr.bf16.mxu1 %v7063_v7  ;;  %3427 = vmatprep.mubr.bf16.mxu0 %v8896_v39  ;;  %v7064_v31 = vld [vmem:[#allocation8 + $0x960] ss:$48 sps:$4 sm:$0xff]   ;;  %v7067_v14 = vld [vmem:[#allocation8 + $0x968] ss:$48 sps:$4 sm:$0xff]  }
 0x1d6   :  { %7526 = vrsqrt.f32 %v633_v11  ;;  %v712_v3 = vmul.f32 %v8901_v19, %v8400_v45  ;;  %v711_v47 = vmul.f32 %v8901_v19, %v8395_v63  ;;  %v7061_v11 = vld [vmem:[#allocation8 + $0x908] ss:$48 sps:$4 sm:$0xff]   ;;  %v910_v58 = vadd.f32 %v8684_v22, %v809_v42  ;;  %v7066_v45 = vld [vmem:[#allocation8 + $0x964] ss:$48 sps:$4 sm:$0xff]   ;;  %3693 = vmatprep.mubr.bf16.mxu1 %v8896_v39  ;;  %3495 = vmatpush1.bf16.msra.mxu0 %v7058_v20 }
 0x1d7   :  { %v634_v21 = vadd.f32 1e-05, %v614_v10  ;;  %v8913_v54 = vpop.eup %7520  ;;  %v7069_v10 = vld [vmem:[#allocation8 + $0x96c] ss:$48 sps:$4 sm:$0xff]   ;;  %v909_v63 = vadd.f32 %v8687_v60, %v808_v16  ;;  %3496 = vmatprep.subr.bf16.mxu0 %v7066_v45  ;;  %v7072_v16 = vld [vmem:[#allocation8 + $0x9c4] ss:$48 sps:$4 sm:$0xff]  }
 0x1d8   :  { %v716_v13 = vmul.f32 %v8913_v54, %v8390_v5  ;;  %v813_v8 = vmul.f32 %v8675_v0, %v712_v3  ;;  %v8927_v62 = vpack.c.bf16 %v910_v58, %v906_v44  ;;  %v715_v49 = vmul.f32 %v8913_v54, %v8385_v48  ;;  %3761 = vmatpush1.bf16.msra.mxu1 %v7061_v11 }
 0x1d9   :  { %7528 = vrsqrt.f32 %v634_v21  ;;  %v812_v15 = vmul.f32 %v8678_v28, %v711_v47  ;;  %v8934_v5 = vpack.c.bf16 %v909_v63, %v905_v55  ;;  %3762 = vmatprep.subr.bf16.mxu1 %v7069_v10  ;;  %v7075_v55 = vld [vmem:[#allocation8 + $0x9cc] ss:$48 sps:$4 sm:$0xff]  }
 0x1da   :  { %v8923_v46 = vpop.eup %7522  ;;  %v817_v35 = vmul.f32 %v8675_v0, %v716_v13  ;;  %v914_v36 = vadd.f32 %v8684_v22, %v813_v8  ;;  %v816_v48 = vmul.f32 %v8678_v28, %v715_v49  ;;  %v9993_v13 = vld [vmem:[#allocation35_spill] sm:$0xff]  ;;  %3497 = vmatpush1.bf16.msra.mxu0 %v7064_v31  ;;  %v7070_v8 = vld [vmem:[#allocation8 + $0x9c0] ss:$48 sps:$4 sm:$0xff]   ;;  %3694 = vmatmul.mubr.bf16.gmra.mrb[20].mxu1 %v8903_v6 }
 0x1db   :  { %v913_v21 = vadd.f32 %v8687_v60, %v812_v15  ;;  %v720_v42 = vmul.f32 %v8923_v46, %v8444_v25  ;;  %v719_v47 = vmul.f32 %v8923_v46, %v8439_v53  ;;  %v8953_v25 = vpack.c.bf16 %v871_v26, %v867_v37  ;;  %v7073_v49 = vld [vmem:[#allocation8 + $0x9c8] ss:$48 sps:$4 sm:$0xff]   ;;  %3498 = vmatprep.subr.bf16.mxu0 %v7072_v16  ;;  %v7078_v26 = vld [vmem:[#allocation8 + $0xa24] ss:$48 sps:$4 sm:$0xff]  }
 0x1dc   :  { %v8938_v7 = vpop.eup %7524  ;;  %v918_v44 = vadd.f32 %v8684_v22, %v817_v35  ;;  %v917_v20 = vadd.f32 %v8687_v60, %v816_v48  ;;  %v674_v53 = vmul.f32 %v8736_v57, %v9993_v13  ;;  %3763 = vmatpush1.bf16.msra.mxu1 %v7067_v14  ;;  %v7081_v35 = vld [vmem:[#allocation8 + $0xa2c] ss:$48 sps:$4 sm:$0xff]   ;;  %3428 = vmatmul.mubr.bf16.gmra.mrb[20].mxu0 %v8903_v6 }
 0x1dd   :  { %v724_v3 = vmul.f32 %v8938_v7, %v8432_v4  ;;  %v821_v11 = vmul.f32 %v8675_v0, %v720_v42  ;;  %v723_v58 = vmul.f32 %v8938_v7, %v8427_v27  ;;  %v820_v4 = vmul.f32 %v8678_v28, %v719_v47  ;;  %3764 = vmatprep.subr.bf16.mxu1 %v7075_v55  ;;  %v7076_v47 = vld [vmem:[#allocation8 + $0xa20] ss:$48 sps:$4 sm:$0xff]  }
 0x1de   :  { %v8957_v10 = vpack.c.bf16 %v918_v44, %v914_v36  ;;  %v8963_v15 = vpack.c.bf16 %v917_v20, %v913_v21  ;;  %v9994_v44 = vld [vmem:[#allocation39_spill] sm:$0xff]  ;;  %3437 = vmatprep.mubr.bf16.mxu0 %v8927_v62  ;;  %3703 = vmatprep.mubr.bf16.mxu1 %v8927_v62 }
 0x1df   :  { %v825_v63 = vmul.f32 %v8675_v0, %v724_v3  ;;  %v922_v27 = vadd.f32 %v8684_v22, %v821_v11  ;;  %v824_v37 = vmul.f32 %v8678_v28, %v723_v58  ;;  %v921_v48 = vadd.f32 %v8687_v60, %v820_v4  ;;  %3499 = vmatpush1.bf16.msra.mxu0 %v7070_v8  ;;  %v7079_v20 = vld [vmem:[#allocation8 + $0xa28] ss:$48 sps:$4 sm:$0xff]   ;;  %v7087_v4 = vld [vmem:[#allocation8 + $0xa8c] ss:$48 sps:$4 sm:$0xff]  }
 0x1e0   :  { %v8955_v45 = vpop.eup %7526  ;;  %v678_v16 = vmul.f32 %v8754_v43, %v9994_v44  ;;  %3765 = vmatpush1.bf16.msra.mxu1 %v7073_v49  ;;  %3500 = vmatprep.subr.bf16.mxu0 %v7078_v26  ;;  %v775_v8 = vmul.f32 %v8681_v40, %v674_v53  ;;  %v7085_v53 = vld [vmem:[#allocation8 + $0xa88] ss:$48 sps:$4 sm:$0xff]  }
 0x1e1   :  { %v926_v36 = vadd.f32 %v8684_v22, %v825_v63  ;;  %v728_v31 = vmul.f32 %v8955_v45, %v8492_v50  ;;  %v925_v21 = vadd.f32 %v8687_v60, %v824_v37  ;;  %v727_v42 = vmul.f32 %v8955_v45, %v8487_v1  ;;  %3766 = vmatprep.subr.bf16.mxu1 %v7081_v35  ;;  %v7084_v63 = vld [vmem:[#allocation8 + $0xa84] ss:$48 sps:$4 sm:$0xff]  }
 0x1e2   :  { %v779_v37 = vmul.f32 %v8681_v40, %v678_v16  ;;  %v876_v35 = vadd.f32 %v8696_v9, %v775_v8  ;;  %v7093_v16 = vld [vmem:[#allocation8 + $0xaec] ss:$48 sps:$4 sm:$0xff]   ;;  %3704 = vmatmul.mubr.bf16.gmra.mrb[24].mxu1 %v8934_v5 }
 0x1e3   :  { %v8971_v14 = vpop.eup %7528  ;;  %v8982_v55 = vpack.c.bf16 %v926_v36, %v922_v27  ;;  %v829_v3 = vmul.f32 %v8675_v0, %v728_v31  ;;  %v8987_v11 = vpack.c.bf16 %v925_v21, %v921_v48  ;;  %v828_v58 = vmul.f32 %v8678_v28, %v727_v42  ;;  %v9995_v36 = vld [vmem:[#allocation34_spill] sm:$0xff]  ;;  %v9996_v48 = vld [vmem:[#allocation36_spill] sm:$0xff]  ;;  %v9997_v31 = vld [vmem:[#allocation41_spill] sm:$0xff]  ;;  %3501 = vmatpush1.bf16.msra.mxu0 %v7076_v47 }
 0x1e4   :  { %v732_v50 = vmul.f32 %v8971_v14, %v8538_v52  ;;  %v731_v1 = vmul.f32 %v8971_v14, %v8533_v33  ;;  %v673_v33 = vmul.f32 %v8736_v57, %v9995_v36  ;;  %v682_v21 = vmul.f32 %v8774_v32, %v9997_v31  ;;  %3767 = vmatpush1.bf16.msra.mxu1 %v7079_v20  ;;  %v9999_v8 = vld [vmem:[#allocation40_spill] sm:$0xff]  ;;  %v10001_v36 = vld [vmem:[#allocation45_spill] sm:$0xff] }
 0x1e5   :  { %v930_v52 = vadd.f32 %v8684_v22, %v829_v3  ;;  %v929_v27 = vadd.f32 %v8687_v60, %v828_v58  ;;  %v880_v44 = vadd.f32 %v8696_v9, %v779_v37  ;;  %3502 = vmatprep.subr.bf16.mxu0 %v7084_v63  ;;  %3768 = vmatprep.subr.bf16.mxu1 %v7087_v4  ;;  %v9998_v3 = vld [vmem:[#allocation43_spill] sm:$0xff] }
 0x1e6   :  { %v833_v13 = vmul.f32 %v8675_v0, %v732_v50  ;;  %v832_v49 = vmul.f32 %v8678_v28, %v731_v1  ;;  %v677_v0 = vmul.f32 %v8754_v43, %v9996_v48  ;;  %v7082_v28 = vld [vmem:[#allocation8 + $0xa80] ss:$48 sps:$4 sm:$0xff]   ;;  %v774_v57 = vmul.f32 %v8690_v17, %v673_v33  ;;  %3438 = vmatmul.mubr.bf16.gmra.mrb[24].mxu0 %v8934_v5 }
 0x1e7   :  { %v686_v47 = vmul.f32 %v8794_v41, %v9998_v3  ;;  %v9018_v20 = vpack.c.bf16 %v880_v44, %v876_v35  ;;  %3447 = vmatprep.mubr.bf16.mxu0 %v8957_v10  ;;  %3713 = vmatprep.mubr.bf16.mxu1 %v8957_v10  ;;  %v783_v63 = vmul.f32 %v8681_v40, %v682_v21  ;;  %v7099_v35 = vld [vmem:[#allocation8 + $0xb4c] ss:$48 sps:$4 sm:$0xff]  }
 0x1e8   :  { %v934_v26 = vadd.f32 %v8684_v22, %v833_v13  ;;  %v933_v42 = vadd.f32 %v8687_v60, %v832_v49  ;;  %v7090_v22 = vld [vmem:[#allocation8 + $0xae4] ss:$48 sps:$4 sm:$0xff]   ;;  %v778_v43 = vmul.f32 %v8690_v17, %v677_v0  ;;  %v875_v1 = vadd.f32 %v8706_v12, %v774_v57  ;;  %3503 = vmatpush1.bf16.msra.mxu0 %v7082_v28  ;;  %v7088_v13 = vld [vmem:[#allocation8 + $0xae0] ss:$48 sps:$4 sm:$0xff]  }
 0x1e9   :  { %v787_v4 = vmul.f32 %v8681_v40, %v686_v47  ;;  %3769 = vmatpush1.bf16.msra.mxu1 %v7085_v53  ;;  %v681_v49 = vmul.f32 %v8774_v32, %v9999_v8  ;;  %v690_v33 = vmul.f32 %v8810_v59, %v10001_v36  ;;  %3504 = vmatprep.subr.bf16.mxu0 %v7090_v22  ;;  %v10002_v28 = vld [vmem:[#allocation47_spill] sm:$0xff]  ;;  %v10003_v44 = vld [vmem:[#allocation44_spill] sm:$0xff]  ;;  %v10004_v22 = vld [vmem:[#allocation46_spill] sm:$0xff] }
 0x1ea   :  { %v9009_v50 = vpack.c.bf16 %v934_v26, %v930_v52  ;;  %v9016_v60 = vpack.c.bf16 %v933_v42, %v929_v27  ;;  %v879_v58 = vadd.f32 %v8706_v12, %v778_v43  ;;  %v7091_v52 = vld [vmem:[#allocation8 + $0xae8] ss:$48 sps:$4 sm:$0xff]   ;;  %v10000_v27 = vld [vmem:[#allocation42_spill] sm:$0xff]  ;;  %3770 = vmatprep.subr.bf16.mxu1 %v7093_v16  ;;  %v7096_v26 = vld [vmem:[#allocation8 + $0xb44] ss:$48 sps:$4 sm:$0xff]   ;;  %v884_v0 = vadd.f32 %v8696_v9, %v783_v63 }
 0x1eb   :  { %v685_v37 = vmul.f32 %v8794_v41, %v10000_v27  ;;  %v888_v31 = vadd.f32 %v8696_v9, %v787_v4  ;;  %v782_v21 = vmul.f32 %v8690_v17, %v681_v49  ;;  %v694_v41 = vmul.f32 %v8828_v23, %v10002_v28  ;;  %v10005_v43 = vld [vmem:[#allocation49_spill] sm:$0xff]  ;;  %v7094_v47 = vld [vmem:[#allocation8 + $0xb40] ss:$48 sps:$4 sm:$0xff]   ;;  %3714 = vmatmul.mubr.bf16.gmra.mrb[28].mxu1 %v8963_v15 }
 0x1ec   :  { %v9032_v48 = vpack.c.bf16 %v879_v58, %v875_v1  ;;  %v791_v53 = vmul.f32 %v8681_v40, %v690_v33  ;;  %v689_v57 = vmul.f32 %v8810_v59, %v10003_v44  ;;  %v693_v16 = vmul.f32 %v8828_v23, %v10004_v22  ;;  %3505 = vmatpush1.bf16.msra.mxu0 %v7088_v13  ;;  %v7097_v1 = vld [vmem:[#allocation8 + $0xb48] ss:$48 sps:$4 sm:$0xff]   ;;  %v7102_v8 = vld [vmem:[#allocation8 + $0xba4] ss:$48 sps:$4 sm:$0xff]   ;;  %v7105_v59 = vld [vmem:[#allocation8 + $0xbac] ss:$48 sps:$4 sm:$0xff]  }
 0x1ed   :  { %v786_v32 = vmul.f32 %v8690_v17, %v685_v37  ;;  %v9041_v42 = vpack.c.bf16 %v888_v31, %v884_v0  ;;  %v698_v3 = vmul.f32 %v8843_v29, %v10005_v43  ;;  %3771 = vmatpush1.bf16.msra.mxu1 %v7091_v52  ;;  %v883_v58 = vadd.f32 %v8706_v12, %v782_v21  ;;  %v10006_v37 = vld [vmem:[#allocation51_spill] sm:$0xff]  ;;  %v7100_v0 = vld [vmem:[#allocation8 + $0xba0] ss:$48 sps:$4 sm:$0xff]   ;;  %v7111_v44 = vld [vmem:[#allocation8 + $0x1c] ss:$48 sps:$4 sm:$0xff]  }
 0x1ee   :  { %v795_v4 = vmul.f32 %v8681_v40, %v694_v41  ;;  %3506 = vmatprep.subr.bf16.mxu0 %v7096_v26  ;;  %3772 = vmatprep.subr.bf16.mxu1 %v7099_v35  ;;  %v892_v49 = vadd.f32 %v8696_v9, %v791_v53  ;;  %v790_v23 = vmul.f32 %v8690_v17, %v689_v57  ;;  %v7103_v31 = vld [vmem:[#allocation8 + $0xba8] ss:$48 sps:$4 sm:$0xff]   ;;  %v10007_v28 = vld [vmem:[#allocation48_spill] sm:$0xff]  ;;  %v7108_v53 = vld [vmem:[#allocation8 + $0x14] ss:$48 sps:$4 sm:$0xff]  }
 0x1ef   :  { %v887_v63 = vadd.f32 %v8706_v12, %v786_v32  ;;  %v794_v27 = vmul.f32 %v8690_v17, %v693_v16  ;;  %3448 = vmatmul.mubr.bf16.gmra.mrb[28].mxu0 %v8963_v15  ;;  %v702_v36 = vmul.f32 %v8859_v18, %v10006_v37  ;;  %3723 = vmatprep.mubr.bf16.mxu1 %v8982_v55  ;;  %v10008_v16 = vld [vmem:[#allocation50_spill] sm:$0xff] }
 0x1f0   :  { %v896_v52 = vadd.f32 %v8696_v9, %v795_v4  ;;  %3457 = vmatprep.mubr.bf16.mxu0 %v8982_v55  ;;  %v891_v33 = vadd.f32 %v8706_v12, %v790_v23  ;;  %v799_v35 = vmul.f32 %v8681_v40, %v698_v3  ;;  %3507 = vmatpush1.bf16.msra.mxu0 %v7094_v47 }
 0x1f1   :  { %v9057_v13 = vpack.c.bf16 %v887_v63, %v883_v58  ;;  %v895_v26 = vadd.f32 %v8706_v12, %v794_v27  ;;  %3773 = vmatpush1.bf16.msra.mxu1 %v7097_v1  ;;  %v803_v32 = vmul.f32 %v8681_v40, %v702_v36  ;;  %v697_v41 = vmul.f32 %v8843_v29, %v10007_v28  ;;  %v10009_v1 = vld [vmem:[#allocation53_spill] sm:$0xff]  ;;  %v10010_v63 = vld [vmem:[#allocation55_spill] sm:$0xff] }
 0x1f2   :  { %v9067_v21 = vpack.c.bf16 %v896_v52, %v892_v49  ;;  %3508 = vmatprep.subr.bf16.mxu0 %v7102_v8  ;;  %3774 = vmatprep.subr.bf16.mxu1 %v7105_v59  ;;  %v900_v22 = vadd.f32 %v8696_v9, %v799_v35  ;;  %v701_v43 = vmul.f32 %v8859_v18, %v10008_v16  ;;  %v10011_v8 = vld [vmem:[#allocation52_spill] sm:$0xff]  ;;  %v10012_v49 = vld [vmem:[#allocation54_spill] sm:$0xff]  ;;  %v10013_v27 = vld [vmem:[#allocation57_spill] sm:$0xff] }
 0x1f3   :  { %v9072_v57 = vpack.c.bf16 %v895_v26, %v891_v33  ;;  %v904_v3 = vadd.f32 %v8696_v9, %v803_v32  ;;  %v798_v47 = vmul.f32 %v8690_v17, %v697_v41  ;;  %v706_v58 = vmul.f32 %v8868_v24, %v10009_v1  ;;  %3724 = vmatmul.mubr.bf16.gmra.mrb[32].mxu1 %v8987_v11  ;;  %v10015_v16 = vld [vmem:[#allocation56_spill] sm:$0xff] }
 0x1f4   :  { %v710_v29 = vmul.f32 %v8883_v51, %v10010_v63  ;;  %v802_v4 = vmul.f32 %v8690_v17, %v701_v43  ;;  %v705_v59 = vmul.f32 %v8868_v24, %v10011_v8  ;;  %v709_v23 = vmul.f32 %v8883_v51, %v10012_v49  ;;  %3509 = vmatpush1.bf16.msra.mxu0 %v7100_v0  ;;  %v10014_v0 = vld [vmem:[#allocation59_spill] sm:$0xff] }
 0x1f5   :  { %v714_v18 = vmul.f32 %v8901_v19, %v10013_v27  ;;  %3775 = vmatpush1.bf16.msra.mxu1 %v7103_v31  ;;  %v9090_v52 = vpack.c.bf16 %v904_v3, %v900_v22  ;;  %v899_v37 = vadd.f32 %v8706_v12, %v798_v47  ;;  %v807_v36 = vmul.f32 %v8681_v40, %v706_v58  ;;  %v10016_v47 = vld [vmem:[#allocation58_spill] sm:$0xff]  ;;  %v10017_v58 = vld [vmem:[#allocation61_spill] sm:$0xff] }
 0x1f6   :  { %3877 = vmatprep.subr.bf16.mxu0 %v7108_v53  ;;  %4143 = vmatprep.subr.bf16.mxu1 %v7111_v44  ;;  %v903_v33 = vadd.f32 %v8706_v12, %v802_v4  ;;  %v811_v24 = vmul.f32 %v8681_v40, %v710_v29  ;;  %v806_v26 = vmul.f32 %v8690_v17, %v705_v59  ;;  %v10018_v29 = vld [vmem:[#allocation63_spill] sm:$0xff] }
 0x1f7   :  { %3458 = vmatmul.mubr.bf16.gmra.mrb[32].mxu0 %v8987_v11  ;;  %v908_v51 = vadd.f32 %v8696_v9, %v807_v36  ;;  %v810_v35 = vmul.f32 %v8690_v17, %v709_v23  ;;  %v718_v31 = vmul.f32 %v8913_v54, %v10014_v0  ;;  %3733 = vmatprep.mubr.bf16.mxu1 %v9009_v50 }
 0x1f8   :  { %3467 = vmatprep.mubr.bf16.mxu0 %v9009_v50  ;;  %v9105_v32 = vpack.c.bf16 %v903_v33, %v899_v37  ;;  %v912_v28 = vadd.f32 %v8696_v9, %v811_v24  ;;  %v907_v41 = vadd.f32 %v8706_v12, %v806_v26  ;;  %v815_v44 = vmul.f32 %v8681_v40, %v714_v18  ;;  %v10019_v18 = vld [vmem:[#allocation60_spill] sm:$0xff]  ;;  %v10021_v24 = vld [vmem:[#allocation62_spill] sm:$0xff] }
 0x1f9   :  { %v911_v53 = vadd.f32 %v8706_v12, %v810_v35  ;;  %v819_v22 = vmul.f32 %v8681_v40, %v718_v31  ;;  %v713_v43 = vmul.f32 %v8901_v19, %v10015_v16  ;;  %v717_v1 = vmul.f32 %v8913_v54, %v10016_v47 }
 0x1fa   :  { %v9114_v3 = vpack.c.bf16 %v912_v28, %v908_v51  ;;  %v722_v63 = vmul.f32 %v8923_v46, %v10017_v58  ;;  %v726_v4 = vmul.f32 %v8938_v7, %v10018_v29  ;;  %v916_v59 = vadd.f32 %v8696_v9, %v815_v44  ;;  %v10022_v51 = vld [vmem:[#allocation65_spill] sm:$0xff] }
 0x1fb   :  { %v9122_v8 = vpack.c.bf16 %v911_v53, %v907_v41  ;;  %v920_v49 = vadd.f32 %v8696_v9, %v819_v22  ;;  %v814_v23 = vmul.f32 %v8690_v17, %v713_v43  ;;  %v818_v19 = vmul.f32 %v8690_v17, %v717_v1  ;;  %3734 = vmatmul.mubr.bf16.gmra.mrb[36].mxu1 %v9016_v60  ;;  %v10023_v53 = vld [vmem:[#allocation67_spill] sm:$0xff] }
 0x1fc   :  { %v823_v27 = vmul.f32 %v8681_v40, %v722_v63  ;;  %v827_v54 = vmul.f32 %v8681_v40, %v726_v4  ;;  %v721_v37 = vmul.f32 %v8923_v46, %v10019_v18  ;;  %v725_v26 = vmul.f32 %v8938_v7, %v10021_v24  ;;  %v10024_v22 = vld [vmem:[#allocation23_spill] sm:$0xff]  ;;  %v10025_v63 = vld [vmem:[#allocation64_spill] sm:$0xff]  ;;  %v10026_v4 = vld [vmem:[#allocation66_spill] sm:$0xff] }
 0x1fd   :  { %v9132_v36 = vpack.c.bf16 %v920_v49, %v916_v59  ;;  %v915_v33 = vadd.f32 %v8706_v12, %v814_v23  ;;  %v730_v35 = vmul.f32 %v8955_v45, %v10022_v51  ;;  %v919_v0 = vadd.f32 %v8706_v12, %v818_v19  ;;  %3776 = vmatprep.mubr.bf16.mxu1 %v10024_v22  ;;  %v7109_v18 = vld [vmem:[#allocation8 + $0x18] ss:$48 sps:$4 sm:$0xff]   ;;  %v7117_v24 = vld [vmem:[#allocation8 + $0x7c] ss:$48 sps:$4 sm:$0xff]  }
 0x1fe   :  { %v924_v31 = vadd.f32 %v8696_v9, %v823_v27  ;;  %v928_v28 = vadd.f32 %v8696_v9, %v827_v54  ;;  %v822_v41 = vmul.f32 %v8690_v17, %v721_v37  ;;  %v826_v46 = vmul.f32 %v8690_v17, %v725_v26  ;;  %v7106_v54 = vld [vmem:[#allocation8 + $0x10] ss:$48 sps:$4 sm:$0xff]   ;;  %v7115_v51 = vld [vmem:[#allocation8 + $0x78] ss:$48 sps:$4 sm:$0xff]  }
 0x1ff   :  { %10020 = vst [vmem:[#allocation28_spill] sm:$0xff] %v9132_v36  ;;  %3468 = vmatmul.mubr.bf16.gmra.mrb[36].mxu0 %v9016_v60  ;;  %v734_v7 = vmul.f32 %v8971_v14, %v10023_v53  ;;  %v831_v44 = vmul.f32 %v8681_v40, %v730_v35  ;;  %v9151_v16 = vpack.c.bf16 %v919_v0, %v915_v33  ;;  %v10027_v26 = vld [vmem:[#allocation24_spill] sm:$0xff]  ;;  %v7127_v53 = vld [vmem:[#allocation8 + $0x138] ss:$48 sps:$4 sm:$0xff]  }
 0x200   :  { %3510 = vmatprep.mubr.bf16.mxu0 %v10024_v22  ;;  %v9153_v43 = vpack.c.bf16 %v928_v28, %v924_v31  ;;  %v923_v47 = vadd.f32 %v8706_v12, %v822_v41  ;;  %v927_v1 = vadd.f32 %v8706_v12, %v826_v46  ;;  %v729_v29 = vmul.f32 %v8955_v45, %v10025_v63  ;;  %v7123_v0 = vld [vmem:[#allocation8 + $0xdc] ss:$48 sps:$4 sm:$0xff]   ;;  %v7121_v31 = vld [vmem:[#allocation8 + $0xd8] ss:$48 sps:$4 sm:$0xff]   ;;  %v7126_v28 = vld [vmem:[#allocation8 + $0x134] ss:$48 sps:$4 sm:$0xff]  }
 0x201   :  { %v835_v58 = vmul.f32 %v8681_v40, %v734_v7  ;;  %v733_v59 = vmul.f32 %v8971_v14, %v10026_v4  ;;  %v932_v23 = vadd.f32 %v8696_v9, %v831_v44  ;;  %v7114_v40 = vld [vmem:[#allocation8 + $0x74] ss:$48 sps:$4 sm:$0xff]   ;;  %v7129_v41 = vld [vmem:[#allocation8 + $0x13c] ss:$48 sps:$4 sm:$0xff]   ;;  %v7124_v46 = vld [vmem:[#allocation8 + $0x130] ss:$48 sps:$4 sm:$0xff]  }
 0x202   :  { %v9162_v49 = vpack.c.bf16 %v927_v1, %v923_v47  ;;  %v830_v27 = vmul.f32 %v8690_v17, %v729_v29  ;;  %v7132_v7 = vld [vmem:[#allocation8 + $0x194] ss:$48 sps:$4 sm:$0xff]   ;;  %v7135_v44 = vld [vmem:[#allocation8 + $0x19c] ss:$48 sps:$4 sm:$0xff]   ;;  %v7130_v47 = vld [vmem:[#allocation8 + $0x190] ss:$48 sps:$4 sm:$0xff]  }
 0x203   :  { %v936_v19 = vadd.f32 %v8696_v9, %v835_v58  ;;  %v834_v37 = vmul.f32 %v8690_v17, %v733_v59  ;;  %3777 = vmatmul.mubr.bf16.vlgmr.msra.gmra.mrb[0].mxu1 %v10027_v26  ;;  %v7112_v9 = vld [vmem:[#allocation8 + $0x70] ss:$48 sps:$4 sm:$0xff]   ;;  %v7120_v17 = vld [vmem:[#allocation8 + $0xd4] ss:$48 sps:$4 sm:$0xff]   ;;  %v7133_v1 = vld [vmem:[#allocation8 + $0x198] ss:$48 sps:$4 sm:$0xff]  }
 0x204   :  { %v931_v45 = vadd.f32 %v8706_v12, %v830_v27  ;;  %4144 = vmatpush1.bf16.msra.mxu1 %v7109_v18  ;;  %3786 = vmatprep.mubr.bf16.mxu1 %v8826_v2  ;;  %v7138_v58 = vld [vmem:[#allocation8 + $0x1f4] ss:$48 sps:$4 sm:$0xff]   ;;  %v7141_v63 = vld [vmem:[#allocation8 + $0x1fc] ss:$48 sps:$4 sm:$0xff]   ;;  %v7136_v29 = vld [vmem:[#allocation8 + $0x1f0] ss:$48 sps:$4 sm:$0xff]  }
 0x205   :  { %v9168_v33 = vpack.c.bf16 %v936_v19, %v932_v23  ;;  %v935_v14 = vadd.f32 %v8706_v12, %v834_v37  ;;  %4145 = vmatprep.subr.bf16.mxu1 %v7117_v24  ;;  %v7118_v12 = vld [vmem:[#allocation8 + $0xd0] ss:$48 sps:$4 sm:$0xff]   ;;  %v7139_v4 = vld [vmem:[#allocation8 + $0x1f8] ss:$48 sps:$4 sm:$0xff]   ;;  %v7144_v59 = vld [vmem:[#allocation8 + $0x254] ss:$48 sps:$4 sm:$0xff]  }
 0x206   :  { %v7147_v23 = vld [vmem:[#allocation8 + $0x25c] ss:$48 sps:$4 sm:$0xff]   ;;  %v7142_v19 = vld [vmem:[#allocation8 + $0x250] ss:$48 sps:$4 sm:$0xff]   ;;  %v7145_v27 = vld [vmem:[#allocation8 + $0x258] ss:$48 sps:$4 sm:$0xff]  }
 0x207   :  { %3511 = vmatmul.mubr.bf16.vlgmr.msra.gmra.mrb[0].mxu0 %v10027_v26  ;;  %v9174_v35 = vpack.c.bf16 %v935_v14, %v931_v45  ;;  %v7153_v18 = vld [vmem:[#allocation8 + $0x2bc] ss:$48 sps:$4 sm:$0xff]   ;;  %v7148_v37 = vld [vmem:[#allocation8 + $0x2b0] ss:$48 sps:$4 sm:$0xff]   ;;  %v7156_v24 = vld [vmem:[#allocation8 + $0x314] ss:$48 sps:$4 sm:$0xff]  }
 0x208   :  { %3878 = vmatpush1.bf16.msra.mxu0 %v7106_v54  ;;  %3520 = vmatprep.mubr.bf16.mxu0 %v8826_v2  ;;  %v7150_v54 = vld [vmem:[#allocation8 + $0x2b4] ss:$48 sps:$4 sm:$0xff]   ;;  %v7159_v45 = vld [vmem:[#allocation8 + $0x31c] ss:$48 sps:$4 sm:$0xff]   ;;  %v7154_v14 = vld [vmem:[#allocation8 + $0x310] ss:$48 sps:$4 sm:$0xff]  }
 0x209   :  { %3879 = vmatprep.subr.bf16.mxu0 %v7114_v40  ;;  %4146 = vmatpush1.bf16.msra.mxu1 %v7115_v51  ;;  %v7151_v40 = vld [vmem:[#allocation8 + $0x2b8] ss:$48 sps:$4 sm:$0xff]   ;;  %v7162_v51 = vld [vmem:[#allocation8 + $0x374] ss:$48 sps:$4 sm:$0xff]  }
 0x20a   :  { %4147 = vmatprep.subr.bf16.mxu1 %v7123_v0  ;;  %v7160_v0 = vld [vmem:[#allocation8 + $0x370] ss:$48 sps:$4 sm:$0xff]  }
 0x20b   :  { %3787 = vmatmul.mubr.bf16.gmra.mrb[4].mxu1 %v8953_v25 }
 0x20c   :  { %3880 = vmatpush1.bf16.msra.mxu0 %v7112_v9  ;;  %3796 = vmatprep.mubr.bf16.mxu1 %v9018_v20  ;;  %v7157_v9 = vld [vmem:[#allocation8 + $0x318] ss:$48 sps:$4 sm:$0xff]  }
 0x20d   :  { %3881 = vmatprep.subr.bf16.mxu0 %v7120_v17  ;;  %4148 = vmatpush1.bf16.msra.mxu1 %v7121_v31  ;;  %v7165_v17 = vld [vmem:[#allocation8 + $0x37c] ss:$48 sps:$4 sm:$0xff]   ;;  %v7168_v31 = vld [vmem:[#allocation8 + $0x3d4] ss:$48 sps:$4 sm:$0xff]  }
 0x20e   :  { %4149 = vmatprep.subr.bf16.mxu1 %v7129_v41  ;;  %v7166_v41 = vld [vmem:[#allocation8 + $0x3d0] ss:$48 sps:$4 sm:$0xff]  }
 0x20f   :  { %3521 = vmatmul.mubr.bf16.gmra.mrb[4].mxu0 %v8953_v25 }
 0x210   :  { %3530 = vmatprep.mubr.bf16.mxu0 %v9018_v20  ;;  %3882 = vmatpush1.bf16.msra.mxu0 %v7118_v12  ;;  %v7163_v12 = vld [vmem:[#allocation8 + $0x378] ss:$48 sps:$4 sm:$0xff]  }
 0x211   :  { %3883 = vmatprep.subr.bf16.mxu0 %v7126_v28  ;;  %4150 = vmatpush1.bf16.msra.mxu1 %v7127_v53  ;;  %v7171_v28 = vld [vmem:[#allocation8 + $0x3dc] ss:$48 sps:$4 sm:$0xff]   ;;  %v7174_v53 = vld [vmem:[#allocation8 + $0x434] ss:$48 sps:$4 sm:$0xff]  }
 0x212   :  { %4151 = vmatprep.subr.bf16.mxu1 %v7135_v44  ;;  %v7172_v44 = vld [vmem:[#allocation8 + $0x430] ss:$48 sps:$4 sm:$0xff]  }
 0x213   :  { %3797 = vmatmul.mubr.bf16.gmra.mrb[8].mxu1 %v9032_v48 }
 0x214   :  { %3884 = vmatpush1.bf16.msra.mxu0 %v7124_v46  ;;  %3806 = vmatprep.mubr.bf16.mxu1 %v9041_v42  ;;  %v7169_v46 = vld [vmem:[#allocation8 + $0x3d8] ss:$48 sps:$4 sm:$0xff]  }
 0x215   :  { %3885 = vmatprep.subr.bf16.mxu0 %v7132_v7  ;;  %4152 = vmatpush1.bf16.msra.mxu1 %v7133_v1  ;;  %v7177_v7 = vld [vmem:[#allocation8 + $0x43c] ss:$48 sps:$4 sm:$0xff]   ;;  %v7180_v1 = vld [vmem:[#allocation8 + $0x494] ss:$48 sps:$4 sm:$0xff]  }
 0x216   :  { %4153 = vmatprep.subr.bf16.mxu1 %v7141_v63  ;;  %v7178_v63 = vld [vmem:[#allocation8 + $0x490] ss:$48 sps:$4 sm:$0xff]  }
 0x217   :  { %3531 = vmatmul.mubr.bf16.gmra.mrb[8].mxu0 %v9032_v48 }
 0x218   :  { %3540 = vmatprep.mubr.bf16.mxu0 %v9041_v42  ;;  %3886 = vmatpush1.bf16.msra.mxu0 %v7130_v47  ;;  %v7175_v47 = vld [vmem:[#allocation8 + $0x438] ss:$48 sps:$4 sm:$0xff]  }
 0x219   :  { %3887 = vmatprep.subr.bf16.mxu0 %v7138_v58  ;;  %4154 = vmatpush1.bf16.msra.mxu1 %v7139_v4  ;;  %v7183_v58 = vld [vmem:[#allocation8 + $0x49c] ss:$48 sps:$4 sm:$0xff]   ;;  %v7186_v4 = vld [vmem:[#allocation8 + $0x4f4] ss:$48 sps:$4 sm:$0xff]  }
 0x21a   :  { %4155 = vmatprep.subr.bf16.mxu1 %v7147_v23  ;;  %v7184_v23 = vld [vmem:[#allocation8 + $0x4f0] ss:$48 sps:$4 sm:$0xff]  }
 0x21b   :  { %3807 = vmatmul.mubr.bf16.gmra.mrb[12].mxu1 %v9057_v13 }
 0x21c   :  { %3888 = vmatpush1.bf16.msra.mxu0 %v7136_v29  ;;  %3816 = vmatprep.mubr.bf16.mxu1 %v9067_v21  ;;  %v7181_v29 = vld [vmem:[#allocation8 + $0x498] ss:$48 sps:$4 sm:$0xff]  }
 0x21d   :  { %3889 = vmatprep.subr.bf16.mxu0 %v7144_v59  ;;  %4156 = vmatpush1.bf16.msra.mxu1 %v7145_v27  ;;  %v7189_v59 = vld [vmem:[#allocation8 + $0x4fc] ss:$48 sps:$4 sm:$0xff]   ;;  %v7192_v27 = vld [vmem:[#allocation8 + $0x554] ss:$48 sps:$4 sm:$0xff]  }
 0x21e   :  { %4157 = vmatprep.subr.bf16.mxu1 %v7153_v18  ;;  %v7190_v18 = vld [vmem:[#allocation8 + $0x550] ss:$48 sps:$4 sm:$0xff]  }
 0x21f   :  { %3541 = vmatmul.mubr.bf16.gmra.mrb[12].mxu0 %v9057_v13 }
 0x220   :  { %3550 = vmatprep.mubr.bf16.mxu0 %v9067_v21  ;;  %3890 = vmatpush1.bf16.msra.mxu0 %v7142_v19  ;;  %v7187_v19 = vld [vmem:[#allocation8 + $0x4f8] ss:$48 sps:$4 sm:$0xff]  }
 0x221   :  { %3891 = vmatprep.subr.bf16.mxu0 %v7150_v54  ;;  %4158 = vmatpush1.bf16.msra.mxu1 %v7151_v40  ;;  %v7195_v54 = vld [vmem:[#allocation8 + $0x55c] ss:$48 sps:$4 sm:$0xff]   ;;  %v7198_v40 = vld [vmem:[#allocation8 + $0x5b4] ss:$48 sps:$4 sm:$0xff]  }
 0x222   :  { %4159 = vmatprep.subr.bf16.mxu1 %v7159_v45  ;;  %v7196_v45 = vld [vmem:[#allocation8 + $0x5b0] ss:$48 sps:$4 sm:$0xff]  }
 0x223   :  { %3817 = vmatmul.mubr.bf16.gmra.mrb[16].mxu1 %v9072_v57 }
 0x224   :  { %3892 = vmatpush1.bf16.msra.mxu0 %v7148_v37  ;;  %3826 = vmatprep.mubr.bf16.mxu1 %v9090_v52  ;;  %v7193_v37 = vld [vmem:[#allocation8 + $0x558] ss:$48 sps:$4 sm:$0xff]  }
 0x225   :  { %3893 = vmatprep.subr.bf16.mxu0 %v7156_v24  ;;  %4160 = vmatpush1.bf16.msra.mxu1 %v7157_v9  ;;  %v7201_v24 = vld [vmem:[#allocation8 + $0x5bc] ss:$48 sps:$4 sm:$0xff]   ;;  %v7204_v9 = vld [vmem:[#allocation8 + $0x614] ss:$48 sps:$4 sm:$0xff]  }
 0x226   :  { %4161 = vmatprep.subr.bf16.mxu1 %v7165_v17  ;;  %v10028_v17 = vld [vmem:[#allocation21_spill] sm:$0xff] }
 0x227   :  { %3551 = vmatmul.mubr.bf16.gmra.mrb[16].mxu0 %v9072_v57 }
 0x228   :  { %3560 = vmatprep.mubr.bf16.mxu0 %v9090_v52  ;;  %3894 = vmatpush1.bf16.msra.mxu0 %v7154_v14  ;;  %v7199_v14 = vld [vmem:[#allocation8 + $0x5b8] ss:$48 sps:$4 sm:$0xff]  }
 0x229   :  { %3895 = vmatprep.subr.bf16.mxu0 %v7162_v51  ;;  %4162 = vmatpush1.bf16.msra.mxu1 %v7163_v12  ;;  %v7207_v51 = vld [vmem:[#allocation8 + $0x61c] ss:$48 sps:$4 sm:$0xff]   ;;  %v7205_v12 = vld [vmem:[#allocation8 + $0x618] ss:$48 sps:$4 sm:$0xff]  }
 0x22a   :  { %4163 = vmatprep.subr.bf16.mxu1 %v7171_v28  ;;  %v7213_v28 = vld [vmem:[#allocation8 + $0x67c] ss:$48 sps:$4 sm:$0xff]  }
 0x22b   :  { %3827 = vmatmul.mubr.bf16.gmra.mrb[20].mxu1 %v9105_v32 }
 0x22c   :  { %3896 = vmatpush1.bf16.msra.mxu0 %v7160_v0  ;;  %3836 = vmatprep.mubr.bf16.mxu1 %v9114_v3  ;;  %v7202_v0 = vld [vmem:[#allocation8 + $0x610] ss:$48 sps:$4 sm:$0xff]  }
 0x22d   :  { %3897 = vmatprep.subr.bf16.mxu0 %v7168_v31  ;;  %4164 = vmatpush1.bf16.msra.mxu1 %v7169_v46  ;;  %v7210_v31 = vld [vmem:[#allocation8 + $0x674] ss:$48 sps:$4 sm:$0xff]   ;;  %v7208_v46 = vld [vmem:[#allocation8 + $0x670] ss:$48 sps:$4 sm:$0xff]  }
 0x22e   :  { %4165 = vmatprep.subr.bf16.mxu1 %v7177_v7  ;;  %v10030_v7 = vld [vmem:[#allocation17_spill] sm:$0xff] }
 0x22f   :  { %3561 = vmatmul.mubr.bf16.gmra.mrb[20].mxu0 %v9105_v32 }
 0x230   :  { %3570 = vmatprep.mubr.bf16.mxu0 %v9114_v3  ;;  %3898 = vmatpush1.bf16.msra.mxu0 %v7166_v41  ;;  %v10029_v41 = vld [vmem:[#allocation20_spill] sm:$0xff] }
 0x231   :  { %3899 = vmatprep.subr.bf16.mxu0 %v7174_v53  ;;  %4166 = vmatpush1.bf16.msra.mxu1 %v7175_v47  ;;  %v7211_v53 = vld [vmem:[#allocation8 + $0x678] ss:$48 sps:$4 sm:$0xff]   ;;  %v7219_v47 = vld [vmem:[#allocation8 + $0x6dc] ss:$48 sps:$4 sm:$0xff]  }
 0x232   :  { %4167 = vmatprep.subr.bf16.mxu1 %v7183_v58  ;;  %v7217_v58 = vld [vmem:[#allocation8 + $0x6d8] ss:$48 sps:$4 sm:$0xff]  }
 0x233   :  { %3837 = vmatmul.mubr.bf16.gmra.mrb[24].mxu1 %v9122_v8 }
 0x234   :  { %3900 = vmatpush1.bf16.msra.mxu0 %v7172_v44  ;;  %3846 = vmatprep.mubr.bf16.mxu1 %v9132_v36  ;;  %v7216_v44 = vld [vmem:[#allocation8 + $0x6d4] ss:$48 sps:$4 sm:$0xff]  }
 0x235   :  { %3901 = vmatprep.subr.bf16.mxu0 %v7180_v1  ;;  %4168 = vmatpush1.bf16.msra.mxu1 %v7181_v29  ;;  %v7214_v1 = vld [vmem:[#allocation8 + $0x6d0] ss:$48 sps:$4 sm:$0xff]   ;;  %v7225_v29 = vld [vmem:[#allocation8 + $0x73c] ss:$48 sps:$4 sm:$0xff]  }
 0x236   :  { %4169 = vmatprep.subr.bf16.mxu1 %v7189_v59  ;;  %v10032_v59 = vld [vmem:[#allocation22_spill] sm:$0xff] }
 0x237   :  { %3571 = vmatmul.mubr.bf16.gmra.mrb[24].mxu0 %v9122_v8 }
 0x238   :  { %3580 = vmatprep.mubr.bf16.mxu0 %v9132_v36  ;;  %3902 = vmatpush1.bf16.msra.mxu0 %v7178_v63  ;;  %v7222_v63 = vld [vmem:[#allocation8 + $0x734] ss:$48 sps:$4 sm:$0xff]  }
 0x239   :  { %3903 = vmatprep.subr.bf16.mxu0 %v7186_v4  ;;  %4170 = vmatpush1.bf16.msra.mxu1 %v7187_v19  ;;  %v10031_v4 = vld [vmem:[#allocation16_spill] sm:$0xff]  ;;  %v7223_v19 = vld [vmem:[#allocation8 + $0x738] ss:$48 sps:$4 sm:$0xff]  }
 0x23a   :  { %4171 = vmatprep.subr.bf16.mxu1 %v7195_v54  ;;  %v7231_v54 = vld [vmem:[#allocation8 + $0x79c] ss:$48 sps:$4 sm:$0xff]  }
 0x23b   :  { %3847 = vmatmul.mubr.bf16.gmra.mrb[28].mxu1 %v9151_v16 }
 0x23c   :  { %3904 = vmatpush1.bf16.msra.mxu0 %v7184_v23  ;;  %3856 = vmatprep.mubr.bf16.mxu1 %v9153_v43  ;;  %v7220_v23 = vld [vmem:[#allocation8 + $0x730] ss:$48 sps:$4 sm:$0xff]  }
 0x23d   :  { %3905 = vmatprep.subr.bf16.mxu0 %v7192_v27  ;;  %4172 = vmatpush1.bf16.msra.mxu1 %v7193_v37  ;;  %v7228_v27 = vld [vmem:[#allocation8 + $0x794] ss:$48 sps:$4 sm:$0xff]   ;;  %v7229_v37 = vld [vmem:[#allocation8 + $0x798] ss:$48 sps:$4 sm:$0xff]  }
 0x23e   :  { %4173 = vmatprep.subr.bf16.mxu1 %v7201_v24  ;;  %v7237_v24 = vld [vmem:[#allocation8 + $0x7fc] ss:$48 sps:$4 sm:$0xff]  }
 0x23f   :  { %3581 = vmatmul.mubr.bf16.gmra.mrb[28].mxu0 %v9151_v16 }
 0x240   :  { %3590 = vmatprep.mubr.bf16.mxu0 %v9153_v43  ;;  %3906 = vmatpush1.bf16.msra.mxu0 %v7190_v18  ;;  %v7226_v18 = vld [vmem:[#allocation8 + $0x790] ss:$48 sps:$4 sm:$0xff]  }
 0x241   :  { %3907 = vmatprep.subr.bf16.mxu0 %v7198_v40  ;;  %4174 = vmatpush1.bf16.msra.mxu1 %v7199_v14  ;;  %v7234_v40 = vld [vmem:[#allocation8 + $0x7f4] ss:$48 sps:$4 sm:$0xff]   ;;  %v7235_v14 = vld [vmem:[#allocation8 + $0x7f8] ss:$48 sps:$4 sm:$0xff]  }
 0x242   :  { %4276 = vmatprep.subr.bf16.mxu1 %v7207_v51  ;;  %v7243_v51 = vld [vmem:[#allocation8 + $0x85c] ss:$48 sps:$4 sm:$0xff]  }
 0x243   :  { %3857 = vmatmul.mubr.bf16.gmra.mrb[32].mxu1 %v9162_v49 }
 0x244   :  { %3908 = vmatpush1.bf16.msra.mxu0 %v7196_v45  ;;  %3866 = vmatprep.mubr.bf16.mxu1 %v9168_v33  ;;  %v7232_v45 = vld [vmem:[#allocation8 + $0x7f0] ss:$48 sps:$4 sm:$0xff]  }
 0x245   :  { %4010 = vmatprep.subr.bf16.mxu0 %v7204_v9  ;;  %v7240_v9 = vld [vmem:[#allocation8 + $0x854] ss:$48 sps:$4 sm:$0xff]  }
 0x247   :  { %3591 = vmatmul.mubr.bf16.gmra.mrb[32].mxu0 %v9162_v49 }
 0x248   :  { %3600 = vmatprep.mubr.bf16.mxu0 %v9168_v33 }
 0x24b   :  { %3867 = vmatmul.mubr.bf16.gmra.mrb[36].mxu1 %v9174_v35 }
 0x24c   :  { %4175 = vmatprep.mubr.bf16.mxu1 %v10028_v17 }
 0x24f   :  { %3601 = vmatmul.mubr.bf16.gmra.mrb[36].mxu0 %v9174_v35 }
 0x250   :  { %3909 = vmatprep.mubr.bf16.mxu0 %v10028_v17 }
 0x253   :  { %4176 = vmatmul.mubr.bf16.vlgmr.msra.gmra.mrb[40].mxu1 %v10029_v41 }
 0x254   :  { %4277 = vmatpush1.bf16.msra.mxu1 %v7205_v12  ;;  %4185 = vmatprep.mubr.bf16.mxu1 %v10030_v7  ;;  %v7241_v12 = vld [vmem:[#allocation8 + $0x858] ss:$48 sps:$4 sm:$0xff]  }
 0x255   :  { %4278 = vmatprep.subr.bf16.mxu1 %v7213_v28  ;;  %v7249_v28 = vld [vmem:[#allocation8 + $0x8bc] ss:$48 sps:$4 sm:$0xff]  }
 0x257   :  { %3910 = vmatmul.mubr.bf16.vlgmr.msra.gmra.mrb[40].mxu0 %v10029_v41 }
 0x258   :  { %4011 = vmatpush1.bf16.msra.mxu0 %v7202_v0  ;;  %3919 = vmatprep.mubr.bf16.mxu0 %v10030_v7  ;;  %v7238_v0 = vld [vmem:[#allocation8 + $0x850] ss:$48 sps:$4 sm:$0xff]  }
 0x259   :  { %4012 = vmatprep.subr.bf16.mxu0 %v7210_v31  ;;  %4279 = vmatpush1.bf16.msra.mxu1 %v7211_v53  ;;  %v7246_v31 = vld [vmem:[#allocation8 + $0x8b4] ss:$48 sps:$4 sm:$0xff]   ;;  %v7247_v53 = vld [vmem:[#allocation8 + $0x8b8] ss:$48 sps:$4 sm:$0xff]  }
 0x25a   :  { %4280 = vmatprep.subr.bf16.mxu1 %v7219_v47  ;;  %v7255_v47 = vld [vmem:[#allocation8 + $0x91c] ss:$48 sps:$4 sm:$0xff]  }
 0x25b   :  { %4186 = vmatmul.mubr.bf16.gmra.mrb[44].mxu1 %v10031_v4 }
 0x25c   :  { %4013 = vmatpush1.bf16.msra.mxu0 %v7208_v46  ;;  %4195 = vmatprep.mubr.bf16.mxu1 %v10032_v59  ;;  %v7244_v46 = vld [vmem:[#allocation8 + $0x8b0] ss:$48 sps:$4 sm:$0xff]  }
 0x25d   :  { %4014 = vmatprep.subr.bf16.mxu0 %v7216_v44  ;;  %4281 = vmatpush1.bf16.msra.mxu1 %v7217_v58  ;;  %v7252_v44 = vld [vmem:[#allocation8 + $0x914] ss:$48 sps:$4 sm:$0xff]   ;;  %v7253_v58 = vld [vmem:[#allocation8 + $0x918] ss:$48 sps:$4 sm:$0xff]  }
 0x25e   :  { %4282 = vmatprep.subr.bf16.mxu1 %v7225_v29  ;;  %v7261_v29 = vld [vmem:[#allocation8 + $0x97c] ss:$48 sps:$4 sm:$0xff]  }
 0x25f   :  { %3920 = vmatmul.mubr.bf16.gmra.mrb[44].mxu0 %v10031_v4 }
 0x260   :  { %3929 = vmatprep.mubr.bf16.mxu0 %v10032_v59  ;;  %4015 = vmatpush1.bf16.msra.mxu0 %v7214_v1  ;;  %v7250_v1 = vld [vmem:[#allocation8 + $0x910] ss:$48 sps:$4 sm:$0xff]  }
 0x261   :  { %4016 = vmatprep.subr.bf16.mxu0 %v7222_v63  ;;  %4283 = vmatpush1.bf16.msra.mxu1 %v7223_v19  ;;  %v7258_v63 = vld [vmem:[#allocation8 + $0x974] ss:$48 sps:$4 sm:$0xff]   ;;  %v7259_v19 = vld [vmem:[#allocation8 + $0x978] ss:$48 sps:$4 sm:$0xff]  }
 0x262   :  { %4284 = vmatprep.subr.bf16.mxu1 %v7231_v54  ;;  %v7267_v54 = vld [vmem:[#allocation8 + $0x9dc] ss:$48 sps:$4 sm:$0xff]  }
 0x263   :  { %4196 = vmatmul.mubr.bf16.gmra.mrb[48].mxu1 %v8798_v56 }
 0x264   :  { %4017 = vmatpush1.bf16.msra.mxu0 %v7220_v23  ;;  %4205 = vmatprep.mubr.bf16.mxu1 %v8830_v38  ;;  %v7256_v23 = vld [vmem:[#allocation8 + $0x970] ss:$48 sps:$4 sm:$0xff]  }
 0x265   :  { %4018 = vmatprep.subr.bf16.mxu0 %v7228_v27  ;;  %4285 = vmatpush1.bf16.msra.mxu1 %v7229_v37  ;;  %v7264_v27 = vld [vmem:[#allocation8 + $0x9d4] ss:$48 sps:$4 sm:$0xff]   ;;  %v7265_v37 = vld [vmem:[#allocation8 + $0x9d8] ss:$48 sps:$4 sm:$0xff]  }
 0x266   :  { %4286 = vmatprep.subr.bf16.mxu1 %v7237_v24  ;;  %v7273_v24 = vld [vmem:[#allocation8 + $0xa3c] ss:$48 sps:$4 sm:$0xff]  }
 0x267   :  { %3930 = vmatmul.mubr.bf16.gmra.mrb[48].mxu0 %v8798_v56 }
 0x268   :  { %3939 = vmatprep.mubr.bf16.mxu0 %v8830_v38  ;;  %4019 = vmatpush1.bf16.msra.mxu0 %v7226_v18  ;;  %v7262_v18 = vld [vmem:[#allocation8 + $0x9d0] ss:$48 sps:$4 sm:$0xff]  }
 0x269   :  { %4020 = vmatprep.subr.bf16.mxu0 %v7234_v40  ;;  %4287 = vmatpush1.bf16.msra.mxu1 %v7235_v14  ;;  %v7270_v40 = vld [vmem:[#allocation8 + $0xa34] ss:$48 sps:$4 sm:$0xff]   ;;  %v7271_v14 = vld [vmem:[#allocation8 + $0xa38] ss:$48 sps:$4 sm:$0xff]  }
 0x26a   :  { %4288 = vmatprep.subr.bf16.mxu1 %v7243_v51  ;;  %v7279_v51 = vld [vmem:[#allocation8 + $0xa9c] ss:$48 sps:$4 sm:$0xff]  }
 0x26b   :  { %4206 = vmatmul.mubr.bf16.gmra.mrb[52].mxu1 %v8832_v61 }
 0x26c   :  { %4021 = vmatpush1.bf16.msra.mxu0 %v7232_v45  ;;  %4215 = vmatprep.mubr.bf16.mxu1 %v8870_v34  ;;  %v7268_v45 = vld [vmem:[#allocation8 + $0xa30] ss:$48 sps:$4 sm:$0xff]  }
 0x26d   :  { %4022 = vmatprep.subr.bf16.mxu0 %v7240_v9  ;;  %4289 = vmatpush1.bf16.msra.mxu1 %v7241_v12  ;;  %v7276_v9 = vld [vmem:[#allocation8 + $0xa94] ss:$48 sps:$4 sm:$0xff]   ;;  %v7277_v12 = vld [vmem:[#allocation8 + $0xa98] ss:$48 sps:$4 sm:$0xff]  }
 0x26e   :  { %4290 = vmatprep.subr.bf16.mxu1 %v7249_v28  ;;  %v7285_v28 = vld [vmem:[#allocation8 + $0xafc] ss:$48 sps:$4 sm:$0xff]  }
 0x26f   :  { %3940 = vmatmul.mubr.bf16.gmra.mrb[52].mxu0 %v8832_v61 }
 0x270   :  { %3949 = vmatprep.mubr.bf16.mxu0 %v8870_v34  ;;  %4023 = vmatpush1.bf16.msra.mxu0 %v7238_v0  ;;  %v7274_v0 = vld [vmem:[#allocation8 + $0xa90] ss:$48 sps:$4 sm:$0xff]  }
 0x271   :  { %4024 = vmatprep.subr.bf16.mxu0 %v7246_v31  ;;  %4291 = vmatpush1.bf16.msra.mxu1 %v7247_v53  ;;  %v7282_v31 = vld [vmem:[#allocation8 + $0xaf4] ss:$48 sps:$4 sm:$0xff]   ;;  %v7283_v53 = vld [vmem:[#allocation8 + $0xaf8] ss:$48 sps:$4 sm:$0xff]  }
 0x272   :  { %4292 = vmatprep.subr.bf16.mxu1 %v7255_v47  ;;  %v7291_v47 = vld [vmem:[#allocation8 + $0xb5c] ss:$48 sps:$4 sm:$0xff]  }
 0x273   :  { %4216 = vmatmul.mubr.bf16.gmra.mrb[56].mxu1 %v8873_v30 }
 0x274   :  { %4025 = vmatpush1.bf16.msra.mxu0 %v7244_v46  ;;  %4225 = vmatprep.mubr.bf16.mxu1 %v8896_v39  ;;  %v7280_v46 = vld [vmem:[#allocation8 + $0xaf0] ss:$48 sps:$4 sm:$0xff]  }
 0x275   :  { %4026 = vmatprep.subr.bf16.mxu0 %v7252_v44  ;;  %4293 = vmatpush1.bf16.msra.mxu1 %v7253_v58  ;;  %v7288_v44 = vld [vmem:[#allocation8 + $0xb54] ss:$48 sps:$4 sm:$0xff]   ;;  %v7289_v58 = vld [vmem:[#allocation8 + $0xb58] ss:$48 sps:$4 sm:$0xff]  }
 0x276   :  { %4294 = vmatprep.subr.bf16.mxu1 %v7261_v29  ;;  %v7297_v29 = vld [vmem:[#allocation8 + $0xbbc] ss:$48 sps:$4 sm:$0xff]  }
 0x277   :  { %3950 = vmatmul.mubr.bf16.gmra.mrb[56].mxu0 %v8873_v30 }
 0x278   :  { %3959 = vmatprep.mubr.bf16.mxu0 %v8896_v39  ;;  %4027 = vmatpush1.bf16.msra.mxu0 %v7250_v1  ;;  %v7286_v1 = vld [vmem:[#allocation8 + $0xb50] ss:$48 sps:$4 sm:$0xff]  }
 0x279   :  { %4028 = vmatprep.subr.bf16.mxu0 %v7258_v63  ;;  %4295 = vmatpush1.bf16.msra.mxu1 %v7259_v19  ;;  %v7294_v63 = vld [vmem:[#allocation8 + $0xbb4] ss:$48 sps:$4 sm:$0xff]   ;;  %v7295_v19 = vld [vmem:[#allocation8 + $0xbb8] ss:$48 sps:$4 sm:$0xff]  }
 0x27a   :  { %4296 = vmatprep.subr.bf16.mxu1 %v7267_v54  ;;  %v7303_v54 = vld [vmem:[#allocation8 + $0x2c] ss:$48 sps:$4 sm:$0xff]  }
 0x27b   :  { %4226 = vmatmul.mubr.bf16.gmra.mrb[60].mxu1 %v8903_v6 }
 0x27c   :  { %4029 = vmatpush1.bf16.msra.mxu0 %v7256_v23  ;;  %4235 = vmatprep.mubr.bf16.mxu1 %v8927_v62  ;;  %v7292_v23 = vld [vmem:[#allocation8 + $0xbb0] ss:$48 sps:$4 sm:$0xff]  }
 0x27d   :  { %4030 = vmatprep.subr.bf16.mxu0 %v7264_v27  ;;  %4297 = vmatpush1.bf16.msra.mxu1 %v7265_v37  ;;  %v7300_v27 = vld [vmem:[#allocation8 + $0x24] ss:$48 sps:$4 sm:$0xff]   ;;  %v7301_v37 = vld [vmem:[#allocation8 + $0x28] ss:$48 sps:$4 sm:$0xff]  }
 0x27e   :  { %4298 = vmatprep.subr.bf16.mxu1 %v7273_v24  ;;  %v7309_v24 = vld [vmem:[#allocation8 + $0x8c] ss:$48 sps:$4 sm:$0xff]  }
 0x27f   :  { %3960 = vmatmul.mubr.bf16.gmra.mrb[60].mxu0 %v8903_v6 }
 0x280   :  { %3969 = vmatprep.mubr.bf16.mxu0 %v8927_v62  ;;  %4031 = vmatpush1.bf16.msra.mxu0 %v7262_v18  ;;  %v7298_v18 = vld [vmem:[#allocation8 + $0x20] ss:$48 sps:$4 sm:$0xff]  }
 0x281   :  { %4032 = vmatprep.subr.bf16.mxu0 %v7270_v40  ;;  %4299 = vmatpush1.bf16.msra.mxu1 %v7271_v14  ;;  %v7306_v40 = vld [vmem:[#allocation8 + $0x84] ss:$48 sps:$4 sm:$0xff]   ;;  %v7307_v14 = vld [vmem:[#allocation8 + $0x88] ss:$48 sps:$4 sm:$0xff]  }
 0x282   :  { %4300 = vmatprep.subr.bf16.mxu1 %v7279_v51  ;;  %v7315_v51 = vld [vmem:[#allocation8 + $0xec] ss:$48 sps:$4 sm:$0xff]  }
 0x283   :  { %4236 = vmatmul.mubr.bf16.gmra.mrb[64].mxu1 %v8934_v5 }
 0x284   :  { %4033 = vmatpush1.bf16.msra.mxu0 %v7268_v45  ;;  %4245 = vmatprep.mubr.bf16.mxu1 %v8957_v10  ;;  %v7304_v45 = vld [vmem:[#allocation8 + $0x80] ss:$48 sps:$4 sm:$0xff]  }
 0x285   :  { %4034 = vmatprep.subr.bf16.mxu0 %v7276_v9  ;;  %4301 = vmatpush1.bf16.msra.mxu1 %v7277_v12  ;;  %v7312_v9 = vld [vmem:[#allocation8 + $0xe4] ss:$48 sps:$4 sm:$0xff]   ;;  %v7313_v12 = vld [vmem:[#allocation8 + $0xe8] ss:$48 sps:$4 sm:$0xff]  }
 0x286   :  { %4302 = vmatprep.subr.bf16.mxu1 %v7285_v28  ;;  %v7321_v28 = vld [vmem:[#allocation8 + $0x14c] ss:$48 sps:$4 sm:$0xff]  }
 0x287   :  { %3970 = vmatmul.mubr.bf16.gmra.mrb[64].mxu0 %v8934_v5 }
 0x288   :  { %3979 = vmatprep.mubr.bf16.mxu0 %v8957_v10  ;;  %4035 = vmatpush1.bf16.msra.mxu0 %v7274_v0  ;;  %v7310_v0 = vld [vmem:[#allocation8 + $0xe0] ss:$48 sps:$4 sm:$0xff]  }
 0x289   :  { %4036 = vmatprep.subr.bf16.mxu0 %v7282_v31  ;;  %4303 = vmatpush1.bf16.msra.mxu1 %v7283_v53  ;;  %v7318_v31 = vld [vmem:[#allocation8 + $0x144] ss:$48 sps:$4 sm:$0xff]   ;;  %v7319_v53 = vld [vmem:[#allocation8 + $0x148] ss:$48 sps:$4 sm:$0xff]  }
 0x28a   :  { %4304 = vmatprep.subr.bf16.mxu1 %v7291_v47  ;;  %v7327_v47 = vld [vmem:[#allocation8 + $0x1ac] ss:$48 sps:$4 sm:$0xff]  }
 0x28b   :  { %4246 = vmatmul.mubr.bf16.gmra.mrb[68].mxu1 %v8963_v15 }
 0x28c   :  { %4037 = vmatpush1.bf16.msra.mxu0 %v7280_v46  ;;  %4255 = vmatprep.mubr.bf16.mxu1 %v8982_v55  ;;  %v7316_v46 = vld [vmem:[#allocation8 + $0x140] ss:$48 sps:$4 sm:$0xff]  }
 0x28d   :  { %4038 = vmatprep.subr.bf16.mxu0 %v7288_v44  ;;  %4305 = vmatpush1.bf16.msra.mxu1 %v7289_v58  ;;  %v7324_v44 = vld [vmem:[#allocation8 + $0x1a4] ss:$48 sps:$4 sm:$0xff]   ;;  %v7325_v58 = vld [vmem:[#allocation8 + $0x1a8] ss:$48 sps:$4 sm:$0xff]  }
 0x28e   :  { %4306 = vmatprep.subr.bf16.mxu1 %v7297_v29  ;;  %v7333_v29 = vld [vmem:[#allocation8 + $0x20c] ss:$48 sps:$4 sm:$0xff]  }
 0x28f   :  { %3980 = vmatmul.mubr.bf16.gmra.mrb[68].mxu0 %v8963_v15 }
 0x290   :  { %3989 = vmatprep.mubr.bf16.mxu0 %v8982_v55  ;;  %4039 = vmatpush1.bf16.msra.mxu0 %v7286_v1  ;;  %v7322_v1 = vld [vmem:[#allocation8 + $0x1a0] ss:$48 sps:$4 sm:$0xff]  }
 0x291   :  { %4040 = vmatprep.subr.bf16.mxu0 %v7294_v63  ;;  %4307 = vmatpush1.bf16.msra.mxu1 %v7295_v19  ;;  %v7330_v63 = vld [vmem:[#allocation8 + $0x204] ss:$48 sps:$4 sm:$0xff]   ;;  %v7331_v19 = vld [vmem:[#allocation8 + $0x208] ss:$48 sps:$4 sm:$0xff]  }
 0x292   :  { %4675 = vmatprep.subr.bf16.mxu1 %v7303_v54  ;;  %v7339_v54 = vld [vmem:[#allocation8 + $0x26c] ss:$48 sps:$4 sm:$0xff]  }
 0x293   :  { %4256 = vmatmul.mubr.bf16.gmra.mrb[72].mxu1 %v8987_v11 }
 0x294   :  { %4041 = vmatpush1.bf16.msra.mxu0 %v7292_v23  ;;  %4265 = vmatprep.mubr.bf16.mxu1 %v9009_v50  ;;  %v7328_v23 = vld [vmem:[#allocation8 + $0x200] ss:$48 sps:$4 sm:$0xff]  }
 0x295   :  { %4409 = vmatprep.subr.bf16.mxu0 %v7300_v27  ;;  %v7336_v27 = vld [vmem:[#allocation8 + $0x264] ss:$48 sps:$4 sm:$0xff]  }
 0x297   :  { %3990 = vmatmul.mubr.bf16.gmra.mrb[72].mxu0 %v8987_v11 }
 0x298   :  { %3999 = vmatprep.mubr.bf16.mxu0 %v9009_v50 }
 0x29b   :  { %4266 = vmatmul.mubr.bf16.gmra.mrb[76].mxu1 %v9016_v60 }
 0x29c   :  { %4308 = vmatprep.mubr.bf16.mxu1 %v10024_v22 }
 0x29f   :  { %4000 = vmatmul.mubr.bf16.gmra.mrb[76].mxu0 %v9016_v60 }
 0x2a0   :  { %4042 = vmatprep.mubr.bf16.mxu0 %v10024_v22 }
 0x2a3   :  { %4309 = vmatmul.mubr.bf16.vlgmr.msra.gmra.mrb[40].mxu1 %v10027_v26 }
 0x2a4   :  { %4676 = vmatpush1.bf16.msra.mxu1 %v7301_v37  ;;  %4318 = vmatprep.mubr.bf16.mxu1 %v8826_v2  ;;  %v7337_v37 = vld [vmem:[#allocation8 + $0x268] ss:$48 sps:$4 sm:$0xff]  }
 0x2a5   :  { %4677 = vmatprep.subr.bf16.mxu1 %v7309_v24  ;;  %v7345_v24 = vld [vmem:[#allocation8 + $0x2cc] ss:$48 sps:$4 sm:$0xff]  }
 0x2a7   :  { %4043 = vmatmul.mubr.bf16.vlgmr.msra.gmra.mrb[40].mxu0 %v10027_v26 }
 0x2a8   :  { %4410 = vmatpush1.bf16.msra.mxu0 %v7298_v18  ;;  %4052 = vmatprep.mubr.bf16.mxu0 %v8826_v2  ;;  %v7334_v18 = vld [vmem:[#allocation8 + $0x260] ss:$48 sps:$4 sm:$0xff]  }
 0x2a9   :  { %4411 = vmatprep.subr.bf16.mxu0 %v7306_v40  ;;  %4678 = vmatpush1.bf16.msra.mxu1 %v7307_v14  ;;  %v7342_v40 = vld [vmem:[#allocation8 + $0x2c4] ss:$48 sps:$4 sm:$0xff]   ;;  %v7343_v14 = vld [vmem:[#allocation8 + $0x2c8] ss:$48 sps:$4 sm:$0xff]  }
 0x2aa   :  { %4679 = vmatprep.subr.bf16.mxu1 %v7315_v51  ;;  %v7351_v51 = vld [vmem:[#allocation8 + $0x32c] ss:$48 sps:$4 sm:$0xff]  }
 0x2ab   :  { %4319 = vmatmul.mubr.bf16.gmra.mrb[44].mxu1 %v8953_v25 }
 0x2ac   :  { %4412 = vmatpush1.bf16.msra.mxu0 %v7304_v45  ;;  %4328 = vmatprep.mubr.bf16.mxu1 %v9018_v20  ;;  %v7340_v45 = vld [vmem:[#allocation8 + $0x2c0] ss:$48 sps:$4 sm:$0xff]  }
 0x2ad   :  { %4413 = vmatprep.subr.bf16.mxu0 %v7312_v9  ;;  %4680 = vmatpush1.bf16.msra.mxu1 %v7313_v12  ;;  %v7348_v9 = vld [vmem:[#allocation8 + $0x324] ss:$48 sps:$4 sm:$0xff]   ;;  %v7349_v12 = vld [vmem:[#allocation8 + $0x328] ss:$48 sps:$4 sm:$0xff]  }
 0x2ae   :  { %4681 = vmatprep.subr.bf16.mxu1 %v7321_v28  ;;  %v7357_v28 = vld [vmem:[#allocation8 + $0x38c] ss:$48 sps:$4 sm:$0xff]  }
 0x2af   :  { %4053 = vmatmul.mubr.bf16.gmra.mrb[44].mxu0 %v8953_v25 }
 0x2b0   :  { %4062 = vmatprep.mubr.bf16.mxu0 %v9018_v20  ;;  %4414 = vmatpush1.bf16.msra.mxu0 %v7310_v0  ;;  %v7346_v0 = vld [vmem:[#allocation8 + $0x320] ss:$48 sps:$4 sm:$0xff]  }
 0x2b1   :  { %4415 = vmatprep.subr.bf16.mxu0 %v7318_v31  ;;  %4682 = vmatpush1.bf16.msra.mxu1 %v7319_v53  ;;  %v7354_v31 = vld [vmem:[#allocation8 + $0x384] ss:$48 sps:$4 sm:$0xff]   ;;  %v7355_v53 = vld [vmem:[#allocation8 + $0x388] ss:$48 sps:$4 sm:$0xff]  }
 0x2b2   :  { %4683 = vmatprep.subr.bf16.mxu1 %v7327_v47  ;;  %v7363_v47 = vld [vmem:[#allocation8 + $0x3ec] ss:$48 sps:$4 sm:$0xff]  }
 0x2b3   :  { %4329 = vmatmul.mubr.bf16.gmra.mrb[48].mxu1 %v9032_v48 }
 0x2b4   :  { %4416 = vmatpush1.bf16.msra.mxu0 %v7316_v46  ;;  %4338 = vmatprep.mubr.bf16.mxu1 %v9041_v42  ;;  %v7352_v46 = vld [vmem:[#allocation8 + $0x380] ss:$48 sps:$4 sm:$0xff]  }
 0x2b5   :  { %4417 = vmatprep.subr.bf16.mxu0 %v7324_v44  ;;  %4684 = vmatpush1.bf16.msra.mxu1 %v7325_v58  ;;  %v7360_v44 = vld [vmem:[#allocation8 + $0x3e4] ss:$48 sps:$4 sm:$0xff]   ;;  %v7361_v58 = vld [vmem:[#allocation8 + $0x3e8] ss:$48 sps:$4 sm:$0xff]  }
 0x2b6   :  { %4685 = vmatprep.subr.bf16.mxu1 %v7333_v29  ;;  %v7369_v29 = vld [vmem:[#allocation8 + $0x44c] ss:$48 sps:$4 sm:$0xff]  }
 0x2b7   :  { %4063 = vmatmul.mubr.bf16.gmra.mrb[48].mxu0 %v9032_v48 }
 0x2b8   :  { %4072 = vmatprep.mubr.bf16.mxu0 %v9041_v42  ;;  %4418 = vmatpush1.bf16.msra.mxu0 %v7322_v1  ;;  %v7358_v1 = vld [vmem:[#allocation8 + $0x3e0] ss:$48 sps:$4 sm:$0xff]  }
 0x2b9   :  { %4419 = vmatprep.subr.bf16.mxu0 %v7330_v63  ;;  %4686 = vmatpush1.bf16.msra.mxu1 %v7331_v19  ;;  %v7366_v63 = vld [vmem:[#allocation8 + $0x444] ss:$48 sps:$4 sm:$0xff]   ;;  %v7367_v19 = vld [vmem:[#allocation8 + $0x448] ss:$48 sps:$4 sm:$0xff]  }
 0x2ba   :  { %4687 = vmatprep.subr.bf16.mxu1 %v7339_v54  ;;  %v7375_v54 = vld [vmem:[#allocation8 + $0x4ac] ss:$48 sps:$4 sm:$0xff]  }
 0x2bb   :  { %4339 = vmatmul.mubr.bf16.gmra.mrb[52].mxu1 %v9057_v13 }
 0x2bc   :  { %4420 = vmatpush1.bf16.msra.mxu0 %v7328_v23  ;;  %4348 = vmatprep.mubr.bf16.mxu1 %v9067_v21  ;;  %v7364_v23 = vld [vmem:[#allocation8 + $0x440] ss:$48 sps:$4 sm:$0xff]  }
 0x2bd   :  { %4421 = vmatprep.subr.bf16.mxu0 %v7336_v27  ;;  %4688 = vmatpush1.bf16.msra.mxu1 %v7337_v37  ;;  %v7372_v27 = vld [vmem:[#allocation8 + $0x4a4] ss:$48 sps:$4 sm:$0xff]   ;;  %v7370_v37 = vld [vmem:[#allocation8 + $0x4a0] ss:$48 sps:$4 sm:$0xff]  }
 0x2be   :  { %4689 = vmatprep.subr.bf16.mxu1 %v7345_v24  ;;  %v7378_v24 = vld [vmem:[#allocation8 + $0x504] ss:$48 sps:$4 sm:$0xff]  }
 0x2bf   :  { %4073 = vmatmul.mubr.bf16.gmra.mrb[52].mxu0 %v9057_v13 }
 0x2c0   :  { %4082 = vmatprep.mubr.bf16.mxu0 %v9067_v21  ;;  %4422 = vmatpush1.bf16.msra.mxu0 %v7334_v18  ;;  %v9278_v18 = vld [vmem:[#allocation10] sm:$0xff] }
 0x2c1   :  { %4423 = vmatprep.subr.bf16.mxu0 %v7342_v40  ;;  %4690 = vmatpush1.bf16.msra.mxu1 %v7343_v14  ;;  %10033 = vst [vmem:[#allocation27_spill] sm:$0xff] %v9278_v18  ;;  %v7373_v40 = vld [vmem:[#allocation8 + $0x4a8] ss:$48 sps:$4 sm:$0xff]   ;;  %v10034_v14 = vld [vmem:[#allocation70_spill] sm:$0xff] }
 0x2c2   :  { %4691 = vmatprep.subr.bf16.mxu1 %v7351_v51  ;;  %v10035_v51 = vld [vmem:[#allocation72_spill] sm:$0xff] }
 0x2c3   :  { %4349 = vmatmul.mubr.bf16.gmra.mrb[56].mxu1 %v9072_v57 }
 0x2c4   :  { %4424 = vmatpush1.bf16.msra.mxu0 %v7340_v45  ;;  %4358 = vmatprep.mubr.bf16.mxu1 %v9090_v52  ;;  %v7381_v45 = vld [vmem:[#allocation8 + $0x50c] ss:$48 sps:$4 sm:$0xff]  }
 0x2c5   :  { %4425 = vmatprep.subr.bf16.mxu0 %v7348_v9  ;;  %4692 = vmatpush1.bf16.msra.mxu1 %v7349_v12  ;;  %v9284_v9 = vrot.slane %v9278_v18, %v10034_v14  ;;  %v10036_v12 = vld [vmem:[#allocation69_spill] sm:$0xff] }
 0x2c6   :  { %4693 = vmatprep.subr.bf16.mxu1 %v7357_v28  ;;  %v10037_v28 = vld [vmem:[#allocation71_spill] sm:$0xff] }
 0x2c7   :  { %4083 = vmatmul.mubr.bf16.gmra.mrb[56].mxu0 %v9072_v57 }
 0x2c8   :  { %4092 = vmatprep.mubr.bf16.mxu0 %v9090_v52  ;;  %4426 = vmatpush1.bf16.msra.mxu0 %v7346_v0  ;;  %v9288_v0 = vrot.slane %v9278_v18, %v10035_v51 }
 0x2c9   :  { %4427 = vmatprep.subr.bf16.mxu0 %v7354_v31  ;;  %4694 = vmatpush1.bf16.msra.mxu1 %v7355_v53  ;;  %v9294_v31 = vrot.slane %v9278_v18, %v10036_v12  ;;  %v7376_v53 = vld [vmem:[#allocation8 + $0x500] ss:$48 sps:$4 sm:$0xff]  }
 0x2ca   :  { %4695 = vmatprep.subr.bf16.mxu1 %v7363_v47 }
 0x2cb   :  { %4359 = vmatmul.mubr.bf16.gmra.mrb[60].mxu1 %v9105_v32 }
 0x2cc   :  { %4428 = vmatpush1.bf16.msra.mxu0 %v7352_v46  ;;  %4368 = vmatprep.mubr.bf16.mxu1 %v9114_v3  ;;  %v9298_v46 = vrot.slane %v9278_v18, %v10037_v28  ;;  %v7390_v18 = vld [vmem:[#allocation8 + $0x5c4] ss:$48 sps:$4 sm:$0xff]  }
 0x2cd   :  { %4429 = vmatprep.subr.bf16.mxu0 %v7360_v44  ;;  %4696 = vmatpush1.bf16.msra.mxu1 %v7361_v58  ;;  %v7379_v44 = vld [vmem:[#allocation8 + $0x508] ss:$48 sps:$4 sm:$0xff]   ;;  %v7384_v58 = vld [vmem:[#allocation8 + $0x564] ss:$48 sps:$4 sm:$0xff]  }
 0x2ce   :  { %4697 = vmatprep.subr.bf16.mxu1 %v7369_v29 }
 0x2cf   :  { %4093 = vmatmul.mubr.bf16.gmra.mrb[60].mxu0 %v9105_v32 }
 0x2d0   :  { %4102 = vmatprep.mubr.bf16.mxu0 %v9114_v3  ;;  %4430 = vmatpush1.bf16.msra.mxu0 %v7358_v1 }
 0x2d1   :  { %4431 = vmatprep.subr.bf16.mxu0 %v7366_v63  ;;  %4698 = vmatpush1.bf16.msra.mxu1 %v7367_v19 }
 0x2d2   :  { %4699 = vmatprep.subr.bf16.mxu1 %v7375_v54 }
 0x2d3   :  { %4369 = vmatmul.mubr.bf16.gmra.mrb[64].mxu1 %v9122_v8 }
 0x2d4   :  { %4432 = vmatpush1.bf16.msra.mxu0 %v7364_v23  ;;  %4378 = vmatprep.mubr.bf16.mxu1 %v9132_v36 }
 0x2d5   :  { %4433 = vmatprep.subr.bf16.mxu0 %v7372_v27  ;;  %4700 = vmatpush1.bf16.msra.mxu1 %v7373_v40 }
 0x2d6   :  { %v3778_v1 = vpop.f32.mrb[0].mxu1  ;;  %4701 = vmatprep.subr.bf16.mxu1 %v7381_v45  ;;  %v7382_v45 = vld [vmem:[#allocation8 + $0x560] ss:$48 sps:$4 sm:$0xff]  }
 0x2d7   :  { %4103 = vmatmul.mubr.bf16.gmra.mrb[64].mxu0 %v9122_v8  ;;  %v6464_v29 = vadd.f32 %v3778_v1, %v9288_v0  ;;  %v3780_v19 = vpop.f32.mrb[1].mxu1 }
 0x2d8   :  { %4112 = vmatprep.mubr.bf16.mxu0 %v9132_v36  ;;  %4434 = vmatpush1.bf16.msra.mxu0 %v7370_v37  ;;  %v6465_v54 = vadd.f32 %v3780_v19, %v9298_v46  ;;  %v3782_v37 = vpop.f32.mrb[2].mxu1  ;;  %v7385_v19 = vld [vmem:[#allocation8 + $0x568] ss:$48 sps:$4 sm:$0xff]  }
 0x2d9   :  { %4435 = vmatprep.subr.bf16.mxu0 %v7378_v24  ;;  %v6466_v12 = vadd.f32 %v3782_v37, %v9288_v0  ;;  %v3784_v24 = vpop.f32.mrb[3].mxu1  ;;  %4702 = vmatpush1.bf16.msra.mxu1 %v7379_v44 }
 0x2da   :  { %v3512_v47 = vpop.f32.mrb[0].mxu0  ;;  %v6305_v1 = vpack.c.bf16 %v6465_v54, %v6464_v29  ;;  %v7391_v29 = vld [vmem:[#allocation8 + $0x5c8] ss:$48 sps:$4 sm:$0xff]  }
 0x2db   :  { %v6424_v63 = vadd.f32 %v3512_v47, %v9284_v9  ;;  %v3514_v23 = vpop.f32.mrb[1].mxu0  ;;  %v7387_v47 = vld [vmem:[#allocation8 + $0x56c] ss:$48 sps:$4 sm:$0xff]   ;;  %4379 = vmatmul.mubr.bf16.gmra.mrb[68].mxu1 %v9151_v16 }
 0x2dc   :  { %v6425_v27 = vadd.f32 %v3514_v23, %v9294_v31  ;;  %v3516_v28 = vpop.f32.mrb[2].mxu0  ;;  %4436 = vmatpush1.bf16.msra.mxu0 %v7376_v53  ;;  %v6467_v23 = vadd.f32 %v3784_v24, %v9298_v46  ;;  %5662 = vst [vmem:[#allocation11 + $0x8] sm:$0xff] %v6305_v1  ;;  %4388 = vmatprep.mubr.bf16.mxu1 %v9153_v43 }
 0x2dd   :  { %v6426_v40 = vadd.f32 %v3516_v28, %v9284_v9  ;;  %v3518_v51 = vpop.f32.mrb[3].mxu0  ;;  %4437 = vmatprep.subr.bf16.mxu0 %v7384_v58  ;;  %v7393_v28 = vld [vmem:[#allocation8 + $0x5cc] ss:$48 sps:$4 sm:$0xff]   ;;  %4703 = vmatprep.subr.bf16.mxu1 %v7387_v47 }
 0x2de   :  { %v6304_v14 = vpack.c.bf16 %v6425_v27, %v6424_v63  ;;  %v6427_v36 = vadd.f32 %v3518_v51, %v9294_v31  ;;  %v6311_v44 = vpack.c.bf16 %v6467_v23, %v6466_v12  ;;  %v7388_v51 = vld [vmem:[#allocation8 + $0x5c0] ss:$48 sps:$4 sm:$0xff]   ;;  %v3788_v63 = vpop.f32.mrb[4].mxu1  ;;  %4704 = vmatpush1.bf16.msra.mxu1 %v7385_v19  ;;  %v7396_v23 = vld [vmem:[#allocation8 + $0x624] ss:$48 sps:$4 sm:$0xff]  }
 0x2df   :  { %4113 = vmatmul.mubr.bf16.gmra.mrb[68].mxu0 %v9151_v16  ;;  %v3790_v12 = vpop.f32.mrb[5].mxu1  ;;  %4705 = vmatprep.subr.bf16.mxu1 %v7393_v28  ;;  %v7399_v19 = vld [vmem:[#allocation8 + $0x62c] ss:$48 sps:$4 sm:$0xff]  }
 0x2e0   :  { %5661 = vst [vmem:[#allocation11] sm:$0xff] %v6304_v14  ;;  %v6310_v53 = vpack.c.bf16 %v6427_v36, %v6426_v40  ;;  %4122 = vmatprep.mubr.bf16.mxu0 %v9153_v43  ;;  %4438 = vmatpush1.bf16.msra.mxu0 %v7382_v45  ;;  %5668 = vst [vmem:[#allocation11 + $0x38] sm:$0xff] %v6311_v44  ;;  %v6468_v14 = vadd.f32 %v3788_v63, %v9288_v0  ;;  %v3792_v24 = vpop.f32.mrb[6].mxu1 }
 0x2e1   :  { %4439 = vmatprep.subr.bf16.mxu0 %v7390_v18  ;;  %v6469_v37 = vadd.f32 %v3790_v12, %v9298_v46  ;;  %v6470_v47 = vadd.f32 %v3792_v24, %v9288_v0  ;;  %v3794_v18 = vpop.f32.mrb[7].mxu1 }
 0x2e2   :  { %5667 = vst [vmem:[#allocation11 + $0x30] sm:$0xff] %v6310_v53  ;;  %v3522_v58 = vpop.f32.mrb[4].mxu0  ;;  %v6471_v28 = vadd.f32 %v3794_v18, %v9298_v46  ;;  %4706 = vmatpush1.bf16.msra.mxu1 %v7391_v29 }
 0x2e3   :  { %v6428_v27 = vadd.f32 %v3522_v58, %v9284_v9  ;;  %v3524_v36 = vpop.f32.mrb[5].mxu0  ;;  %v6317_v44 = vpack.c.bf16 %v6469_v37, %v6468_v14  ;;  %4389 = vmatmul.mubr.bf16.gmra.mrb[72].mxu1 %v9162_v49  ;;  %4808 = vmatprep.subr.bf16.mxu1 %v7399_v19 }
 0x2e4   :  { %v6429_v54 = vadd.f32 %v3524_v36, %v9294_v31  ;;  %v3526_v40 = vpop.f32.mrb[6].mxu0  ;;  %4440 = vmatpush1.bf16.msra.mxu0 %v7388_v51  ;;  %v6323_v36 = vpack.c.bf16 %v6471_v28, %v6470_v47  ;;  %4398 = vmatprep.mubr.bf16.mxu1 %v9168_v33 }
 0x2e5   :  { %v6430_v45 = vadd.f32 %v3526_v40, %v9284_v9  ;;  %v3528_v1 = vpop.f32.mrb[7].mxu0  ;;  %5674 = vst [vmem:[#allocation11 + $0x68] sm:$0xff] %v6317_v44  ;;  %4542 = vmatprep.subr.bf16.mxu0 %v7396_v23 }
 0x2e6   :  { %v6316_v53 = vpack.c.bf16 %v6429_v54, %v6428_v27  ;;  %v6431_v58 = vadd.f32 %v3528_v1, %v9294_v31  ;;  %5680 = vst [vmem:[#allocation11 + $0x98] sm:$0xff] %v6323_v36  ;;  %v3798_v27 = vpop.f32.mrb[8].mxu1 }
 0x2e7   :  { %4123 = vmatmul.mubr.bf16.gmra.mrb[72].mxu0 %v9162_v49  ;;  %v6472_v14 = vadd.f32 %v3798_v27, %v9288_v0  ;;  %v3800_v54 = vpop.f32.mrb[9].mxu1 }
 0x2e8   :  { %5673 = vst [vmem:[#allocation11 + $0x60] sm:$0xff] %v6316_v53  ;;  %v6322_v63 = vpack.c.bf16 %v6431_v58, %v6430_v45  ;;  %4132 = vmatprep.mubr.bf16.mxu0 %v9168_v33  ;;  %v6473_v40 = vadd.f32 %v3800_v54, %v9298_v46  ;;  %v3802_v45 = vpop.f32.mrb[10].mxu1 }
 0x2e9   :  { %v6474_v1 = vadd.f32 %v3802_v45, %v9288_v0  ;;  %v3804_v23 = vpop.f32.mrb[11].mxu1  ;;  %v7394_v45 = vld [vmem:[#allocation8 + $0x620] ss:$48 sps:$4 sm:$0xff]  }
 0x2ea   :  { %5679 = vst [vmem:[#allocation11 + $0x90] sm:$0xff] %v6322_v63  ;;  %v3532_v51 = vpop.f32.mrb[8].mxu0  ;;  %v6329_v53 = vpack.c.bf16 %v6473_v40, %v6472_v14  ;;  %v6475_v58 = vadd.f32 %v3804_v23, %v9298_v46 }
 0x2eb   :  { %v6432_v29 = vadd.f32 %v3532_v51, %v9284_v9  ;;  %v3534_v12 = vpop.f32.mrb[9].mxu0  ;;  %4399 = vmatmul.mubr.bf16.gmra.mrb[76].mxu1 %v9174_v35 }
 0x2ec   :  { %v6433_v37 = vadd.f32 %v3534_v12, %v9294_v31  ;;  %v3536_v24 = vpop.f32.mrb[10].mxu0  ;;  %5686 = vst [vmem:[#allocation11 + $0xc8] sm:$0xff] %v6329_v53  ;;  %v6335_v63 = vpack.c.bf16 %v6475_v58, %v6474_v1  ;;  %4707 = vmatprep.mubr.bf16.mxu1 %v10028_v17 }
 0x2ed   :  { %v6434_v47 = vadd.f32 %v3536_v24, %v9284_v9  ;;  %v3538_v18 = vpop.f32.mrb[11].mxu0 }
 0x2ee   :  { %v6328_v19 = vpack.c.bf16 %v6433_v37, %v6432_v29  ;;  %v6435_v44 = vadd.f32 %v3538_v18, %v9294_v31  ;;  %5692 = vst [vmem:[#allocation11 + $0xf8] sm:$0xff] %v6335_v63  ;;  %v3808_v51 = vpop.f32.mrb[12].mxu1  ;;  %v7405_v63 = vld [vmem:[#allocation8 + $0x68c] ss:$48 sps:$4 sm:$0xff]  }
 0x2ef   :  { %4133 = vmatmul.mubr.bf16.gmra.mrb[76].mxu0 %v9174_v35  ;;  %v6476_v29 = vadd.f32 %v3808_v51, %v9288_v0  ;;  %v3810_v12 = vpop.f32.mrb[13].mxu1 }
 0x2f0   :  { %5685 = vst [vmem:[#allocation11 + $0xc0] sm:$0xff] %v6328_v19  ;;  %v6334_v28 = vpack.c.bf16 %v6435_v44, %v6434_v47  ;;  %4441 = vmatprep.mubr.bf16.mxu0 %v10028_v17  ;;  %v6477_v37 = vadd.f32 %v3810_v12, %v9298_v46  ;;  %v3812_v24 = vpop.f32.mrb[14].mxu1  ;;  %v7397_v47 = vld [vmem:[#allocation8 + $0x628] ss:$48 sps:$4 sm:$0xff]  }
 0x2f1   :  { %v6478_v1 = vadd.f32 %v3812_v24, %v9288_v0  ;;  %v3814_v23 = vpop.f32.mrb[15].mxu1  ;;  %v7403_v12 = vld [vmem:[#allocation8 + $0x688] ss:$48 sps:$4 sm:$0xff]  }
 0x2f2   :  { %5691 = vst [vmem:[#allocation11 + $0xf0] sm:$0xff] %v6334_v28  ;;  %v3542_v36 = vpop.f32.mrb[12].mxu0  ;;  %v6341_v53 = vpack.c.bf16 %v6477_v37, %v6476_v29  ;;  %v6479_v58 = vadd.f32 %v3814_v23, %v9298_v46  ;;  %v7402_v28 = vld [vmem:[#allocation8 + $0x684] ss:$48 sps:$4 sm:$0xff]   ;;  %v7411_v29 = vld [vmem:[#allocation8 + $0x6ec] ss:$48 sps:$4 sm:$0xff]  }
 0x2f3   :  { %v6436_v27 = vadd.f32 %v3542_v36, %v9284_v9  ;;  %v3544_v14 = vpop.f32.mrb[13].mxu0  ;;  %4708 = vmatmul.mubr.bf16.vlgmr.msra.gmra.mrb[80].mxu1 %v10029_v41 }
 0x2f4   :  { %v6437_v54 = vadd.f32 %v3544_v14, %v9294_v31  ;;  %v3546_v40 = vpop.f32.mrb[14].mxu0  ;;  %5698 = vst [vmem:[#allocation11 + $0x128] sm:$0xff] %v6341_v53  ;;  %v6347_v51 = vpack.c.bf16 %v6479_v58, %v6478_v1  ;;  %4809 = vmatpush1.bf16.msra.mxu1 %v7397_v47  ;;  %v7400_v14 = vld [vmem:[#allocation8 + $0x680] ss:$48 sps:$4 sm:$0xff]   ;;  %4717 = vmatprep.mubr.bf16.mxu1 %v10030_v7  ;;  %v7409_v58 = vld [vmem:[#allocation8 + $0x6e8] ss:$48 sps:$4 sm:$0xff]  }
 0x2f5   :  { %v6438_v17 = vadd.f32 %v3546_v40, %v9284_v9  ;;  %v3548_v18 = vpop.f32.mrb[15].mxu0  ;;  %4810 = vmatprep.subr.bf16.mxu1 %v7405_v63 }
 0x2f6   :  { %v6340_v19 = vpack.c.bf16 %v6437_v54, %v6436_v27  ;;  %v6439_v44 = vadd.f32 %v3548_v18, %v9294_v31  ;;  %v7408_v27 = vld [vmem:[#allocation8 + $0x6e4] ss:$48 sps:$4 sm:$0xff]   ;;  %5704 = vst [vmem:[#allocation11 + $0x158] sm:$0xff] %v6347_v51  ;;  %v3818_v37 = vpop.f32.mrb[16].mxu1 }
 0x2f7   :  { %4442 = vmatmul.mubr.bf16.vlgmr.msra.gmra.mrb[80].mxu0 %v10029_v41  ;;  %v6480_v40 = vadd.f32 %v3818_v37, %v9288_v0  ;;  %v7417_v37 = vld [vmem:[#allocation8 + $0x74c] ss:$48 sps:$4 sm:$0xff]  }
 0x2f8   :  { %5697 = vst [vmem:[#allocation11 + $0x120] sm:$0xff] %v6340_v19  ;;  %v6346_v36 = vpack.c.bf16 %v6439_v44, %v6438_v17  ;;  %4543 = vmatpush1.bf16.msra.mxu0 %v7394_v45  ;;  %4451 = vmatprep.mubr.bf16.mxu0 %v10030_v7  ;;  %v3820_v45 = vpop.f32.mrb[17].mxu1  ;;  %v7406_v44 = vld [vmem:[#allocation8 + $0x6e0] ss:$48 sps:$4 sm:$0xff]  }
 0x2f9   :  { %4544 = vmatprep.subr.bf16.mxu0 %v7402_v28  ;;  %v6481_v17 = vadd.f32 %v3820_v45, %v9298_v46  ;;  %v3822_v7 = vpop.f32.mrb[18].mxu1  ;;  %4811 = vmatpush1.bf16.msra.mxu1 %v7403_v12 }
 0x2fa   :  { %5703 = vst [vmem:[#allocation11 + $0x150] sm:$0xff] %v6346_v36  ;;  %v3552_v54 = vpop.f32.mrb[16].mxu0  ;;  %v6482_v23 = vadd.f32 %v3822_v7, %v9288_v0  ;;  %v3824_v53 = vpop.f32.mrb[19].mxu1  ;;  %4812 = vmatprep.subr.bf16.mxu1 %v7411_v29  ;;  %v7415_v29 = vld [vmem:[#allocation8 + $0x748] ss:$48 sps:$4 sm:$0xff]  }
 0x2fb   :  { %v6440_v41 = vadd.f32 %v3552_v54, %v9284_v9  ;;  %v3554_v24 = vpop.f32.mrb[17].mxu0  ;;  %v6353_v63 = vpack.c.bf16 %v6481_v17, %v6480_v40  ;;  %v6483_v51 = vadd.f32 %v3824_v53, %v9298_v46  ;;  %v7414_v54 = vld [vmem:[#allocation8 + $0x744] ss:$48 sps:$4 sm:$0xff]   ;;  %4718 = vmatmul.mubr.bf16.gmra.mrb[84].mxu1 %v10031_v4 }
 0x2fc   :  { %v6441_v47 = vadd.f32 %v3554_v24, %v9294_v31  ;;  %v3556_v1 = vpop.f32.mrb[18].mxu0  ;;  %4545 = vmatpush1.bf16.msra.mxu0 %v7400_v14  ;;  %4727 = vmatprep.mubr.bf16.mxu1 %v10032_v59  ;;  %v7420_v24 = vld [vmem:[#allocation8 + $0x7a4] ss:$48 sps:$4 sm:$0xff]  }
 0x2fd   :  { %v6442_v18 = vadd.f32 %v3556_v1, %v9284_v9  ;;  %v3558_v19 = vpop.f32.mrb[19].mxu0  ;;  %4546 = vmatprep.subr.bf16.mxu0 %v7408_v27  ;;  %5710 = vst [vmem:[#allocation11 + $0x188] sm:$0xff] %v6353_v63  ;;  %v6359_v12 = vpack.c.bf16 %v6483_v51, %v6482_v23  ;;  %4813 = vmatpush1.bf16.msra.mxu1 %v7409_v58  ;;  %v7412_v27 = vld [vmem:[#allocation8 + $0x740] ss:$48 sps:$4 sm:$0xff]  }
 0x2fe   :  { %v6352_v28 = vpack.c.bf16 %v6441_v47, %v6440_v41  ;;  %v6443_v36 = vadd.f32 %v3558_v19, %v9294_v31  ;;  %v3828_v40 = vpop.f32.mrb[20].mxu1  ;;  %4814 = vmatprep.subr.bf16.mxu1 %v7417_v37  ;;  %v7418_v58 = vld [vmem:[#allocation8 + $0x7a0] ss:$48 sps:$4 sm:$0xff]   ;;  %v7421_v37 = vld [vmem:[#allocation8 + $0x7a8] ss:$48 sps:$4 sm:$0xff]  }
 0x2ff   :  { %4452 = vmatmul.mubr.bf16.gmra.mrb[84].mxu0 %v10031_v4  ;;  %5716 = vst [vmem:[#allocation11 + $0x1b8] sm:$0xff] %v6359_v12  ;;  %v6484_v45 = vadd.f32 %v3828_v40, %v9288_v0  ;;  %v3830_v17 = vpop.f32.mrb[21].mxu1  ;;  %v7429_v12 = vld [vmem:[#allocation8 + $0x80c] ss:$48 sps:$4 sm:$0xff]  }
 0x300   :  { %5709 = vst [vmem:[#allocation11 + $0x180] sm:$0xff] %v6352_v28  ;;  %v6358_v14 = vpack.c.bf16 %v6443_v36, %v6442_v18  ;;  %4461 = vmatprep.mubr.bf16.mxu0 %v10032_v59  ;;  %4547 = vmatpush1.bf16.msra.mxu0 %v7406_v44  ;;  %v6485_v59 = vadd.f32 %v3830_v17, %v9298_v46  ;;  %v3832_v18 = vpop.f32.mrb[22].mxu1  ;;  %v7423_v28 = vld [vmem:[#allocation8 + $0x7ac] ss:$48 sps:$4 sm:$0xff]  }
 0x301   :  { %4548 = vmatprep.subr.bf16.mxu0 %v7414_v54  ;;  %v6486_v19 = vadd.f32 %v3832_v18, %v9288_v0  ;;  %v3834_v44 = vpop.f32.mrb[23].mxu1  ;;  %4815 = vmatpush1.bf16.msra.mxu1 %v7415_v29 }
 0x302   :  { %5715 = vst [vmem:[#allocation11 + $0x1b0] sm:$0xff] %v6358_v14  ;;  %v3562_v41 = vpop.f32.mrb[20].mxu0  ;;  %v6365_v36 = vpack.c.bf16 %v6485_v59, %v6484_v45  ;;  %v6487_v54 = vadd.f32 %v3834_v44, %v9298_v46  ;;  %v7426_v14 = vld [vmem:[#allocation8 + $0x804] ss:$48 sps:$4 sm:$0xff]   ;;  %4816 = vmatprep.subr.bf16.mxu1 %v7423_v28 }
 0x303   :  { %v6444_v4 = vadd.f32 %v3562_v41, %v9284_v9  ;;  %v3564_v47 = vpop.f32.mrb[21].mxu0  ;;  %4728 = vmatmul.mubr.bf16.gmra.mrb[88].mxu1 %v8798_v56  ;;  %v7424_v41 = vld [vmem:[#allocation8 + $0x800] ss:$48 sps:$4 sm:$0xff]   ;;  %v7432_v44 = vld [vmem:[#allocation8 + $0x864] ss:$48 sps:$4 sm:$0xff]  }
 0x304   :  { %v6445_v1 = vadd.f32 %v3564_v47, %v9294_v31  ;;  %v3566_v7 = vpop.f32.mrb[22].mxu0  ;;  %4549 = vmatpush1.bf16.msra.mxu0 %v7412_v27  ;;  %5722 = vst [vmem:[#allocation11 + $0x1e8] sm:$0xff] %v6365_v36  ;;  %v6371_v29 = vpack.c.bf16 %v6487_v54, %v6486_v19  ;;  %4737 = vmatprep.mubr.bf16.mxu1 %v8830_v38  ;;  %v7430_v54 = vld [vmem:[#allocation8 + $0x860] ss:$48 sps:$4 sm:$0xff]  }
 0x305   :  { %v6446_v23 = vadd.f32 %v3566_v7, %v9284_v9  ;;  %v3568_v53 = vpop.f32.mrb[23].mxu0  ;;  %4550 = vmatprep.subr.bf16.mxu0 %v7420_v24  ;;  %4817 = vmatpush1.bf16.msra.mxu1 %v7421_v37  ;;  %v7433_v37 = vld [vmem:[#allocation8 + $0x868] ss:$48 sps:$4 sm:$0xff]  }
 0x306   :  { %v6364_v63 = vpack.c.bf16 %v6445_v1, %v6444_v4  ;;  %v6447_v51 = vadd.f32 %v3568_v53, %v9294_v31  ;;  %5728 = vst [vmem:[#allocation11 + $0x218] sm:$0xff] %v6371_v29  ;;  %v3838_v24 = vpop.f32.mrb[24].mxu1  ;;  %v7427_v4 = vld [vmem:[#allocation8 + $0x808] ss:$48 sps:$4 sm:$0xff]   ;;  %4818 = vmatprep.subr.bf16.mxu1 %v7429_v12  ;;  %v7441_v12 = vld [vmem:[#allocation8 + $0x8cc] ss:$48 sps:$4 sm:$0xff]  }
 0x307   :  { %4462 = vmatmul.mubr.bf16.gmra.mrb[88].mxu0 %v8798_v56  ;;  %v6488_v45 = vadd.f32 %v3838_v24, %v9288_v0  ;;  %v3840_v17 = vpop.f32.mrb[25].mxu1  ;;  %v7436_v24 = vld [vmem:[#allocation8 + $0x8c0] ss:$48 sps:$4 sm:$0xff]  }
 0x308   :  { %5721 = vst [vmem:[#allocation11 + $0x1e0] sm:$0xff] %v6364_v63  ;;  %v6370_v27 = vpack.c.bf16 %v6447_v51, %v6446_v23  ;;  %4471 = vmatprep.mubr.bf16.mxu0 %v8830_v38  ;;  %4551 = vmatpush1.bf16.msra.mxu0 %v7418_v58  ;;  %v6489_v38 = vadd.f32 %v3840_v17, %v9298_v46  ;;  %v3842_v7 = vpop.f32.mrb[26].mxu1  ;;  %v7435_v58 = vld [vmem:[#allocation8 + $0x86c] ss:$48 sps:$4 sm:$0xff]  }
 0x309   :  { %4552 = vmatprep.subr.bf16.mxu0 %v7426_v14  ;;  %v6490_v23 = vadd.f32 %v3842_v7, %v9288_v0  ;;  %v3844_v53 = vpop.f32.mrb[27].mxu1  ;;  %4819 = vmatpush1.bf16.msra.mxu1 %v7427_v4  ;;  %v7438_v14 = vld [vmem:[#allocation8 + $0x8c4] ss:$48 sps:$4 sm:$0xff]  }
 0x30a   :  { %5727 = vst [vmem:[#allocation11 + $0x210] sm:$0xff] %v6370_v27  ;;  %v3572_v40 = vpop.f32.mrb[24].mxu0  ;;  %v6377_v63 = vpack.c.bf16 %v6489_v38, %v6488_v45  ;;  %v6491_v51 = vadd.f32 %v3844_v53, %v9298_v46  ;;  %4820 = vmatprep.subr.bf16.mxu1 %v7435_v58 }
 0x30b   :  { %v6448_v56 = vadd.f32 %v3572_v40, %v9284_v9  ;;  %v3574_v47 = vpop.f32.mrb[25].mxu0  ;;  %4738 = vmatmul.mubr.bf16.gmra.mrb[92].mxu1 %v8832_v61 }
 0x30c   :  { %v6449_v1 = vadd.f32 %v3574_v47, %v9294_v31  ;;  %v3576_v59 = vpop.f32.mrb[26].mxu0  ;;  %4553 = vmatpush1.bf16.msra.mxu0 %v7424_v41  ;;  %5734 = vst [vmem:[#allocation11 + $0x248] sm:$0xff] %v6377_v63  ;;  %v6383_v29 = vpack.c.bf16 %v6491_v51, %v6490_v23  ;;  %4747 = vmatprep.mubr.bf16.mxu1 %v8870_v34  ;;  %v7439_v23 = vld [vmem:[#allocation8 + $0x8c8] ss:$48 sps:$4 sm:$0xff]   ;;  %v7442_v63 = vld [vmem:[#allocation8 + $0x920] ss:$48 sps:$4 sm:$0xff]  }
 0x30d   :  { %v6450_v18 = vadd.f32 %v3576_v59, %v9284_v9  ;;  %v3578_v19 = vpop.f32.mrb[27].mxu0  ;;  %4554 = vmatprep.subr.bf16.mxu0 %v7432_v44  ;;  %4821 = vmatpush1.bf16.msra.mxu1 %v7433_v37  ;;  %v7450_v51 = vld [vmem:[#allocation8 + $0x984] ss:$48 sps:$4 sm:$0xff]  }
 0x30e   :  { %v6376_v28 = vpack.c.bf16 %v6449_v1, %v6448_v56  ;;  %v6451_v36 = vadd.f32 %v3578_v19, %v9294_v31  ;;  %5740 = vst [vmem:[#allocation11 + $0x278] sm:$0xff] %v6383_v29  ;;  %v3848_v40 = vpop.f32.mrb[28].mxu1  ;;  %4822 = vmatprep.subr.bf16.mxu1 %v7441_v12  ;;  %v7444_v19 = vld [vmem:[#allocation8 + $0x924] ss:$48 sps:$4 sm:$0xff]   ;;  %v7453_v29 = vld [vmem:[#allocation8 + $0x98c] ss:$48 sps:$4 sm:$0xff]  }
 0x30f   :  { %4472 = vmatmul.mubr.bf16.gmra.mrb[92].mxu0 %v8832_v61  ;;  %v6492_v4 = vadd.f32 %v3848_v40, %v9288_v0  ;;  %v3850_v45 = vpop.f32.mrb[29].mxu1 }
 0x310   :  { %5733 = vst [vmem:[#allocation11 + $0x240] sm:$0xff] %v6376_v28  ;;  %v6382_v27 = vpack.c.bf16 %v6451_v36, %v6450_v18  ;;  %4481 = vmatprep.mubr.bf16.mxu0 %v8870_v34  ;;  %4555 = vmatpush1.bf16.msra.mxu0 %v7430_v54  ;;  %v6493_v34 = vadd.f32 %v3850_v45, %v9298_v46  ;;  %v3852_v1 = vpop.f32.mrb[30].mxu1  ;;  %v7447_v36 = vld [vmem:[#allocation8 + $0x92c] ss:$48 sps:$4 sm:$0xff]  }
 0x311   :  { %4556 = vmatprep.subr.bf16.mxu0 %v7438_v14  ;;  %v6494_v59 = vadd.f32 %v3852_v1, %v9288_v0  ;;  %v3854_v18 = vpop.f32.mrb[31].mxu1  ;;  %4823 = vmatpush1.bf16.msra.mxu1 %v7439_v23  ;;  %v7445_v14 = vld [vmem:[#allocation8 + $0x928] ss:$48 sps:$4 sm:$0xff]   ;;  %v7448_v1 = vld [vmem:[#allocation8 + $0x980] ss:$48 sps:$4 sm:$0xff]  }
 0x312   :  { %5739 = vst [vmem:[#allocation11 + $0x270] sm:$0xff] %v6382_v27  ;;  %v3582_v41 = vpop.f32.mrb[28].mxu0  ;;  %v6389_v44 = vpack.c.bf16 %v6493_v34, %v6492_v4  ;;  %v6495_v28 = vadd.f32 %v3854_v18, %v9298_v46  ;;  %4824 = vmatprep.subr.bf16.mxu1 %v7447_v36 }
 0x313   :  { %v6452_v61 = vadd.f32 %v3582_v41, %v9284_v9  ;;  %v3584_v56 = vpop.f32.mrb[29].mxu0  ;;  %4748 = vmatmul.mubr.bf16.gmra.mrb[96].mxu1 %v8873_v30 }
 0x314   :  { %v6453_v47 = vadd.f32 %v3584_v56, %v9294_v31  ;;  %v3586_v17 = vpop.f32.mrb[30].mxu0  ;;  %4557 = vmatpush1.bf16.msra.mxu0 %v7436_v24  ;;  %5746 = vst [vmem:[#allocation11 + $0x2a8] sm:$0xff] %v6389_v44  ;;  %v6395_v37 = vpack.c.bf16 %v6495_v28, %v6494_v59  ;;  %4757 = vmatprep.mubr.bf16.mxu1 %v8896_v39  ;;  %v7454_v28 = vld [vmem:[#allocation8 + $0x9e0] ss:$48 sps:$4 sm:$0xff]  }
 0x315   :  { %v6454_v38 = vadd.f32 %v3586_v17, %v9284_v9  ;;  %v3588_v7 = vpop.f32.mrb[31].mxu0  ;;  %4558 = vmatprep.subr.bf16.mxu0 %v7444_v19  ;;  %4825 = vmatpush1.bf16.msra.mxu1 %v7445_v14  ;;  %v7456_v19 = vld [vmem:[#allocation8 + $0x9e4] ss:$48 sps:$4 sm:$0xff]  }
 0x316   :  { %v6388_v53 = vpack.c.bf16 %v6453_v47, %v6452_v61  ;;  %v6455_v58 = vadd.f32 %v3588_v7, %v9294_v31  ;;  %5752 = vst [vmem:[#allocation11 + $0x2d8] sm:$0xff] %v6395_v37  ;;  %v3858_v27 = vpop.f32.mrb[32].mxu1  ;;  %4826 = vmatprep.subr.bf16.mxu1 %v7453_v29 }
 0x317   :  { %4482 = vmatmul.mubr.bf16.gmra.mrb[96].mxu0 %v8873_v30  ;;  %v6496_v41 = vadd.f32 %v3858_v27, %v9288_v0  ;;  %v3860_v24 = vpop.f32.mrb[33].mxu1 }
 0x318   :  { %5745 = vst [vmem:[#allocation11 + $0x2a0] sm:$0xff] %v6388_v53  ;;  %v6394_v54 = vpack.c.bf16 %v6455_v58, %v6454_v38  ;;  %4491 = vmatprep.mubr.bf16.mxu0 %v8896_v39  ;;  %4559 = vmatpush1.bf16.msra.mxu0 %v7442_v63  ;;  %v6497_v39 = vadd.f32 %v3860_v24, %v9298_v46  ;;  %v3862_v56 = vpop.f32.mrb[34].mxu1  ;;  %v7451_v38 = vld [vmem:[#allocation8 + $0x988] ss:$48 sps:$4 sm:$0xff]   ;;  %v7459_v53 = vld [vmem:[#allocation8 + $0x9ec] ss:$48 sps:$4 sm:$0xff]  }
 0x319   :  { %4560 = vmatprep.subr.bf16.mxu0 %v7450_v51  ;;  %v6498_v47 = vadd.f32 %v3862_v56, %v9288_v0  ;;  %v3864_v17 = vpop.f32.mrb[35].mxu1  ;;  %4827 = vmatpush1.bf16.msra.mxu1 %v7451_v38  ;;  %v7457_v63 = vld [vmem:[#allocation8 + $0x9e8] ss:$48 sps:$4 sm:$0xff]  }
 0x31a   :  { %5751 = vst [vmem:[#allocation11 + $0x2d0] sm:$0xff] %v6394_v54  ;;  %v3592_v12 = vpop.f32.mrb[32].mxu0  ;;  %v6401_v7 = vpack.c.bf16 %v6497_v39, %v6496_v41  ;;  %v6499_v23 = vadd.f32 %v3864_v17, %v9298_v46  ;;  %4828 = vmatprep.subr.bf16.mxu1 %v7459_v53  ;;  %v7462_v54 = vld [vmem:[#allocation8 + $0xa44] ss:$48 sps:$4 sm:$0xff]   ;;  %v7460_v39 = vld [vmem:[#allocation8 + $0xa40] ss:$48 sps:$4 sm:$0xff]  }
 0x31b   :  { %v6456_v30 = vadd.f32 %v3592_v12, %v9284_v9  ;;  %v3594_v40 = vpop.f32.mrb[33].mxu0  ;;  %4758 = vmatmul.mubr.bf16.gmra.mrb[100].mxu1 %v8903_v6  ;;  %v7463_v17 = vld [vmem:[#allocation8 + $0xa48] ss:$48 sps:$4 sm:$0xff]  }
 0x31c   :  { %v6457_v61 = vadd.f32 %v3594_v40, %v9294_v31  ;;  %v3596_v4 = vpop.f32.mrb[34].mxu0  ;;  %5758 = vst [vmem:[#allocation11 + $0x308] sm:$0xff] %v6401_v7  ;;  %v6407_v58 = vpack.c.bf16 %v6499_v23, %v6498_v47  ;;  %4767 = vmatprep.mubr.bf16.mxu1 %v8927_v62  ;;  %4561 = vmatpush1.bf16.msra.mxu0 %v7448_v1  ;;  %v7468_v1 = vld [vmem:[#allocation8 + $0xaa4] ss:$48 sps:$4 sm:$0xff]   ;;  %v7477_v7 = vld [vmem:[#allocation8 + $0xb0c] ss:$48 sps:$4 sm:$0xff]  }
 0x31d   :  { %v6458_v45 = vadd.f32 %v3596_v4, %v9284_v9  ;;  %v3598_v34 = vpop.f32.mrb[35].mxu0  ;;  %4562 = vmatprep.subr.bf16.mxu0 %v7456_v19  ;;  %4829 = vmatpush1.bf16.msra.mxu1 %v7457_v63  ;;  %v7465_v4 = vld [vmem:[#allocation8 + $0xa4c] ss:$48 sps:$4 sm:$0xff]   ;;  %v7480_v23 = vld [vmem:[#allocation8 + $0xb64] ss:$48 sps:$4 sm:$0xff]  }
 0x31e   :  { %v6400_v59 = vpack.c.bf16 %v6457_v61, %v6456_v30  ;;  %v6459_v18 = vadd.f32 %v3598_v34, %v9294_v31  ;;  %5764 = vst [vmem:[#allocation11 + $0x338] sm:$0xff] %v6407_v58  ;;  %v3868_v51 = vpop.f32.mrb[36].mxu1  ;;  %4830 = vmatprep.subr.bf16.mxu1 %v7465_v4  ;;  %v7478_v19 = vld [vmem:[#allocation8 + $0xb60] ss:$48 sps:$4 sm:$0xff]   ;;  %v7481_v53 = vld [vmem:[#allocation8 + $0xb68] ss:$48 sps:$4 sm:$0xff]  }
 0x31f   :  { %4492 = vmatmul.mubr.bf16.gmra.mrb[100].mxu0 %v8903_v6  ;;  %v6500_v37 = vadd.f32 %v3868_v51, %v9288_v0  ;;  %v3870_v12 = vpop.f32.mrb[37].mxu1  ;;  %v7484_v58 = vld [vmem:[#allocation8 + $0xbc0] ss:$48 sps:$4 sm:$0xff]   ;;  %v7487_v63 = vld [vmem:[#allocation8 + $0xbc8] ss:$48 sps:$4 sm:$0xff]  }
 0x320   :  { %5757 = vst [vmem:[#allocation11 + $0x300] sm:$0xff] %v6400_v59  ;;  %v6406_v44 = vpack.c.bf16 %v6459_v18, %v6458_v45  ;;  %4501 = vmatprep.mubr.bf16.mxu0 %v8927_v62  ;;  %v6501_v62 = vadd.f32 %v3870_v12, %v9298_v46  ;;  %v3872_v30 = vpop.f32.mrb[38].mxu1  ;;  %4563 = vmatpush1.bf16.msra.mxu0 %v7454_v28  ;;  %v7474_v59 = vld [vmem:[#allocation8 + $0xb04] ss:$48 sps:$4 sm:$0xff]   ;;  %v7475_v18 = vld [vmem:[#allocation8 + $0xb08] ss:$48 sps:$4 sm:$0xff]  }
 0x321   :  { %v6502_v40 = vadd.f32 %v3872_v30, %v9288_v0  ;;  %v3874_v61 = vpop.f32.mrb[39].mxu1  ;;  %4564 = vmatprep.subr.bf16.mxu0 %v7462_v54  ;;  %4831 = vmatpush1.bf16.msra.mxu1 %v7463_v17  ;;  %v7489_v28 = vld [vmem:[#allocation8 + $0xbcc] ss:$48 sps:$4 sm:$0xff]  }
 0x322   :  { %5763 = vst [vmem:[#allocation11 + $0x330] sm:$0xff] %v6406_v44  ;;  %v3602_v36 = vpop.f32.mrb[36].mxu0  ;;  %v6413_v45 = vpack.c.bf16 %v6501_v62, %v6500_v37  ;;  %v6503_v34 = vadd.f32 %v3874_v61, %v9298_v46  ;;  %v7469_v46 = vld [vmem:[#allocation8 + $0xaa8] ss:$48 sps:$4 sm:$0xff]   ;;  %v7486_v44 = vld [vmem:[#allocation8 + $0xbc4] ss:$48 sps:$4 sm:$0xff]  }
 0x323   :  { %v6460_v6 = vadd.f32 %v3602_v36, %v9284_v9  ;;  %v3604_v14 = vpop.f32.mrb[37].mxu0  ;;  %4768 = vmatmul.mubr.bf16.gmra.mrb[104].mxu1 %v8934_v5 }
 0x324   :  { %v6461_v27 = vadd.f32 %v3604_v14, %v9294_v31  ;;  %v3606_v29 = vpop.f32.mrb[38].mxu0  ;;  %5770 = vst [vmem:[#allocation11 + $0x368] sm:$0xff] %v6413_v45  ;;  %v6419_v38 = vpack.c.bf16 %v6503_v34, %v6502_v40  ;;  %4777 = vmatprep.mubr.bf16.mxu1 %v8957_v10  ;;  %4565 = vmatpush1.bf16.msra.mxu0 %v7460_v39 }
 0x325   :  { %v6462_v41 = vadd.f32 %v3606_v29, %v9284_v9  ;;  %v3608_v24 = vpop.f32.mrb[39].mxu0  ;;  %v7471_v9 = vld [vmem:[#allocation8 + $0xaac] ss:$48 sps:$4 sm:$0xff]   ;;  %4566 = vmatprep.subr.bf16.mxu0 %v7468_v1 }
 0x326   :  { %v6412_v56 = vpack.c.bf16 %v6461_v27, %v6460_v6  ;;  %v6463_v47 = vadd.f32 %v3608_v24, %v9294_v31  ;;  %v7466_v31 = vld [vmem:[#allocation8 + $0xaa0] ss:$48 sps:$4 sm:$0xff]   ;;  %5776 = vst [vmem:[#allocation11 + $0x398] sm:$0x77] %v6419_v38  ;;  %4832 = vmatprep.subr.bf16.mxu1 %v7471_v9 }
 0x327   :  { %4502 = vmatmul.mubr.bf16.gmra.mrb[104].mxu0 %v8934_v5  ;;  %v7472_v5 = vld [vmem:[#allocation8 + $0xb00] ss:$48 sps:$4 sm:$0xff]   ;;  %4833 = vmatpush1.bf16.msra.mxu1 %v7469_v46 }
 0x328   :  { %5769 = vst [vmem:[#allocation11 + $0x360] sm:$0xff] %v6412_v56  ;;  %v6418_v0 = vpack.c.bf16 %v6463_v47, %v6462_v41  ;;  %4511 = vmatprep.mubr.bf16.mxu0 %v8957_v10  ;;  %4567 = vmatpush1.bf16.msra.mxu0 %v7466_v31  ;;  %v7483_v10 = vld [vmem:[#allocation8 + $0xb6c] ss:$48 sps:$4 sm:$0xff]  }
 0x329   :  { %4568 = vmatprep.subr.bf16.mxu0 %v7474_v59  ;;  %4834 = vmatprep.subr.bf16.mxu1 %v7477_v7 }
 0x32a   :  { %5775 = vst [vmem:[#allocation11 + $0x390] sm:$0x77] %v6418_v0 }
 0x32b   :  { %4778 = vmatmul.mubr.bf16.gmra.mrb[108].mxu1 %v8963_v15 }
 0x32c   :  { %4787 = vmatprep.mubr.bf16.mxu1 %v8982_v55  ;;  %4569 = vmatpush1.bf16.msra.mxu0 %v7472_v5 }
 0x32d   :  { %4835 = vmatpush1.bf16.msra.mxu1 %v7475_v18  ;;  %4570 = vmatprep.subr.bf16.mxu0 %v7480_v23 }
 0x32e   :  { %4836 = vmatprep.subr.bf16.mxu1 %v7483_v10 }
 0x32f   :  { %4512 = vmatmul.mubr.bf16.gmra.mrb[108].mxu0 %v8963_v15 }
 0x330   :  { %4521 = vmatprep.mubr.bf16.mxu0 %v8982_v55  ;;  %4571 = vmatpush1.bf16.msra.mxu0 %v7478_v19 }
 0x331   :  { %4837 = vmatpush1.bf16.msra.mxu1 %v7481_v53  ;;  %4572 = vmatprep.subr.bf16.mxu0 %v7486_v44 }
 0x332   :  { %4838 = vmatprep.subr.bf16.mxu1 %v7489_v28 }
 0x333   :  { %4788 = vmatmul.mubr.bf16.gmra.mrb[112].mxu1 %v8987_v11 }
 0x334   :  { %4797 = vmatprep.mubr.bf16.mxu1 %v9009_v50  ;;  %4573 = vmatpush1.bf16.msra.mxu0 %v7484_v58 }
 0x335   :  { %4839 = vmatpush1.bf16.msra.mxu1 %v7487_v63 }
 0x337   :  { %4522 = vmatmul.mubr.bf16.gmra.mrb[112].mxu0 %v8987_v11 }
 0x338   :  { %4531 = vmatprep.mubr.bf16.mxu0 %v9009_v50  ;;  %v10039_v50 = vld [vmem:[#allocation27_spill] sm:$0xff] }
 0x33b   :  { %4798 = vmatmul.mubr.bf16.gmra.mrb[116].mxu1 %v9016_v60 }
 0x33c   :  { %4840 = vmatprep.mubr.bf16.mxu1 %v10024_v22 }
 0x33f   :  { %4532 = vmatmul.mubr.bf16.gmra.mrb[116].mxu0 %v9016_v60 }
 0x340   :  { %4574 = vmatprep.mubr.bf16.mxu0 %v10024_v22 }
 0x343   :  { %4841 = vmatmul.mubr.bf16.vlgmr.msra.gmra.mrb[80].mxu1 %v10027_v26 }
 0x344   :  { %4850 = vmatprep.mubr.bf16.mxu1 %v8826_v2 }
 0x347   :  { %4575 = vmatmul.mubr.bf16.vlgmr.msra.gmra.mrb[80].mxu0 %v10027_v26 }
 0x348   :  { %4584 = vmatprep.mubr.bf16.mxu0 %v8826_v2  ;;  %v10038_v2 = vld [vmem:[#allocation68_spill] sm:$0xff] }
 0x349   :  { %v1391_v15 = vsub.s32 6, %v10038_v2  ;;  %v1387_v55 = vsub.s32 5, %v10038_v2  ;;  %v1395_v11 = vsub.s32 7, %v10038_v2 }
 0x34b   :  { %4851 = vmatmul.mubr.bf16.gmra.mrb[84].mxu1 %v8953_v25 }
 0x34c   :  { %4860 = vmatprep.mubr.bf16.mxu1 %v9018_v20 }
 0x34f   :  { %4585 = vmatmul.mubr.bf16.gmra.mrb[84].mxu0 %v8953_v25  ;;  %v1383_v25 = vsub.s32 4, %v10038_v2 }
 0x350   :  { %4594 = vmatprep.mubr.bf16.mxu0 %v9018_v20  ;;  %v9466_v20 = vrot.slane %v10039_v50, %v1391_v15 }
 0x351   :  { %v9463_v60 = vrot.slane %v10039_v50, %v1383_v25 }
 0x353   :  { %4861 = vmatmul.mubr.bf16.gmra.mrb[88].mxu1 %v9032_v48 }
 0x354   :  { %4870 = vmatprep.mubr.bf16.mxu1 %v9041_v42 }
 0x357   :  { %4595 = vmatmul.mubr.bf16.gmra.mrb[88].mxu0 %v9032_v48  ;;  %v10040_v48 = vld [vmem:[#allocation28_spill] sm:$0xff] }
 0x358   :  { %4604 = vmatprep.mubr.bf16.mxu0 %v9041_v42  ;;  %v9471_v42 = vrot.slane %v10039_v50, %v1387_v55 }
 0x35b   :  { %4871 = vmatmul.mubr.bf16.gmra.mrb[92].mxu1 %v9057_v13 }
 0x35c   :  { %4880 = vmatprep.mubr.bf16.mxu1 %v9067_v21 }
 0x35f   :  { %4605 = vmatmul.mubr.bf16.gmra.mrb[92].mxu0 %v9057_v13  ;;  %v9474_v13 = vrot.slane %v10039_v50, %v1395_v11 }
 0x360   :  { %4614 = vmatprep.mubr.bf16.mxu0 %v9067_v21 }
 0x363   :  { %4881 = vmatmul.mubr.bf16.gmra.mrb[96].mxu1 %v9072_v57 }
 0x364   :  { %4890 = vmatprep.mubr.bf16.mxu1 %v9090_v52 }
 0x367   :  { %4615 = vmatmul.mubr.bf16.gmra.mrb[96].mxu0 %v9072_v57 }
 0x368   :  { %4624 = vmatprep.mubr.bf16.mxu0 %v9090_v52 }
 0x36b   :  { %4891 = vmatmul.mubr.bf16.gmra.mrb[100].mxu1 %v9105_v32 }
 0x36c   :  { %4900 = vmatprep.mubr.bf16.mxu1 %v9114_v3 }
 0x36f   :  { %4625 = vmatmul.mubr.bf16.gmra.mrb[100].mxu0 %v9105_v32 }
 0x370   :  { %4634 = vmatprep.mubr.bf16.mxu0 %v9114_v3 }
 0x373   :  { %4901 = vmatmul.mubr.bf16.gmra.mrb[104].mxu1 %v9122_v8 }
 0x374   :  { %4910 = vmatprep.mubr.bf16.mxu1 %v10040_v48 }
 0x376   :  { %v4310_v57 = vpop.f32.mrb[40].mxu1 }
 0x377   :  { %4635 = vmatmul.mubr.bf16.gmra.mrb[104].mxu0 %v9122_v8  ;;  %v6544_v32 = vadd.f32 %v4310_v57, %v9466_v20  ;;  %v4312_v8 = vpop.f32.mrb[41].mxu1 }
 0x378   :  { %4644 = vmatprep.mubr.bf16.mxu0 %v10040_v48  ;;  %v6545_v26 = vadd.f32 %v4312_v8, %v9474_v13  ;;  %v4314_v51 = vpop.f32.mrb[42].mxu1 }
 0x379   :  { %v6546_v6 = vadd.f32 %v4314_v51, %v9466_v20  ;;  %v4316_v14 = vpop.f32.mrb[43].mxu1 }
 0x37a   :  { %v4044_v21 = vpop.f32.mrb[40].mxu0  ;;  %v6307_v27 = vpack.c.bf16 %v6545_v26, %v6544_v32  ;;  %v6547_v29 = vadd.f32 %v4316_v14, %v9474_v13 }
 0x37b   :  { %v6504_v52 = vadd.f32 %v4044_v21, %v9463_v60  ;;  %v4046_v3 = vpop.f32.mrb[41].mxu0  ;;  %4911 = vmatmul.mubr.bf16.gmra.mrb[108].mxu1 %v9151_v16 }
 0x37c   :  { %v6505_v22 = vadd.f32 %v4046_v3, %v9471_v42  ;;  %v4048_v36 = vpop.f32.mrb[42].mxu0  ;;  %5664 = vst [vmem:[#allocation11 + $0x18] sm:$0xff] %v6307_v27  ;;  %v6313_v41 = vpack.c.bf16 %v6547_v29, %v6546_v6  ;;  %4920 = vmatprep.mubr.bf16.mxu1 %v9153_v43 }
 0x37d   :  { %v6506_v54 = vadd.f32 %v4048_v36, %v9463_v60  ;;  %v4050_v37 = vpop.f32.mrb[43].mxu0 }
 0x37e   :  { %v6306_v12 = vpack.c.bf16 %v6505_v22, %v6504_v52  ;;  %v6507_v62 = vadd.f32 %v4050_v37, %v9471_v42  ;;  %5670 = vst [vmem:[#allocation11 + $0x48] sm:$0xff] %v6313_v41  ;;  %v4320_v24 = vpop.f32.mrb[44].mxu1 }
 0x37f   :  { %4645 = vmatmul.mubr.bf16.gmra.mrb[108].mxu0 %v9151_v16  ;;  %v6548_v39 = vadd.f32 %v4320_v24, %v9466_v20  ;;  %v4322_v56 = vpop.f32.mrb[45].mxu1 }
 0x380   :  { %5663 = vst [vmem:[#allocation11 + $0x10] sm:$0xff] %v6306_v12  ;;  %v6312_v30 = vpack.c.bf16 %v6507_v62, %v6506_v54  ;;  %4654 = vmatprep.mubr.bf16.mxu0 %v9153_v43  ;;  %v6549_v45 = vadd.f32 %v4322_v56, %v9474_v13  ;;  %v4324_v34 = vpop.f32.mrb[46].mxu1 }
 0x381   :  { %v6550_v43 = vadd.f32 %v4324_v34, %v9466_v20  ;;  %v4326_v9 = vpop.f32.mrb[47].mxu1 }
 0x382   :  { %5669 = vst [vmem:[#allocation11 + $0x40] sm:$0xff] %v6312_v30  ;;  %v4054_v40 = vpop.f32.mrb[44].mxu0  ;;  %v6319_v38 = vpack.c.bf16 %v6549_v45, %v6548_v39  ;;  %v6551_v46 = vadd.f32 %v4326_v9, %v9474_v13 }
 0x383   :  { %v6508_v61 = vadd.f32 %v4054_v40, %v9463_v60  ;;  %v4056_v4 = vpop.f32.mrb[45].mxu0  ;;  %4921 = vmatmul.mubr.bf16.gmra.mrb[112].mxu1 %v9162_v49 }
 0x384   :  { %v6509_v16 = vadd.f32 %v4056_v4, %v9471_v42  ;;  %v4058_v47 = vpop.f32.mrb[46].mxu0  ;;  %5676 = vst [vmem:[#allocation11 + $0x78] sm:$0xff] %v6319_v38  ;;  %v6325_v5 = vpack.c.bf16 %v6551_v46, %v6550_v43  ;;  %4930 = vmatprep.mubr.bf16.mxu1 %v9168_v33 }
 0x385   :  { %v6510_v17 = vadd.f32 %v4058_v47, %v9463_v60  ;;  %v4060_v1 = vpop.f32.mrb[47].mxu0 }
 0x386   :  { %v6318_v0 = vpack.c.bf16 %v6509_v16, %v6508_v61  ;;  %v6511_v31 = vadd.f32 %v4060_v1, %v9471_v42  ;;  %5682 = vst [vmem:[#allocation11 + $0xa8] sm:$0xff] %v6325_v5  ;;  %v4330_v18 = vpop.f32.mrb[48].mxu1 }
 0x387   :  { %4655 = vmatmul.mubr.bf16.gmra.mrb[112].mxu0 %v9162_v49  ;;  %v6552_v10 = vadd.f32 %v4330_v18, %v9466_v20  ;;  %v4332_v53 = vpop.f32.mrb[49].mxu1 }
 0x388   :  { %5675 = vst [vmem:[#allocation11 + $0x70] sm:$0xff] %v6318_v0  ;;  %v6324_v59 = vpack.c.bf16 %v6511_v31, %v6510_v17  ;;  %4664 = vmatprep.mubr.bf16.mxu0 %v9168_v33  ;;  %v6553_v44 = vadd.f32 %v4332_v53, %v9474_v13  ;;  %v4334_v28 = vpop.f32.mrb[50].mxu1 }
 0x389   :  { %v6554_v33 = vadd.f32 %v4334_v28, %v9466_v20  ;;  %v4336_v25 = vpop.f32.mrb[51].mxu1 }
 0x38a   :  { %5681 = vst [vmem:[#allocation11 + $0xa0] sm:$0xff] %v6324_v59  ;;  %v4064_v7 = vpop.f32.mrb[48].mxu0  ;;  %v6331_v55 = vpack.c.bf16 %v6553_v44, %v6552_v10  ;;  %v6555_v50 = vadd.f32 %v4336_v25, %v9474_v13 }
 0x38b   :  { %v6512_v23 = vadd.f32 %v4064_v7, %v9463_v60  ;;  %v4066_v19 = vpop.f32.mrb[49].mxu0  ;;  %4931 = vmatmul.mubr.bf16.gmra.mrb[116].mxu1 %v9174_v35 }
 0x38c   :  { %v6513_v49 = vadd.f32 %v4066_v19, %v9471_v42  ;;  %v4068_v58 = vpop.f32.mrb[50].mxu0  ;;  %5688 = vst [vmem:[#allocation11 + $0xd8] sm:$0xff] %v6331_v55  ;;  %v6337_v21 = vpack.c.bf16 %v6555_v50, %v6554_v33 }
 0x38d   :  { %v6514_v63 = vadd.f32 %v4068_v58, %v9463_v60  ;;  %v4070_v2 = vpop.f32.mrb[51].mxu0 }
 0x38e   :  { %v6330_v15 = vpack.c.bf16 %v6513_v49, %v6512_v23  ;;  %v6515_v11 = vadd.f32 %v4070_v2, %v9471_v42  ;;  %5694 = vst [vmem:[#allocation11 + $0x108] sm:$0xff] %v6337_v21  ;;  %v4340_v52 = vpop.f32.mrb[52].mxu1 }
 0x38f   :  { %4665 = vmatmul.mubr.bf16.gmra.mrb[116].mxu0 %v9174_v35  ;;  %v6556_v3 = vadd.f32 %v4340_v52, %v9466_v20  ;;  %v4342_v22 = vpop.f32.mrb[53].mxu1 }
 0x390   :  { %5687 = vst [vmem:[#allocation11 + $0xd0] sm:$0xff] %v6330_v15  ;;  %v6336_v48 = vpack.c.bf16 %v6515_v11, %v6514_v63  ;;  %v6557_v36 = vadd.f32 %v4342_v22, %v9474_v13  ;;  %v4344_v35 = vpop.f32.mrb[54].mxu1 }
 0x391   :  { %v6558_v6 = vadd.f32 %v4344_v35, %v9466_v20  ;;  %v4346_v14 = vpop.f32.mrb[55].mxu1 }
 0x392   :  { %5693 = vst [vmem:[#allocation11 + $0x100] sm:$0xff] %v6336_v48  ;;  %v4074_v57 = vpop.f32.mrb[52].mxu0  ;;  %v6343_v27 = vpack.c.bf16 %v6557_v36, %v6556_v3  ;;  %v6559_v29 = vadd.f32 %v4346_v14, %v9474_v13 }
 0x393   :  { %v6516_v32 = vadd.f32 %v4074_v57, %v9463_v60  ;;  %v4076_v8 = vpop.f32.mrb[53].mxu0 }
 0x394   :  { %v6517_v26 = vadd.f32 %v4076_v8, %v9471_v42  ;;  %v4078_v51 = vpop.f32.mrb[54].mxu0  ;;  %5700 = vst [vmem:[#allocation11 + $0x138] sm:$0xff] %v6343_v27  ;;  %v6349_v41 = vpack.c.bf16 %v6559_v29, %v6558_v6 }
 0x395   :  { %v6518_v54 = vadd.f32 %v4078_v51, %v9463_v60  ;;  %v4080_v37 = vpop.f32.mrb[55].mxu0 }
 0x396   :  { %v6342_v12 = vpack.c.bf16 %v6517_v26, %v6516_v32  ;;  %v6519_v62 = vadd.f32 %v4080_v37, %v9471_v42  ;;  %5706 = vst [vmem:[#allocation11 + $0x168] sm:$0xff] %v6349_v41  ;;  %v4350_v24 = vpop.f32.mrb[56].mxu1 }
 0x397   :  { %v6560_v39 = vadd.f32 %v4350_v24, %v9466_v20  ;;  %v4352_v56 = vpop.f32.mrb[57].mxu1 }
 0x398   :  { %5699 = vst [vmem:[#allocation11 + $0x130] sm:$0xff] %v6342_v12  ;;  %v6348_v30 = vpack.c.bf16 %v6519_v62, %v6518_v54  ;;  %v6561_v45 = vadd.f32 %v4352_v56, %v9474_v13  ;;  %v4354_v34 = vpop.f32.mrb[58].mxu1 }
 0x399   :  { %v6562_v43 = vadd.f32 %v4354_v34, %v9466_v20  ;;  %v4356_v9 = vpop.f32.mrb[59].mxu1 }
 0x39a   :  { %5705 = vst [vmem:[#allocation11 + $0x160] sm:$0xff] %v6348_v30  ;;  %v4084_v40 = vpop.f32.mrb[56].mxu0  ;;  %v6355_v38 = vpack.c.bf16 %v6561_v45, %v6560_v39  ;;  %v6563_v46 = vadd.f32 %v4356_v9, %v9474_v13 }
 0x39b   :  { %v6520_v61 = vadd.f32 %v4084_v40, %v9463_v60  ;;  %v4086_v4 = vpop.f32.mrb[57].mxu0 }
 0x39c   :  { %v6521_v16 = vadd.f32 %v4086_v4, %v9471_v42  ;;  %v4088_v47 = vpop.f32.mrb[58].mxu0  ;;  %5712 = vst [vmem:[#allocation11 + $0x198] sm:$0xff] %v6355_v38  ;;  %v6361_v5 = vpack.c.bf16 %v6563_v46, %v6562_v43 }
 0x39d   :  { %v6522_v17 = vadd.f32 %v4088_v47, %v9463_v60  ;;  %v4090_v1 = vpop.f32.mrb[59].mxu0 }
 0x39e   :  { %v6354_v0 = vpack.c.bf16 %v6521_v16, %v6520_v61  ;;  %v6523_v31 = vadd.f32 %v4090_v1, %v9471_v42  ;;  %5718 = vst [vmem:[#allocation11 + $0x1c8] sm:$0xff] %v6361_v5  ;;  %v4360_v18 = vpop.f32.mrb[60].mxu1 }
 0x39f   :  { %v6564_v10 = vadd.f32 %v4360_v18, %v9466_v20  ;;  %v4362_v53 = vpop.f32.mrb[61].mxu1 }
 0x3a0   :  { %5711 = vst [vmem:[#allocation11 + $0x190] sm:$0xff] %v6354_v0  ;;  %v6360_v59 = vpack.c.bf16 %v6523_v31, %v6522_v17  ;;  %v6565_v44 = vadd.f32 %v4362_v53, %v9474_v13  ;;  %v4364_v28 = vpop.f32.mrb[62].mxu1 }
 0x3a1   :  { %v6566_v33 = vadd.f32 %v4364_v28, %v9466_v20  ;;  %v4366_v25 = vpop.f32.mrb[63].mxu1 }
 0x3a2   :  { %5717 = vst [vmem:[#allocation11 + $0x1c0] sm:$0xff] %v6360_v59  ;;  %v4094_v7 = vpop.f32.mrb[60].mxu0  ;;  %v6367_v55 = vpack.c.bf16 %v6565_v44, %v6564_v10  ;;  %v6567_v50 = vadd.f32 %v4366_v25, %v9474_v13 }
 0x3a3   :  { %v6524_v23 = vadd.f32 %v4094_v7, %v9463_v60  ;;  %v4096_v19 = vpop.f32.mrb[61].mxu0 }
 0x3a4   :  { %v6525_v49 = vadd.f32 %v4096_v19, %v9471_v42  ;;  %v4098_v58 = vpop.f32.mrb[62].mxu0  ;;  %5724 = vst [vmem:[#allocation11 + $0x1f8] sm:$0xff] %v6367_v55  ;;  %v6373_v21 = vpack.c.bf16 %v6567_v50, %v6566_v33 }
 0x3a5   :  { %v6526_v63 = vadd.f32 %v4098_v58, %v9463_v60  ;;  %v4100_v2 = vpop.f32.mrb[63].mxu0 }
 0x3a6   :  { %v6366_v15 = vpack.c.bf16 %v6525_v49, %v6524_v23  ;;  %v6527_v11 = vadd.f32 %v4100_v2, %v9471_v42  ;;  %5730 = vst [vmem:[#allocation11 + $0x228] sm:$0xff] %v6373_v21  ;;  %v4370_v52 = vpop.f32.mrb[64].mxu1 }
 0x3a7   :  { %v6568_v3 = vadd.f32 %v4370_v52, %v9466_v20  ;;  %v4372_v22 = vpop.f32.mrb[65].mxu1 }
 0x3a8   :  { %5723 = vst [vmem:[#allocation11 + $0x1f0] sm:$0xff] %v6366_v15  ;;  %v6372_v48 = vpack.c.bf16 %v6527_v11, %v6526_v63  ;;  %v6569_v36 = vadd.f32 %v4372_v22, %v9474_v13  ;;  %v4374_v35 = vpop.f32.mrb[66].mxu1 }
 0x3a9   :  { %v6570_v6 = vadd.f32 %v4374_v35, %v9466_v20  ;;  %v4376_v14 = vpop.f32.mrb[67].mxu1 }
 0x3aa   :  { %5729 = vst [vmem:[#allocation11 + $0x220] sm:$0xff] %v6372_v48  ;;  %v4104_v57 = vpop.f32.mrb[64].mxu0  ;;  %v6379_v27 = vpack.c.bf16 %v6569_v36, %v6568_v3  ;;  %v6571_v29 = vadd.f32 %v4376_v14, %v9474_v13 }
 0x3ab   :  { %v6528_v32 = vadd.f32 %v4104_v57, %v9463_v60  ;;  %v4106_v8 = vpop.f32.mrb[65].mxu0 }
 0x3ac   :  { %v6529_v26 = vadd.f32 %v4106_v8, %v9471_v42  ;;  %v4108_v51 = vpop.f32.mrb[66].mxu0  ;;  %5736 = vst [vmem:[#allocation11 + $0x258] sm:$0xff] %v6379_v27  ;;  %v6385_v41 = vpack.c.bf16 %v6571_v29, %v6570_v6 }
 0x3ad   :  { %v6530_v54 = vadd.f32 %v4108_v51, %v9463_v60  ;;  %v4110_v37 = vpop.f32.mrb[67].mxu0 }
 0x3ae   :  { %v6378_v12 = vpack.c.bf16 %v6529_v26, %v6528_v32  ;;  %v6531_v62 = vadd.f32 %v4110_v37, %v9471_v42  ;;  %5742 = vst [vmem:[#allocation11 + $0x288] sm:$0xff] %v6385_v41  ;;  %v4380_v24 = vpop.f32.mrb[68].mxu1 }
 0x3af   :  { %v6572_v39 = vadd.f32 %v4380_v24, %v9466_v20  ;;  %v4382_v56 = vpop.f32.mrb[69].mxu1  ;;  %v10041_v24 = vld [vmem:[#allocation70_spill] sm:$0xff] }
 0x3b0   :  { %5735 = vst [vmem:[#allocation11 + $0x250] sm:$0xff] %v6378_v12  ;;  %v6384_v30 = vpack.c.bf16 %v6531_v62, %v6530_v54  ;;  %v6573_v45 = vadd.f32 %v4382_v56, %v9474_v13  ;;  %v4384_v34 = vpop.f32.mrb[70].mxu1  ;;  %v10044_v56 = vld [vmem:[#allocation71_spill] sm:$0xff] }
 0x3b1   :  { %v6574_v43 = vadd.f32 %v4384_v34, %v9466_v20  ;;  %v4386_v9 = vpop.f32.mrb[71].mxu1 }
 0x3b2   :  { %5741 = vst [vmem:[#allocation11 + $0x280] sm:$0xff] %v6384_v30  ;;  %v4114_v40 = vpop.f32.mrb[68].mxu0  ;;  %v6391_v38 = vpack.c.bf16 %v6573_v45, %v6572_v39  ;;  %v6575_v46 = vadd.f32 %v4386_v9, %v9474_v13  ;;  %v10043_v39 = vld [vmem:[#allocation69_spill] sm:$0xff] }
 0x3b3   :  { %v6532_v61 = vadd.f32 %v4114_v40, %v9463_v60  ;;  %v4116_v4 = vpop.f32.mrb[69].mxu0  ;;  %v1362_v40 = vld [vmem:[#allocation10 + $0x8] sm:$0xf] }
 0x3b4   :  { %v6533_v16 = vadd.f32 %v4116_v4, %v9471_v42  ;;  %v4118_v47 = vpop.f32.mrb[70].mxu0  ;;  %5748 = vst [vmem:[#allocation11 + $0x2b8] sm:$0xff] %v6391_v38  ;;  %v6397_v5 = vpack.c.bf16 %v6575_v46, %v6574_v43  ;;  %v9573_v4 = vrot.slane %v1362_v40, %v10043_v39 }
 0x3b5   :  { %v6534_v17 = vadd.f32 %v4118_v47, %v9463_v60  ;;  %v4120_v1 = vpop.f32.mrb[71].mxu0 }
 0x3b6   :  { %v6390_v0 = vpack.c.bf16 %v6533_v16, %v6532_v61  ;;  %v6535_v31 = vadd.f32 %v4120_v1, %v9471_v42  ;;  %5754 = vst [vmem:[#allocation11 + $0x2e8] sm:$0xff] %v6397_v5  ;;  %v4390_v18 = vpop.f32.mrb[72].mxu1  ;;  %v9567_v61 = vrot.slane %v1362_v40, %v10041_v24 }
 0x3b7   :  { %v6576_v10 = vadd.f32 %v4390_v18, %v9466_v20  ;;  %v4392_v53 = vpop.f32.mrb[73].mxu1 }
 0x3b8   :  { %5747 = vst [vmem:[#allocation11 + $0x2b0] sm:$0xff] %v6390_v0  ;;  %v6396_v59 = vpack.c.bf16 %v6535_v31, %v6534_v17  ;;  %v6577_v44 = vadd.f32 %v4392_v53, %v9474_v13  ;;  %v4394_v28 = vpop.f32.mrb[74].mxu1 }
 0x3b9   :  { %v6578_v33 = vadd.f32 %v4394_v28, %v9466_v20  ;;  %v4396_v25 = vpop.f32.mrb[75].mxu1 }
 0x3ba   :  { %5753 = vst [vmem:[#allocation11 + $0x2e0] sm:$0xff] %v6396_v59  ;;  %v4124_v7 = vpop.f32.mrb[72].mxu0  ;;  %v6403_v55 = vpack.c.bf16 %v6577_v44, %v6576_v10  ;;  %v6579_v50 = vadd.f32 %v4396_v25, %v9474_v13 }
 0x3bb   :  { %v6536_v23 = vadd.f32 %v4124_v7, %v9463_v60  ;;  %v4126_v19 = vpop.f32.mrb[73].mxu0 }
 0x3bc   :  { %v6537_v49 = vadd.f32 %v4126_v19, %v9471_v42  ;;  %v4128_v58 = vpop.f32.mrb[74].mxu0  ;;  %5760 = vst [vmem:[#allocation11 + $0x318] sm:$0xff] %v6403_v55  ;;  %v6409_v21 = vpack.c.bf16 %v6579_v50, %v6578_v33 }
 0x3bd   :  { %v6538_v63 = vadd.f32 %v4128_v58, %v9463_v60  ;;  %v4130_v2 = vpop.f32.mrb[75].mxu0 }
 0x3be   :  { %v6402_v15 = vpack.c.bf16 %v6537_v49, %v6536_v23  ;;  %v6539_v11 = vadd.f32 %v4130_v2, %v9471_v42  ;;  %5766 = vst [vmem:[#allocation11 + $0x348] sm:$0xff] %v6409_v21  ;;  %v4400_v52 = vpop.f32.mrb[76].mxu1 }
 0x3bf   :  { %v6580_v3 = vadd.f32 %v4400_v52, %v9466_v20  ;;  %v4402_v22 = vpop.f32.mrb[77].mxu1 }
 0x3c0   :  { %5759 = vst [vmem:[#allocation11 + $0x310] sm:$0xff] %v6402_v15  ;;  %v6408_v48 = vpack.c.bf16 %v6539_v11, %v6538_v63  ;;  %v6581_v36 = vadd.f32 %v4402_v22, %v9474_v13  ;;  %v4404_v35 = vpop.f32.mrb[78].mxu1 }
 0x3c1   :  { %v6582_v6 = vadd.f32 %v4404_v35, %v9466_v20  ;;  %v4406_v14 = vpop.f32.mrb[79].mxu1 }
 0x3c2   :  { %5765 = vst [vmem:[#allocation11 + $0x340] sm:$0xff] %v6408_v48  ;;  %v4134_v57 = vpop.f32.mrb[76].mxu0  ;;  %v6415_v27 = vpack.c.bf16 %v6581_v36, %v6580_v3  ;;  %v6583_v29 = vadd.f32 %v4406_v14, %v9474_v13 }
 0x3c3   :  { %v6540_v32 = vadd.f32 %v4134_v57, %v9463_v60  ;;  %v4136_v8 = vpop.f32.mrb[77].mxu0 }
 0x3c4   :  { %v6541_v26 = vadd.f32 %v4136_v8, %v9471_v42  ;;  %v4138_v51 = vpop.f32.mrb[78].mxu0  ;;  %5772 = vst [vmem:[#allocation11 + $0x378] sm:$0xff] %v6415_v27  ;;  %v6421_v41 = vpack.c.bf16 %v6583_v29, %v6582_v6 }
 0x3c5   :  { %v6542_v54 = vadd.f32 %v4138_v51, %v9463_v60  ;;  %v4140_v37 = vpop.f32.mrb[79].mxu0  ;;  %v10042_v60 = vld [vmem:[#allocation72_spill] sm:$0xff] }
 0x3c6   :  { %v6414_v12 = vpack.c.bf16 %v6541_v26, %v6540_v32  ;;  %v6543_v62 = vadd.f32 %v4140_v37, %v9471_v42  ;;  %5778 = vst [vmem:[#allocation11 + $0x3a8] sm:$0x77] %v6421_v41  ;;  %v9570_v20 = vrot.slane %v1362_v40, %v10042_v60  ;;  %v9576_v42 = vrot.slane %v1362_v40, %v10044_v56 }
 0x3c8   :  { %5771 = vst [vmem:[#allocation11 + $0x370] sm:$0xff] %v6414_v12  ;;  %v6420_v30 = vpack.c.bf16 %v6543_v62, %v6542_v54 }
 0x3ca   :  { %5777 = vst [vmem:[#allocation11 + $0x3a0] sm:$0x77] %v6420_v30 }
 0x416   :  { %v4842_v16 = vpop.f32.mrb[80].mxu1 }
 0x417   :  { %v6624_v47 = vadd.f32 %v4842_v16, %v9570_v20  ;;  %v4844_v17 = vpop.f32.mrb[81].mxu1 }
 0x418   :  { %v6625_v1 = vadd.f32 %v4844_v17, %v9576_v42  ;;  %v4846_v0 = vpop.f32.mrb[82].mxu1 }
 0x419   :  { %v6626_v31 = vadd.f32 %v4846_v0, %v9570_v20  ;;  %v4848_v59 = vpop.f32.mrb[83].mxu1 }
 0x41a   :  { %v4576_v13 = vpop.f32.mrb[80].mxu0  ;;  %v6309_v7 = vpack.c.bf16 %v6625_v1, %v6624_v47  ;;  %v6627_v23 = vadd.f32 %v4848_v59, %v9576_v42 }
 0x41b   :  { %v6584_v45 = vadd.f32 %v4576_v13, %v9567_v61  ;;  %v4578_v34 = vpop.f32.mrb[81].mxu0 }
 0x41c   :  { %v6585_v43 = vadd.f32 %v4578_v34, %v9573_v4  ;;  %v4580_v9 = vpop.f32.mrb[82].mxu0  ;;  %5666 = vst [vmem:[#allocation11 + $0x28] sm:$0xff] %v6309_v7  ;;  %v6315_v19 = vpack.c.bf16 %v6627_v23, %v6626_v31 }
 0x41d   :  { %v6586_v38 = vadd.f32 %v4580_v9, %v9567_v61  ;;  %v4582_v46 = vpop.f32.mrb[83].mxu0 }
 0x41e   :  { %v6308_v5 = vpack.c.bf16 %v6585_v43, %v6584_v45  ;;  %v6587_v18 = vadd.f32 %v4582_v46, %v9573_v4  ;;  %5672 = vst [vmem:[#allocation11 + $0x58] sm:$0xff] %v6315_v19  ;;  %v4852_v49 = vpop.f32.mrb[84].mxu1 }
 0x41f   :  { %v6628_v58 = vadd.f32 %v4852_v49, %v9570_v20  ;;  %v4854_v63 = vpop.f32.mrb[85].mxu1 }
 0x420   :  { %5665 = vst [vmem:[#allocation11 + $0x20] sm:$0xff] %v6308_v5  ;;  %v6314_v10 = vpack.c.bf16 %v6587_v18, %v6586_v38  ;;  %v6629_v2 = vadd.f32 %v4854_v63, %v9576_v42  ;;  %v4856_v15 = vpop.f32.mrb[86].mxu1 }
 0x421   :  { %v6630_v11 = vadd.f32 %v4856_v15, %v9570_v20  ;;  %v4858_v48 = vpop.f32.mrb[87].mxu1 }
 0x422   :  { %5671 = vst [vmem:[#allocation11 + $0x50] sm:$0xff] %v6314_v10  ;;  %v4586_v53 = vpop.f32.mrb[84].mxu0  ;;  %v6321_v57 = vpack.c.bf16 %v6629_v2, %v6628_v58  ;;  %v6631_v32 = vadd.f32 %v4858_v48, %v9576_v42 }
 0x423   :  { %v6588_v44 = vadd.f32 %v4586_v53, %v9567_v61  ;;  %v4588_v28 = vpop.f32.mrb[85].mxu0 }
 0x424   :  { %v6589_v33 = vadd.f32 %v4588_v28, %v9573_v4  ;;  %v4590_v25 = vpop.f32.mrb[86].mxu0  ;;  %5678 = vst [vmem:[#allocation11 + $0x88] sm:$0xff] %v6321_v57  ;;  %v6327_v8 = vpack.c.bf16 %v6631_v32, %v6630_v11 }
 0x425   :  { %v6590_v55 = vadd.f32 %v4590_v25, %v9567_v61  ;;  %v4592_v50 = vpop.f32.mrb[87].mxu0 }
 0x426   :  { %v6320_v21 = vpack.c.bf16 %v6589_v33, %v6588_v44  ;;  %v6591_v52 = vadd.f32 %v4592_v50, %v9573_v4  ;;  %5684 = vst [vmem:[#allocation11 + $0xb8] sm:$0xff] %v6327_v8  ;;  %v4862_v26 = vpop.f32.mrb[88].mxu1 }
 0x427   :  { %v6632_v51 = vadd.f32 %v4862_v26, %v9570_v20  ;;  %v4864_v54 = vpop.f32.mrb[89].mxu1 }
 0x428   :  { %5677 = vst [vmem:[#allocation11 + $0x80] sm:$0xff] %v6320_v21  ;;  %v6326_v3 = vpack.c.bf16 %v6591_v52, %v6590_v55  ;;  %v6633_v37 = vadd.f32 %v4864_v54, %v9576_v42  ;;  %v4866_v12 = vpop.f32.mrb[90].mxu1 }
 0x429   :  { %v6634_v62 = vadd.f32 %v4866_v12, %v9570_v20  ;;  %v4868_v30 = vpop.f32.mrb[91].mxu1 }
 0x42a   :  { %5683 = vst [vmem:[#allocation11 + $0xb0] sm:$0xff] %v6326_v3  ;;  %v4596_v22 = vpop.f32.mrb[88].mxu0  ;;  %v6333_v40 = vpack.c.bf16 %v6633_v37, %v6632_v51  ;;  %v6635_v60 = vadd.f32 %v4868_v30, %v9576_v42 }
 0x42b   :  { %v6592_v36 = vadd.f32 %v4596_v22, %v9567_v61  ;;  %v4598_v35 = vpop.f32.mrb[89].mxu0 }
 0x42c   :  { %v6593_v6 = vadd.f32 %v4598_v35, %v9573_v4  ;;  %v4600_v14 = vpop.f32.mrb[90].mxu0  ;;  %5690 = vst [vmem:[#allocation11 + $0xe8] sm:$0xff] %v6333_v40  ;;  %v6339_v56 = vpack.c.bf16 %v6635_v60, %v6634_v62 }
 0x42d   :  { %v6594_v27 = vadd.f32 %v4600_v14, %v9567_v61  ;;  %v4602_v29 = vpop.f32.mrb[91].mxu0 }
 0x42e   :  { %v6332_v41 = vpack.c.bf16 %v6593_v6, %v6592_v36  ;;  %v6595_v24 = vadd.f32 %v4602_v29, %v9573_v4  ;;  %5696 = vst [vmem:[#allocation11 + $0x118] sm:$0xff] %v6339_v56  ;;  %v4872_v16 = vpop.f32.mrb[92].mxu1 }
 0x42f   :  { %v6636_v47 = vadd.f32 %v4872_v16, %v9570_v20  ;;  %v4874_v17 = vpop.f32.mrb[93].mxu1 }
 0x430   :  { %5689 = vst [vmem:[#allocation11 + $0xe0] sm:$0xff] %v6332_v41  ;;  %v6338_v39 = vpack.c.bf16 %v6595_v24, %v6594_v27  ;;  %v6637_v1 = vadd.f32 %v4874_v17, %v9576_v42  ;;  %v4876_v0 = vpop.f32.mrb[94].mxu1 }
 0x431   :  { %v6638_v31 = vadd.f32 %v4876_v0, %v9570_v20  ;;  %v4878_v59 = vpop.f32.mrb[95].mxu1 }
 0x432   :  { %5695 = vst [vmem:[#allocation11 + $0x110] sm:$0xff] %v6338_v39  ;;  %v4606_v13 = vpop.f32.mrb[92].mxu0  ;;  %v6345_v7 = vpack.c.bf16 %v6637_v1, %v6636_v47  ;;  %v6639_v23 = vadd.f32 %v4878_v59, %v9576_v42 }
 0x433   :  { %v6596_v45 = vadd.f32 %v4606_v13, %v9567_v61  ;;  %v4608_v34 = vpop.f32.mrb[93].mxu0 }
 0x434   :  { %v6597_v43 = vadd.f32 %v4608_v34, %v9573_v4  ;;  %v4610_v9 = vpop.f32.mrb[94].mxu0  ;;  %5702 = vst [vmem:[#allocation11 + $0x148] sm:$0xff] %v6345_v7  ;;  %v6351_v19 = vpack.c.bf16 %v6639_v23, %v6638_v31 }
 0x435   :  { %v6598_v38 = vadd.f32 %v4610_v9, %v9567_v61  ;;  %v4612_v46 = vpop.f32.mrb[95].mxu0 }
 0x436   :  { %v6344_v5 = vpack.c.bf16 %v6597_v43, %v6596_v45  ;;  %v6599_v18 = vadd.f32 %v4612_v46, %v9573_v4  ;;  %5708 = vst [vmem:[#allocation11 + $0x178] sm:$0xff] %v6351_v19  ;;  %v4882_v49 = vpop.f32.mrb[96].mxu1 }
 0x437   :  { %v6640_v58 = vadd.f32 %v4882_v49, %v9570_v20  ;;  %v4884_v63 = vpop.f32.mrb[97].mxu1 }
 0x438   :  { %5701 = vst [vmem:[#allocation11 + $0x140] sm:$0xff] %v6344_v5  ;;  %v6350_v10 = vpack.c.bf16 %v6599_v18, %v6598_v38  ;;  %v6641_v2 = vadd.f32 %v4884_v63, %v9576_v42  ;;  %v4886_v15 = vpop.f32.mrb[98].mxu1 }
 0x439   :  { %v6642_v11 = vadd.f32 %v4886_v15, %v9570_v20  ;;  %v4888_v48 = vpop.f32.mrb[99].mxu1 }
 0x43a   :  { %5707 = vst [vmem:[#allocation11 + $0x170] sm:$0xff] %v6350_v10  ;;  %v4616_v53 = vpop.f32.mrb[96].mxu0  ;;  %v6357_v57 = vpack.c.bf16 %v6641_v2, %v6640_v58  ;;  %v6643_v32 = vadd.f32 %v4888_v48, %v9576_v42 }
 0x43b   :  { %v6600_v44 = vadd.f32 %v4616_v53, %v9567_v61  ;;  %v4618_v28 = vpop.f32.mrb[97].mxu0 }
 0x43c   :  { %v6601_v33 = vadd.f32 %v4618_v28, %v9573_v4  ;;  %v4620_v25 = vpop.f32.mrb[98].mxu0  ;;  %5714 = vst [vmem:[#allocation11 + $0x1a8] sm:$0xff] %v6357_v57  ;;  %v6363_v8 = vpack.c.bf16 %v6643_v32, %v6642_v11 }
 0x43d   :  { %v6602_v55 = vadd.f32 %v4620_v25, %v9567_v61  ;;  %v4622_v50 = vpop.f32.mrb[99].mxu0 }
 0x43e   :  { %v6356_v21 = vpack.c.bf16 %v6601_v33, %v6600_v44  ;;  %v6603_v52 = vadd.f32 %v4622_v50, %v9573_v4  ;;  %5720 = vst [vmem:[#allocation11 + $0x1d8] sm:$0xff] %v6363_v8  ;;  %v4892_v26 = vpop.f32.mrb[100].mxu1 }
 0x43f   :  { %v6644_v51 = vadd.f32 %v4892_v26, %v9570_v20  ;;  %v4894_v54 = vpop.f32.mrb[101].mxu1 }
 0x440   :  { %5713 = vst [vmem:[#allocation11 + $0x1a0] sm:$0xff] %v6356_v21  ;;  %v6362_v3 = vpack.c.bf16 %v6603_v52, %v6602_v55  ;;  %v6645_v37 = vadd.f32 %v4894_v54, %v9576_v42  ;;  %v4896_v12 = vpop.f32.mrb[102].mxu1 }
 0x441   :  { %v6646_v62 = vadd.f32 %v4896_v12, %v9570_v20  ;;  %v4898_v30 = vpop.f32.mrb[103].mxu1 }
 0x442   :  { %5719 = vst [vmem:[#allocation11 + $0x1d0] sm:$0xff] %v6362_v3  ;;  %v4626_v22 = vpop.f32.mrb[100].mxu0  ;;  %v6369_v40 = vpack.c.bf16 %v6645_v37, %v6644_v51  ;;  %v6647_v60 = vadd.f32 %v4898_v30, %v9576_v42 }
 0x443   :  { %v6604_v36 = vadd.f32 %v4626_v22, %v9567_v61  ;;  %v4628_v35 = vpop.f32.mrb[101].mxu0 }
 0x444   :  { %v6605_v6 = vadd.f32 %v4628_v35, %v9573_v4  ;;  %v4630_v14 = vpop.f32.mrb[102].mxu0  ;;  %5726 = vst [vmem:[#allocation11 + $0x208] sm:$0xff] %v6369_v40  ;;  %v6375_v56 = vpack.c.bf16 %v6647_v60, %v6646_v62 }
 0x445   :  { %v6606_v27 = vadd.f32 %v4630_v14, %v9567_v61  ;;  %v4632_v29 = vpop.f32.mrb[103].mxu0 }
 0x446   :  { %v6368_v41 = vpack.c.bf16 %v6605_v6, %v6604_v36  ;;  %v6607_v24 = vadd.f32 %v4632_v29, %v9573_v4  ;;  %5732 = vst [vmem:[#allocation11 + $0x238] sm:$0xff] %v6375_v56  ;;  %v4902_v16 = vpop.f32.mrb[104].mxu1 }
 0x447   :  { %v6648_v47 = vadd.f32 %v4902_v16, %v9570_v20  ;;  %v4904_v17 = vpop.f32.mrb[105].mxu1 }
 0x448   :  { %5725 = vst [vmem:[#allocation11 + $0x200] sm:$0xff] %v6368_v41  ;;  %v6374_v39 = vpack.c.bf16 %v6607_v24, %v6606_v27  ;;  %v6649_v1 = vadd.f32 %v4904_v17, %v9576_v42  ;;  %v4906_v0 = vpop.f32.mrb[106].mxu1 }
 0x449   :  { %v6650_v31 = vadd.f32 %v4906_v0, %v9570_v20  ;;  %v4908_v59 = vpop.f32.mrb[107].mxu1 }
 0x44a   :  { %5731 = vst [vmem:[#allocation11 + $0x230] sm:$0xff] %v6374_v39  ;;  %v4636_v13 = vpop.f32.mrb[104].mxu0  ;;  %v6381_v7 = vpack.c.bf16 %v6649_v1, %v6648_v47  ;;  %v6651_v23 = vadd.f32 %v4908_v59, %v9576_v42 }
 0x44b   :  { %v6608_v45 = vadd.f32 %v4636_v13, %v9567_v61  ;;  %v4638_v34 = vpop.f32.mrb[105].mxu0 }
 0x44c   :  { %v6609_v43 = vadd.f32 %v4638_v34, %v9573_v4  ;;  %v4640_v9 = vpop.f32.mrb[106].mxu0  ;;  %5738 = vst [vmem:[#allocation11 + $0x268] sm:$0xff] %v6381_v7  ;;  %v6387_v19 = vpack.c.bf16 %v6651_v23, %v6650_v31 }
 0x44d   :  { %v6610_v38 = vadd.f32 %v4640_v9, %v9567_v61  ;;  %v4642_v46 = vpop.f32.mrb[107].mxu0 }
 0x44e   :  { %v6380_v5 = vpack.c.bf16 %v6609_v43, %v6608_v45  ;;  %v6611_v18 = vadd.f32 %v4642_v46, %v9573_v4  ;;  %5744 = vst [vmem:[#allocation11 + $0x298] sm:$0xff] %v6387_v19  ;;  %v4912_v49 = vpop.f32.mrb[108].mxu1 }
 0x44f   :  { %v6652_v58 = vadd.f32 %v4912_v49, %v9570_v20  ;;  %v4914_v63 = vpop.f32.mrb[109].mxu1 }
 0x450   :  { %5737 = vst [vmem:[#allocation11 + $0x260] sm:$0xff] %v6380_v5  ;;  %v6386_v10 = vpack.c.bf16 %v6611_v18, %v6610_v38  ;;  %v6653_v2 = vadd.f32 %v4914_v63, %v9576_v42  ;;  %v4916_v15 = vpop.f32.mrb[110].mxu1 }
 0x451   :  { %v6654_v11 = vadd.f32 %v4916_v15, %v9570_v20  ;;  %v4918_v48 = vpop.f32.mrb[111].mxu1 }
 0x452   :  { %5743 = vst [vmem:[#allocation11 + $0x290] sm:$0xff] %v6386_v10  ;;  %v4646_v53 = vpop.f32.mrb[108].mxu0  ;;  %v6393_v57 = vpack.c.bf16 %v6653_v2, %v6652_v58  ;;  %v6655_v32 = vadd.f32 %v4918_v48, %v9576_v42 }
 0x453   :  { %v6612_v44 = vadd.f32 %v4646_v53, %v9567_v61  ;;  %v4648_v28 = vpop.f32.mrb[109].mxu0 }
 0x454   :  { %v6613_v33 = vadd.f32 %v4648_v28, %v9573_v4  ;;  %v4650_v25 = vpop.f32.mrb[110].mxu0  ;;  %5750 = vst [vmem:[#allocation11 + $0x2c8] sm:$0xff] %v6393_v57  ;;  %v6399_v8 = vpack.c.bf16 %v6655_v32, %v6654_v11 }
 0x455   :  { %v6614_v55 = vadd.f32 %v4650_v25, %v9567_v61  ;;  %v4652_v50 = vpop.f32.mrb[111].mxu0 }
 0x456   :  { %v6392_v21 = vpack.c.bf16 %v6613_v33, %v6612_v44  ;;  %v6615_v52 = vadd.f32 %v4652_v50, %v9573_v4  ;;  %5756 = vst [vmem:[#allocation11 + $0x2f8] sm:$0xff] %v6399_v8  ;;  %v4922_v26 = vpop.f32.mrb[112].mxu1 }
 0x457   :  { %v6656_v51 = vadd.f32 %v4922_v26, %v9570_v20  ;;  %v4924_v54 = vpop.f32.mrb[113].mxu1 }
 0x458   :  { %5749 = vst [vmem:[#allocation11 + $0x2c0] sm:$0xff] %v6392_v21  ;;  %v6398_v3 = vpack.c.bf16 %v6615_v52, %v6614_v55  ;;  %v6657_v37 = vadd.f32 %v4924_v54, %v9576_v42  ;;  %v4926_v12 = vpop.f32.mrb[114].mxu1 }
 0x459   :  { %v6658_v62 = vadd.f32 %v4926_v12, %v9570_v20  ;;  %v4928_v30 = vpop.f32.mrb[115].mxu1 }
 0x45a   :  { %5755 = vst [vmem:[#allocation11 + $0x2f0] sm:$0xff] %v6398_v3  ;;  %v4656_v22 = vpop.f32.mrb[112].mxu0  ;;  %v6405_v40 = vpack.c.bf16 %v6657_v37, %v6656_v51  ;;  %v6659_v60 = vadd.f32 %v4928_v30, %v9576_v42 }
 0x45b   :  { %v6616_v36 = vadd.f32 %v4656_v22, %v9567_v61  ;;  %v4658_v35 = vpop.f32.mrb[113].mxu0 }
 0x45c   :  { %v6617_v6 = vadd.f32 %v4658_v35, %v9573_v4  ;;  %v4660_v14 = vpop.f32.mrb[114].mxu0  ;;  %5762 = vst [vmem:[#allocation11 + $0x328] sm:$0xff] %v6405_v40  ;;  %v6411_v56 = vpack.c.bf16 %v6659_v60, %v6658_v62 }
 0x45d   :  { %v6618_v27 = vadd.f32 %v4660_v14, %v9567_v61  ;;  %v4662_v29 = vpop.f32.mrb[115].mxu0 }
 0x45e   :  { %v6404_v41 = vpack.c.bf16 %v6617_v6, %v6616_v36  ;;  %v6619_v24 = vadd.f32 %v4662_v29, %v9573_v4  ;;  %5768 = vst [vmem:[#allocation11 + $0x358] sm:$0xff] %v6411_v56  ;;  %v4932_v16 = vpop.f32.mrb[116].mxu1 }
 0x45f   :  { %v6660_v47 = vadd.f32 %v4932_v16, %v9570_v20  ;;  %v4934_v17 = vpop.f32.mrb[117].mxu1 }
 0x460   :  { %5761 = vst [vmem:[#allocation11 + $0x320] sm:$0xff] %v6404_v41  ;;  %v6410_v39 = vpack.c.bf16 %v6619_v24, %v6618_v27  ;;  %v6661_v1 = vadd.f32 %v4934_v17, %v9576_v42  ;;  %v4936_v0 = vpop.f32.mrb[118].mxu1 }
 0x461   :  { %v6662_v31 = vadd.f32 %v4936_v0, %v9570_v20  ;;  %v4938_v59 = vpop.f32.mrb[119].mxu1 }
 0x462   :  { %5767 = vst [vmem:[#allocation11 + $0x350] sm:$0xff] %v6410_v39  ;;  %v4666_v13 = vpop.f32.mrb[116].mxu0  ;;  %v6417_v7 = vpack.c.bf16 %v6661_v1, %v6660_v47  ;;  %v6663_v23 = vadd.f32 %v4938_v59, %v9576_v42 }
 0x463   :  { %v6620_v45 = vadd.f32 %v4666_v13, %v9567_v61  ;;  %v4668_v34 = vpop.f32.mrb[117].mxu0 }
 0x464   :  { %v6621_v43 = vadd.f32 %v4668_v34, %v9573_v4  ;;  %v4670_v9 = vpop.f32.mrb[118].mxu0  ;;  %5774 = vst [vmem:[#allocation11 + $0x388] sm:$0xff] %v6417_v7  ;;  %v6423_v19 = vpack.c.bf16 %v6663_v23, %v6662_v31 }
 0x465   :  { %v6622_v38 = vadd.f32 %v4670_v9, %v9567_v61  ;;  %v4672_v46 = vpop.f32.mrb[119].mxu0 }
 0x466   :  { %v6416_v5 = vpack.c.bf16 %v6621_v43, %v6620_v45  ;;  %v6623_v18 = vadd.f32 %v4672_v46, %v9573_v4  ;;  %5780 = vst [vmem:[#allocation11 + $0x3b8] sm:$0x77] %v6423_v19 }
 0x468   :  { %5773 = vst [vmem:[#allocation11 + $0x380] sm:$0xff] %v6416_v5  ;;  %v6422_v10 = vpack.c.bf16 %v6623_v18, %v6622_v38 }
 0x46a   :  { %5779 = vst [vmem:[#allocation11 + $0x3b0] sm:$0x77] %v6422_v10 }
 0x46b   :  { %7651 = shalt.err (!%p7648_p2)
}
 0x46c   :  { %s7652_s7 = scalar_lea.hbm %s9678_s5, 15360 }
 0x46d   :  { %p7653_p3 = scmp.ne.s32.totalorder %s9678_s5, %s7652_s7  ;;  %p7656_p4 = scmp.lt.u32.totalorder %s7652_s7, %s9678_s5 }
 0x46f   :  { %p7658_p5 = pnand %p7656_p4, %p7653_p3 }
 0x471   :  { %7661 = shalt.err (!%p7658_p5)
}
 0x472   :  { %5792 = dma.vmem_to_hbm [thread:$0]  %s5787_s21, 15360, %s9678_s5, [#allocation4], %s7672_s1, %s7672_s1, %s7673_s15  }
 0x473   :  { %7668 = dma.done.wait [#allocation4], 15360  }
 0x474   :  { %7669 = vsyncadd [#allocation4], 4294951936 }
 0x475   :  { %5796 = vsyncpa [#allocation3], 1 }
 0x476   :  { %5797 = vsyncpa [#allocation6], 1 }
 0x477   :  { %5798 = vsyncpa [#allocation9], 1 }
 0x478   :  { %5799 = vsyncpa [#allocation4], 1 }

</bundles_post_ra>
